<compile_context>
chip_gen: v7x
topology: tpu7x:2x2x1
jax: 0.10.0
libtpu: 0.0.40
codegen_flags: <defaults>
</compile_context>

<pallas_src>
import functools

import jax
import jax.numpy as jnp
from jax import lax
from jax.experimental import pallas as pl
from jax.experimental.pallas import tpu as pltpu

MLP_LEAKY_SLOPE = 0.2  # stand-in for consts.MLP_LEAKY_SLOPE
_HIGH = lax.Precision.HIGHEST


def _leaky(x):
    return jnp.where(x > 0, x, MLP_LEAKY_SLOPE * x)


def _round_up(x, m):
    return ((x + m - 1) // m) * m


def _dot(a, b):
    return jnp.dot(a, b, preferred_element_type=jnp.float32, precision=_HIGH)


# ----------------------------------------------------------------------------
# In-kernel helpers
# ----------------------------------------------------------------------------
def _geom_mean(geom_blk, wg, bg, k):
    """geom_blk: (tile*k, 4) flattened n-major/k-minor. Returns (tile, d_lfa) mean over k of
    leaky(geom @ Wg + bg). One MXU push + a selector matmul for the K-reduction."""
    tile_k = geom_blk.shape[0]
    tile = tile_k // k
    g = _leaky(_dot(geom_blk, wg) + bg)                          # (tile*k, d_lfa)
    rows = lax.broadcasted_iota(jnp.int32, (tile, tile_k), 0)
    cols = lax.broadcasted_iota(jnp.int32, (tile, tile_k), 1)
    sel = ((cols >= rows * k) & (cols < (rows + 1) * k)).astype(jnp.float32)
    return _dot(sel, g) * (1.0 / k)                              # (tile, d_lfa)


def _neighbor_mean(table, idx, k):
    """Mean over K neighbors of the full resident feature table, via a one-hot averaging matmul.
    table: (n_pad, d_in) value, idx: (tile, k) int32. Returns (tile, d_in)."""
    tile = idx.shape[0]
    n_tab = table.shape[0]
    col_ids = lax.broadcasted_iota(jnp.int32, (tile, n_tab), 1)
    a = jnp.zeros((tile, n_tab), jnp.float32)
    for j in range(k):  # static, small K
        a = a + (idx[:, j:j + 1] == col_ids).astype(jnp.float32)
    return _dot(a, table) * (1.0 / k)                            # (tile, d_in)


# ----------------------------------------------------------------------------
# Kernel 1: fused head of a residual block
#   residual = leaky(pf @ W_res + b_res) ;  act0 = leaky(pf @ W_init + b_init)
# ----------------------------------------------------------------------------
def _head_kernel(pf_ref, wr_ref, br_ref, wi_ref, bi_ref, res_ref, act_ref):
    x = pf_ref[...]
    res_ref[...] = _leaky(_dot(x, wr_ref[...]) + br_ref[...]).astype(res_ref.dtype)
    act_ref[...] = _leaky(_dot(x, wi_ref[...]) + bi_ref[...]).astype(act_ref.dtype)


def fused_head(pf, w_res, b_res, w_init, b_init, *, tile):
    n_pad, d = pf.shape
    d4 = w_init.shape[1]
    return pl.pallas_call(
        _head_kernel,
        out_shape=(jax.ShapeDtypeStruct((n_pad, d), jnp.float32),
                   jax.ShapeDtypeStruct((n_pad, d4), jnp.float32)),
        grid=(n_pad // tile,),
        in_specs=[
            pl.BlockSpec((tile, d), lambda i: (i, 0)),
            pl.BlockSpec((d, d), lambda i: (0, 0)),
            pl.BlockSpec((1, d), lambda i: (0, 0)),
            pl.BlockSpec((d, d4), lambda i: (0, 0)),
            pl.BlockSpec((1, d4), lambda i: (0, 0)),
        ],
        out_specs=(pl.BlockSpec((tile, d), lambda i: (i, 0)),
                   pl.BlockSpec((tile, d4), lambda i: (i, 0))),
        compiler_params=pltpu.CompilerParams(dimension_semantics=("parallel",)),
    )(pf, w_res, b_res.reshape(1, d), w_init, b_init.reshape(1, d4))


# ----------------------------------------------------------------------------
# Kernel 2: LFA with resident feature table
#   out = [ mean_k(leaky(geom@Wg+bg)) | mean_k(table[idx]) ]     (two direct slice stores)
# ----------------------------------------------------------------------------
def _lfa_kernel(table_ref, geom_ref, idx_ref, wg_ref, bg_ref, o_ref):
    k = idx_ref.shape[1]
    d_lfa = wg_ref.shape[1]
    gm = _geom_mean(geom_ref[...], wg_ref[...], bg_ref[...], k)
    fm = _neighbor_mean(table_ref[...], idx_ref[...], k)
    o_ref[:, :d_lfa] = gm.astype(o_ref.dtype)
    o_ref[:, d_lfa:] = fm.astype(o_ref.dtype)


def lfa_block(table, geom_flat, idx, wg, bg, *, tile):
    n_pad, d_in = table.shape
    k = idx.shape[1]
    d_lfa = wg.shape[1]
    return pl.pallas_call(
        _lfa_kernel,
        out_shape=jax.ShapeDtypeStruct((n_pad, d_lfa + d_in), jnp.float32),
        grid=(n_pad // tile,),
        in_specs=[
            pl.BlockSpec((n_pad, d_in), lambda i: (0, 0)),     # full table, resident in VMEM
            pl.BlockSpec((tile * k, 4), lambda i: (i, 0)),
            pl.BlockSpec((tile, k), lambda i: (i, 0)),
            pl.BlockSpec((4, d_lfa), lambda i: (0, 0)),
            pl.BlockSpec((1, d_lfa), lambda i: (0, 0)),
        ],
        out_specs=pl.BlockSpec((tile, d_lfa + d_in), lambda i: (i, 0)),
        compiler_params=pltpu.CompilerParams(dimension_semantics=("parallel",)),
    )(table, geom_flat, idx, wg, bg.reshape(1, d_lfa))


# ----------------------------------------------------------------------------
# Kernel 3: LFA2 + mlp_final + residual add + final activation, fully fused.
#   lfa2 = [gm | fm]  (never materialized: W_fin is pre-split into top/bottom halves)
#   out  = leaky( leaky(gm@Wf_top + fm@Wf_bot + b_fin) + residual )
# ----------------------------------------------------------------------------
def _lfa_final_kernel(table_ref, geom_ref, idx_ref, wg_ref, bg_ref,
                      wft_ref, wfb_ref, bf_ref, res_ref, o_ref):
    k = idx_ref.shape[1]
    gm = _geom_mean(geom_ref[...], wg_ref[...], bg_ref[...], k)      # (tile, d/2)
    fm = _neighbor_mean(table_ref[...], idx_ref[...], k)             # (tile, d/2)
    y = _dot(gm, wft_ref[...]) + _dot(fm, wfb_ref[...]) + bf_ref[...]
    y = _leaky(y)
    o_ref[...] = _leaky(y + res_ref[...]).astype(o_ref.dtype)


def lfa_final_block(table, geom_flat, idx, wg, bg, wf_top, wf_bot, bf, residual, *, tile):
    n_pad, d_in = table.shape
    k = idx.shape[1]
    d_lfa = wg.shape[1]
    d_out = wf_top.shape[1]
    return pl.pallas_call(
        _lfa_final_kernel,
        out_shape=jax.ShapeDtypeStruct((n_pad, d_out), jnp.float32),
        grid=(n_pad // tile,),
        in_specs=[
            pl.BlockSpec((n_pad, d_in), lambda i: (0, 0)),     # full table, resident in VMEM
            pl.BlockSpec((tile * k, 4), lambda i: (i, 0)),
            pl.BlockSpec((tile, k), lambda i: (i, 0)),
            pl.BlockSpec((4, d_lfa), lambda i: (0, 0)),
            pl.BlockSpec((1, d_lfa), lambda i: (0, 0)),
            pl.BlockSpec((d_lfa, d_out), lambda i: (0, 0)),
            pl.BlockSpec((d_in, d_out), lambda i: (0, 0)),
            pl.BlockSpec((1, d_out), lambda i: (0, 0)),
            pl.BlockSpec((tile, d_out), lambda i: (i, 0)),
        ],
        out_specs=pl.BlockSpec((tile, d_out), lambda i: (i, 0)),
        compiler_params=pltpu.CompilerParams(dimension_semantics=("parallel",)),
    )(table, geom_flat, idx, wg, bg.reshape(1, d_lfa),
      wf_top, wf_bot, bf.reshape(1, d_out), residual)


# ----------------------------------------------------------------------------
# Kernel 4: plain SharedMLP (final_mlp)   y = leaky(x @ W + b)
# ----------------------------------------------------------------------------
def _mlp_kernel(x_ref, w_ref, b_ref, o_ref):
    y = _dot(x_ref[...], w_ref[...]) + b_ref[...]
    o_ref[...] = _leaky(y).astype(o_ref.dtype)


def shared_mlp(x, w, b, *, tile):
    n_pad, d_in = x.shape
    d_out = w.shape[1]
    return pl.pallas_call(
        _mlp_kernel,
        out_shape=jax.ShapeDtypeStruct((n_pad, d_out), jnp.float32),
        grid=(n_pad // tile,),
        in_specs=[
            pl.BlockSpec((tile, d_in), lambda i: (i, 0)),
            pl.BlockSpec((d_in, d_out), lambda i: (0, 0)),
            pl.BlockSpec((1, d_out), lambda i: (0, 0)),
        ],
        out_specs=pl.BlockSpec((tile, d_out), lambda i: (i, 0)),
        compiler_params=pltpu.CompilerParams(dimension_semantics=("parallel",)),
    )(x, w, b.reshape(1, d_out))


# ----------------------------------------------------------------------------
# Parameter construction (deterministic, synthetic; Linear stored as (in, out))
# ----------------------------------------------------------------------------
def _init_linear(key, d_in, d_out):
    kw, kb = jax.random.split(key)
    w = jax.random.normal(kw, (d_in, d_out), jnp.float32) * 0.1
    b = jax.random.normal(kb, (d_out,), jnp.float32) * 0.05
    return w, b


def init_student_teacher(key, k, d, num_residuals):
    # NOTE: only arrays live in the params pytree; k/d are recovered statically from shapes.
    params = {"residuals": []}
    for _ in range(num_residuals):
        key, k1, k2, k3, k4, k5 = jax.random.split(key, 6)
        w_res, b_res = _init_linear(k1, d, d)          # mlp_resiudal
        w_init, b_init = _init_linear(k2, d, d // 4)   # mlp_initial
        wg1, bg1 = _init_linear(k3, 4, d // 4)         # lfa1.mlp
        wg2, bg2 = _init_linear(k4, 4, d // 2)         # lfa2.mlp
        w_fin, b_fin = _init_linear(k5, d, d)          # mlp_final
        params["residuals"].append(dict(
            w_res=w_res, b_res=b_res, w_init=w_init, b_init=b_init,
            wg1=wg1, bg1=bg1, wg2=wg2, bg2=bg2, w_fin=w_fin, b_fin=b_fin))
    key, kf = jax.random.split(key)
    params["w_out"], params["b_out"] = _init_linear(kf, d, d)  # final_mlp
    return params


# ----------------------------------------------------------------------------
# Forward (Pallas kernels for all MLP / LFA compute)
# ----------------------------------------------------------------------------
@functools.partial(jax.jit, static_argnames=("tile_rows",))
def student_teacher_forward(params, points, geom_features, closest_indices, *, tile_rows=256):
    n = points.shape[0]
    # Static shape-derived sizes (NOT traced values -> safe for shape math under jit).
    d = params["w_out"].shape[0]
    k = closest_indices.shape[1]

    # Pad N once to a multiple of the row tile (no whole-array fallback; v7x-safe, pipelined).
    tile = min(tile_rows, _round_up(n, 8))
    n_pad = _round_up(n, tile)
    pad = n_pad - n
    geom = jnp.pad(geom_features.astype(jnp.float32), ((0, pad), (0, 0), (0, 0)))
    idx = jnp.pad(closest_indices.astype(jnp.int32), ((0, pad), (0, 0)))
    geom_flat = geom.reshape(n_pad * k, 4)            # n-major, k-minor for the flattened geom dot

    pf = jnp.zeros((n_pad, d), jnp.float32)
    d_half = d // 2
    for rp in params["residuals"]:
        residual, act0 = fused_head(pf, rp["w_res"], rp["b_res"],
                                    rp["w_init"], rp["b_init"], tile=tile)      # (N,d), (N,d/4)
        lfa1_out = lfa_block(act0, geom_flat, idx, rp["wg1"], rp["bg1"], tile=tile)  # (N, d/2)
        pf = lfa_final_block(lfa1_out, geom_flat, idx, rp["wg2"], rp["bg2"],
                             rp["w_fin"][:d_half, :], rp["w_fin"][d_half:, :],
                             rp["b_fin"], residual, tile=tile)                  # (N, d)
    out = shared_mlp(pf, params["w_out"], params["b_out"], tile=tile)
    return out[:n]


# ----------------------------------------------------------------------------
# Pure-JAX reference for correctness checking
# ----------------------------------------------------------------------------
def _ref_mlp(x, w, b):
    return _leaky(jnp.dot(x, w, precision="highest") + b)


def _ref_lfa(x, geom, idx, wg, bg):
    g = _leaky(jnp.einsum("nkc,cd->nkd", geom, wg, precision="highest") + bg)
    gath = jnp.take(x, idx, axis=0)
    return jnp.concatenate([g, gath], axis=-1).mean(axis=1)


def _ref_forward(params, points, geom, idx):
    n = points.shape[0]
    d = params["w_out"].shape[0]
    pf = jnp.zeros((n, d), jnp.float32)
    for rp in params["residuals"]:
        residual = _ref_mlp(pf, rp["w_res"], rp["b_res"])
        act = _ref_mlp(pf, rp["w_init"], rp["b_init"])
        act = _ref_lfa(act, geom, idx, rp["wg1"], rp["bg1"])
        act = _ref_lfa(act, geom, idx, rp["wg2"], rp["bg2"])
        act = _ref_mlp(act, rp["w_fin"], rp["b_fin"])
        pf = _leaky(act + residual)
    return _ref_mlp(pf, params["w_out"], params["b_out"])


if __name__ == "__main__":
    key = jax.random.PRNGKey(0)
    # N deliberately not a multiple of 8 to exercise the pad-to-tile path.
    N, K, D, NUM_RES = 20, 4, 32, 2

    kp, kg, ki, kparams = jax.random.split(key, 4)
    points = jax.random.normal(kp, (N, 3), jnp.float32)
    geom_features = jax.random.normal(kg, (N, K, 4), jnp.float32)
    closest_indices = jax.random.randint(ki, (N, K), 0, N, jnp.int32)

    params = init_student_teacher(kparams, K, D, NUM_RES)

    out = student_teacher_forward(params, points, geom_features, closest_indices)
    out = jax.block_until_ready(out)

    ref = _ref_forward(params, points, geom_features, closest_indices)
    assert out.shape == (N, D)
    assert jnp.allclose(out, ref, atol=1e-4, rtol=1e-4), "mismatch vs JAX reference"

    print("KERNEL_OK")
</pallas_src>

<mosaic_0001>
module attributes {stable_mosaic.version = 11 : i64} {
  func.func @_lfa_kernel(%arg0: i32, %arg1: memref<24x8xf32, #tpu.memory_space<vmem>>, %arg2: memref<96x4xf32, #tpu.memory_space<vmem>>, %arg3: memref<24x4xi32, #tpu.memory_space<vmem>>, %arg4: memref<4x8xf32, #tpu.memory_space<vmem>>, %arg5: memref<1x8xf32, #tpu.memory_space<vmem>>, %arg6: memref<24x16xf32, #tpu.memory_space<vmem>>) attributes {dimension_semantics = [#tpu.dimension_semantics<parallel>], iteration_bounds = array<i64: 1>, scalar_prefetch = 0 : i64, scratch_operands = 0 : i64, tpu.core_type = #tpu.core_type<tc>, window_params = [{pipeline_mode = #tpu.pipeline_mode<synchronous>, transform_indices = @transform_0, window_bounds = array<i64: 24, 8>}, {transform_indices = @transform_1, window_bounds = array<i64: 96, 4>}, {transform_indices = @transform_2, window_bounds = array<i64: 24, 4>}, {pipeline_mode = #tpu.pipeline_mode<synchronous>, transform_indices = @transform_3, window_bounds = array<i64: 4, 8>}, {pipeline_mode = #tpu.pipeline_mode<synchronous>, transform_indices = @transform_4, window_bounds = array<i64: 1, 8>}, {transform_indices = @transform_5, window_bounds = array<i64: 24, 16>}]} {
    %c0 = arith.constant 0 : index
    %c0_0 = arith.constant 0 : index
    %0 = vector.load %arg2[%c0, %c0_0] : memref<96x4xf32, #tpu.memory_space<vmem>>, vector<96x4xf32>
    %c0_1 = arith.constant 0 : index
    %c0_2 = arith.constant 0 : index
    %1 = vector.load %arg4[%c0_1, %c0_2] : memref<4x8xf32, #tpu.memory_space<vmem>>, vector<4x8xf32>
    %c0_3 = arith.constant 0 : index
    %c0_4 = arith.constant 0 : index
    %2 = vector.load %arg5[%c0_3, %c0_4] : memref<1x8xf32, #tpu.memory_space<vmem>>, vector<1x8xf32>
    %cst = arith.constant dense<0.000000e+00> : vector<96x8xf32>
    %3 = tpu.matmul %0, %1, %cst {dimension_numbers = #tpu.dot_dimension_numbers<[1], [0], [0], [1], [0, 0, 1, 1], [], []>, precision = #tpu.contract_precision<fp32>} : vector<96x4xf32>, vector<4x8xf32>, vector<96x8xf32> -> vector<96x8xf32>
    %4 = vector.broadcast %2 : vector<1x8xf32> to vector<96x8xf32>
    %5 = arith.addf %3, %4 : vector<96x8xf32>
    %cst_5 = arith.constant 0.000000e+00 : f32
    %6 = vector.broadcast %cst_5 : f32 to vector<96x8xf32>
    %7 = arith.cmpf ogt, %5, %6 : vector<96x8xf32>
    %cst_6 = arith.constant 2.000000e-01 : f32
    %8 = vector.broadcast %cst_6 : f32 to vector<96x8xf32>
    %9 = arith.mulf %8, %5 : vector<96x8xf32>
    %10 = arith.select %7, %5, %9 : vector<96x8xi1>, vector<96x8xf32>
    %11 = tpu.iota {dimensions = array<i32: 0>} : vector<24x96xi32>
    %12 = tpu.iota {dimensions = array<i32: 1>} : vector<24x96xi32>
    %c4_i32 = arith.constant 4 : i32
    %13 = vector.broadcast %c4_i32 : i32 to vector<24x96xi32>
    %14 = arith.muli %11, %13 : vector<24x96xi32>
    %15 = arith.cmpi sge, %12, %14 : vector<24x96xi32>
    %c1_i32 = arith.constant 1 : i32
    %16 = vector.broadcast %c1_i32 : i32 to vector<24x96xi32>
    %17 = arith.addi %11, %16 : vector<24x96xi32>
    %c4_i32_7 = arith.constant 4 : i32
    %18 = vector.broadcast %c4_i32_7 : i32 to vector<24x96xi32>
    %19 = arith.muli %17, %18 : vector<24x96xi32>
    %20 = arith.cmpi slt, %12, %19 : vector<24x96xi32>
    %21 = arith.andi %15, %20 : vector<24x96xi1>
    %22 = arith.extui %21 : vector<24x96xi1> to vector<24x96xi32>
    %23 = arith.sitofp %22 : vector<24x96xi32> to vector<24x96xf32>
    %cst_8 = arith.constant dense<0.000000e+00> : vector<24x8xf32>
    %24 = tpu.matmul %23, %10, %cst_8 {dimension_numbers = #tpu.dot_dimension_numbers<[1], [0], [0], [1], [0, 0, 1, 1], [], []>, precision = #tpu.contract_precision<fp32>} : vector<24x96xf32>, vector<96x8xf32>, vector<24x8xf32> -> vector<24x8xf32>
    %cst_9 = arith.constant 2.500000e-01 : f32
    %25 = vector.broadcast %cst_9 : f32 to vector<24x8xf32>
    %26 = arith.mulf %24, %25 : vector<24x8xf32>
    %c0_10 = arith.constant 0 : index
    %c0_11 = arith.constant 0 : index
    %27 = vector.load %arg1[%c0_10, %c0_11] : memref<24x8xf32, #tpu.memory_space<vmem>>, vector<24x8xf32>
    %c0_12 = arith.constant 0 : index
    %c0_13 = arith.constant 0 : index
    %28 = vector.load %arg3[%c0_12, %c0_13] : memref<24x4xi32, #tpu.memory_space<vmem>>, vector<24x4xi32>
    %29 = tpu.iota {dimensions = array<i32: 1>} : vector<24x24xi32>
    %cst_14 = arith.constant 0.000000e+00 : f32
    %30 = vector.broadcast %cst_14 : f32 to vector<24x24xf32>
    %31 = vector.extract_strided_slice %28 {offsets = [0, 0], sizes = [24, 1], strides = [1, 1]} : vector<24x4xi32> to vector<24x1xi32>
    %32 = vector.broadcast %31 : vector<24x1xi32> to vector<24x24xi32>
    %33 = arith.cmpi eq, %32, %29 : vector<24x24xi32>
    %34 = arith.extui %33 : vector<24x24xi1> to vector<24x24xi32>
    %35 = arith.sitofp %34 : vector<24x24xi32> to vector<24x24xf32>
    %36 = arith.addf %30, %35 : vector<24x24xf32>
    %37 = vector.extract_strided_slice %28 {offsets = [0, 1], sizes = [24, 1], strides = [1, 1]} : vector<24x4xi32> to vector<24x1xi32>
    %38 = vector.broadcast %37 : vector<24x1xi32> to vector<24x24xi32>
    %39 = arith.cmpi eq, %38, %29 : vector<24x24xi32>
    %40 = arith.extui %39 : vector<24x24xi1> to vector<24x24xi32>
    %41 = arith.sitofp %40 : vector<24x24xi32> to vector<24x24xf32>
    %42 = arith.addf %36, %41 : vector<24x24xf32>
    %43 = vector.extract_strided_slice %28 {offsets = [0, 2], sizes = [24, 1], strides = [1, 1]} : vector<24x4xi32> to vector<24x1xi32>
    %44 = vector.broadcast %43 : vector<24x1xi32> to vector<24x24xi32>
    %45 = arith.cmpi eq, %44, %29 : vector<24x24xi32>
    %46 = arith.extui %45 : vector<24x24xi1> to vector<24x24xi32>
    %47 = arith.sitofp %46 : vector<24x24xi32> to vector<24x24xf32>
    %48 = arith.addf %42, %47 : vector<24x24xf32>
    %49 = vector.extract_strided_slice %28 {offsets = [0, 3], sizes = [24, 1], strides = [1, 1]} : vector<24x4xi32> to vector<24x1xi32>
    %50 = vector.broadcast %49 : vector<24x1xi32> to vector<24x24xi32>
    %51 = arith.cmpi eq, %50, %29 : vector<24x24xi32>
    %52 = arith.extui %51 : vector<24x24xi1> to vector<24x24xi32>
    %53 = arith.sitofp %52 : vector<24x24xi32> to vector<24x24xf32>
    %54 = arith.addf %48, %53 : vector<24x24xf32>
    %cst_15 = arith.constant dense<0.000000e+00> : vector<24x8xf32>
    %55 = tpu.matmul %54, %27, %cst_15 {dimension_numbers = #tpu.dot_dimension_numbers<[1], [0], [0], [1], [0, 0, 1, 1], [], []>, precision = #tpu.contract_precision<fp32>} : vector<24x24xf32>, vector<24x8xf32>, vector<24x8xf32> -> vector<24x8xf32>
    %cst_16 = arith.constant 2.500000e-01 : f32
    %56 = vector.broadcast %cst_16 : f32 to vector<24x8xf32>
    %57 = arith.mulf %55, %56 : vector<24x8xf32>
    %c0_17 = arith.constant 0 : index
    %c0_18 = arith.constant 0 : index
    %58 = vector.load %arg6[%c0_17, %c0_18] : memref<24x16xf32, #tpu.memory_space<vmem>>, vector<24x8xf32>
    tpu.vector_store %arg6[%c0_17, %c0_18], %26 {strides = array<i32>} : memref<24x16xf32, #tpu.memory_space<vmem>>, vector<24x8xf32>,
    %c0_19 = arith.constant 0 : index
    %c8 = arith.constant 8 : index
    %59 = vector.load %arg6[%c0_19, %c8] : memref<24x16xf32, #tpu.memory_space<vmem>>, vector<24x8xf32>
    tpu.vector_store %arg6[%c0_19, %c8], %57 {strides = array<i32>} : memref<24x16xf32, #tpu.memory_space<vmem>>, vector<24x8xf32>,
    return
  }
  func.func @transform_0(%arg0: i32) -> (i32, i32) {
    %c0_i32 = arith.constant 0 : i32
    %c0_i32_0 = arith.constant 0 : i32
    %c0_i32_1 = arith.constant 0 : i32
    return %c0_i32, %c0_i32_0 : i32, i32
  }
  func.func @transform_1(%arg0: i32) -> (i32, i32) {
    %c0_i32 = arith.constant 0 : i32
    %c0_i32_0 = arith.constant 0 : i32
    return %arg0, %c0_i32 : i32, i32
  }
  func.func @transform_2(%arg0: i32) -> (i32, i32) {
    %c0_i32 = arith.constant 0 : i32
    %c0_i32_0 = arith.constant 0 : i32
    return %arg0, %c0_i32 : i32, i32
  }
  func.func @transform_3(%arg0: i32) -> (i32, i32) {
    %c0_i32 = arith.constant 0 : i32
    %c0_i32_0 = arith.constant 0 : i32
    %c0_i32_1 = arith.constant 0 : i32
    return %c0_i32, %c0_i32_0 : i32, i32
  }
  func.func @transform_4(%arg0: i32) -> (i32, i32) {
    %c0_i32 = arith.constant 0 : i32
    %c0_i32_0 = arith.constant 0 : i32
    %c0_i32_1 = arith.constant 0 : i32
    return %c0_i32, %c0_i32_0 : i32, i32
  }
  func.func @transform_5(%arg0: i32) -> (i32, i32) {
    %c0_i32 = arith.constant 0 : i32
    %c0_i32_0 = arith.constant 0 : i32
    return %arg0, %c0_i32 : i32, i32
  }
}

module attributes {stable_mosaic.version = 11 : i64} {
  func.func @_head_kernel(%arg0: i32, %arg1: memref<24x32xf32, #tpu.memory_space<vmem>>, %arg2: memref<32x32xf32, #tpu.memory_space<vmem>>, %arg3: memref<1x32xf32, #tpu.memory_space<vmem>>, %arg4: memref<32x8xf32, #tpu.memory_space<vmem>>, %arg5: memref<1x8xf32, #tpu.memory_space<vmem>>, %arg6: memref<24x32xf32, #tpu.memory_space<vmem>>, %arg7: memref<24x8xf32, #tpu.memory_space<vmem>>) attributes {dimension_semantics = [#tpu.dimension_semantics<parallel>], iteration_bounds = array<i64: 1>, scalar_prefetch = 0 : i64, scratch_operands = 0 : i64, tpu.core_type = #tpu.core_type<tc>, window_params = [{transform_indices = @transform_0, window_bounds = array<i64: 24, 32>}, {pipeline_mode = #tpu.pipeline_mode<synchronous>, transform_indices = @transform_1, window_bounds = array<i64: 32, 32>}, {pipeline_mode = #tpu.pipeline_mode<synchronous>, transform_indices = @transform_2, window_bounds = array<i64: 1, 32>}, {pipeline_mode = #tpu.pipeline_mode<synchronous>, transform_indices = @transform_3, window_bounds = array<i64: 32, 8>}, {pipeline_mode = #tpu.pipeline_mode<synchronous>, transform_indices = @transform_4, window_bounds = array<i64: 1, 8>}, {transform_indices = @transform_5, window_bounds = array<i64: 24, 32>}, {transform_indices = @transform_6, window_bounds = array<i64: 24, 8>}]} {
    %c0 = arith.constant 0 : index
    %c0_0 = arith.constant 0 : index
    %0 = vector.load %arg1[%c0, %c0_0] : memref<24x32xf32, #tpu.memory_space<vmem>>, vector<24x32xf32>
    %c0_1 = arith.constant 0 : index
    %c0_2 = arith.constant 0 : index
    %1 = vector.load %arg2[%c0_1, %c0_2] : memref<32x32xf32, #tpu.memory_space<vmem>>, vector<32x32xf32>
    %cst = arith.constant dense<0.000000e+00> : vector<24x32xf32>
    %2 = tpu.matmul %0, %1, %cst {dimension_numbers = #tpu.dot_dimension_numbers<[1], [0], [0], [1], [0, 0, 1, 1], [], []>, precision = #tpu.contract_precision<fp32>} : vector<24x32xf32>, vector<32x32xf32>, vector<24x32xf32> -> vector<24x32xf32>
    %c0_3 = arith.constant 0 : index
    %c0_4 = arith.constant 0 : index
    %3 = vector.load %arg3[%c0_3, %c0_4] : memref<1x32xf32, #tpu.memory_space<vmem>>, vector<1x32xf32>
    %4 = vector.broadcast %3 : vector<1x32xf32> to vector<24x32xf32>
    %5 = arith.addf %2, %4 : vector<24x32xf32>
    %cst_5 = arith.constant 0.000000e+00 : f32
    %6 = vector.broadcast %cst_5 : f32 to vector<24x32xf32>
    %7 = arith.cmpf ogt, %5, %6 : vector<24x32xf32>
    %cst_6 = arith.constant 2.000000e-01 : f32
    %8 = vector.broadcast %cst_6 : f32 to vector<24x32xf32>
    %9 = arith.mulf %8, %5 : vector<24x32xf32>
    %10 = arith.select %7, %5, %9 : vector<24x32xi1>, vector<24x32xf32>
    %c0_7 = arith.constant 0 : index
    %c0_8 = arith.constant 0 : index
    %11 = vector.load %arg6[%c0_7, %c0_8] : memref<24x32xf32, #tpu.memory_space<vmem>>, vector<24x32xf32>
    tpu.vector_store %arg6[%c0_7, %c0_8], %10 {strides = array<i32>} : memref<24x32xf32, #tpu.memory_space<vmem>>, vector<24x32xf32>,
    %c0_9 = arith.constant 0 : index
    %c0_10 = arith.constant 0 : index
    %12 = vector.load %arg4[%c0_9, %c0_10] : memref<32x8xf32, #tpu.memory_space<vmem>>, vector<32x8xf32>
    %cst_11 = arith.constant dense<0.000000e+00> : vector<24x8xf32>
    %13 = tpu.matmul %0, %12, %cst_11 {dimension_numbers = #tpu.dot_dimension_numbers<[1], [0], [0], [1], [0, 0, 1, 1], [], []>, precision = #tpu.contract_precision<fp32>} : vector<24x32xf32>, vector<32x8xf32>, vector<24x8xf32> -> vector<24x8xf32>
    %c0_12 = arith.constant 0 : index
    %c0_13 = arith.constant 0 : index
    %14 = vector.load %arg5[%c0_12, %c0_13] : memref<1x8xf32, #tpu.memory_space<vmem>>, vector<1x8xf32>
    %15 = vector.broadcast %14 : vector<1x8xf32> to vector<24x8xf32>
    %16 = arith.addf %13, %15 : vector<24x8xf32>
    %cst_14 = arith.constant 0.000000e+00 : f32
    %17 = vector.broadcast %cst_14 : f32 to vector<24x8xf32>
    %18 = arith.cmpf ogt, %16, %17 : vector<24x8xf32>
    %cst_15 = arith.constant 2.000000e-01 : f32
    %19 = vector.broadcast %cst_15 : f32 to vector<24x8xf32>
    %20 = arith.mulf %19, %16 : vector<24x8xf32>
    %21 = arith.select %18, %16, %20 : vector<24x8xi1>, vector<24x8xf32>
    %c0_16 = arith.constant 0 : index
    %c0_17 = arith.constant 0 : index
    %22 = vector.load %arg7[%c0_16, %c0_17] : memref<24x8xf32, #tpu.memory_space<vmem>>, vector<24x8xf32>
    tpu.vector_store %arg7[%c0_16, %c0_17], %21 {strides = array<i32>} : memref<24x8xf32, #tpu.memory_space<vmem>>, vector<24x8xf32>,
    return
  }
  func.func @transform_0(%arg0: i32) -> (i32, i32) {
    %c0_i32 = arith.constant 0 : i32
    %c0_i32_0 = arith.constant 0 : i32
    return %arg0, %c0_i32 : i32, i32
  }
  func.func @transform_1(%arg0: i32) -> (i32, i32) {
    %c0_i32 = arith.constant 0 : i32
    %c0_i32_0 = arith.constant 0 : i32
    %c0_i32_1 = arith.constant 0 : i32
    return %c0_i32, %c0_i32_0 : i32, i32
  }
  func.func @transform_2(%arg0: i32) -> (i32, i32) {
    %c0_i32 = arith.constant 0 : i32
    %c0_i32_0 = arith.constant 0 : i32
    %c0_i32_1 = arith.constant 0 : i32
    return %c0_i32, %c0_i32_0 : i32, i32
  }
  func.func @transform_3(%arg0: i32) -> (i32, i32) {
    %c0_i32 = arith.constant 0 : i32
    %c0_i32_0 = arith.constant 0 : i32
    %c0_i32_1 = arith.constant 0 : i32
    return %c0_i32, %c0_i32_0 : i32, i32
  }
  func.func @transform_4(%arg0: i32) -> (i32, i32) {
    %c0_i32 = arith.constant 0 : i32
    %c0_i32_0 = arith.constant 0 : i32
    %c0_i32_1 = arith.constant 0 : i32
    return %c0_i32, %c0_i32_0 : i32, i32
  }
  func.func @transform_5(%arg0: i32) -> (i32, i32) {
    %c0_i32 = arith.constant 0 : i32
    %c0_i32_0 = arith.constant 0 : i32
    return %arg0, %c0_i32 : i32, i32
  }
  func.func @transform_6(%arg0: i32) -> (i32, i32) {
    %c0_i32 = arith.constant 0 : i32
    %c0_i32_0 = arith.constant 0 : i32
    return %arg0, %c0_i32 : i32, i32
  }
}

module attributes {stable_mosaic.version = 11 : i64} {
  func.func @_lfa_final_kernel(%arg0: i32, %arg1: memref<24x16xf32, #tpu.memory_space<vmem>>, %arg2: memref<96x4xf32, #tpu.memory_space<vmem>>, %arg3: memref<24x4xi32, #tpu.memory_space<vmem>>, %arg4: memref<4x16xf32, #tpu.memory_space<vmem>>, %arg5: memref<1x16xf32, #tpu.memory_space<vmem>>, %arg6: memref<16x32xf32, #tpu.memory_space<vmem>>, %arg7: memref<16x32xf32, #tpu.memory_space<vmem>>, %arg8: memref<1x32xf32, #tpu.memory_space<vmem>>, %arg9: memref<24x32xf32, #tpu.memory_space<vmem>>, %arg10: memref<24x32xf32, #tpu.memory_space<vmem>>) attributes {dimension_semantics = [#tpu.dimension_semantics<parallel>], iteration_bounds = array<i64: 1>, scalar_prefetch = 0 : i64, scratch_operands = 0 : i64, tpu.core_type = #tpu.core_type<tc>, window_params = [{pipeline_mode = #tpu.pipeline_mode<synchronous>, transform_indices = @transform_0, window_bounds = array<i64: 24, 16>}, {transform_indices = @transform_1, window_bounds = array<i64: 96, 4>}, {transform_indices = @transform_2, window_bounds = array<i64: 24, 4>}, {pipeline_mode = #tpu.pipeline_mode<synchronous>, transform_indices = @transform_3, window_bounds = array<i64: 4, 16>}, {pipeline_mode = #tpu.pipeline_mode<synchronous>, transform_indices = @transform_4, window_bounds = array<i64: 1, 16>}, {pipeline_mode = #tpu.pipeline_mode<synchronous>, transform_indices = @transform_5, window_bounds = array<i64: 16, 32>}, {pipeline_mode = #tpu.pipeline_mode<synchronous>, transform_indices = @transform_6, window_bounds = array<i64: 16, 32>}, {pipeline_mode = #tpu.pipeline_mode<synchronous>, transform_indices = @transform_7, window_bounds = array<i64: 1, 32>}, {transform_indices = @transform_8, window_bounds = array<i64: 24, 32>}, {transform_indices = @transform_9, window_bounds = array<i64: 24, 32>}]} {
    %c0 = arith.constant 0 : index
    %c0_0 = arith.constant 0 : index
    %0 = vector.load %arg2[%c0, %c0_0] : memref<96x4xf32, #tpu.memory_space<vmem>>, vector<96x4xf32>
    %c0_1 = arith.constant 0 : index
    %c0_2 = arith.constant 0 : index
    %1 = vector.load %arg4[%c0_1, %c0_2] : memref<4x16xf32, #tpu.memory_space<vmem>>, vector<4x16xf32>
    %c0_3 = arith.constant 0 : index
    %c0_4 = arith.constant 0 : index
    %2 = vector.load %arg5[%c0_3, %c0_4] : memref<1x16xf32, #tpu.memory_space<vmem>>, vector<1x16xf32>
    %cst = arith.constant dense<0.000000e+00> : vector<96x16xf32>
    %3 = tpu.matmul %0, %1, %cst {dimension_numbers = #tpu.dot_dimension_numbers<[1], [0], [0], [1], [0, 0, 1, 1], [], []>, precision = #tpu.contract_precision<fp32>} : vector<96x4xf32>, vector<4x16xf32>, vector<96x16xf32> -> vector<96x16xf32>
    %4 = vector.broadcast %2 : vector<1x16xf32> to vector<96x16xf32>
    %5 = arith.addf %3, %4 : vector<96x16xf32>
    %cst_5 = arith.constant 0.000000e+00 : f32
    %6 = vector.broadcast %cst_5 : f32 to vector<96x16xf32>
    %7 = arith.cmpf ogt, %5, %6 : vector<96x16xf32>
    %cst_6 = arith.constant 2.000000e-01 : f32
    %8 = vector.broadcast %cst_6 : f32 to vector<96x16xf32>
    %9 = arith.mulf %8, %5 : vector<96x16xf32>
    %10 = arith.select %7, %5, %9 : vector<96x16xi1>, vector<96x16xf32>
    %11 = tpu.iota {dimensions = array<i32: 0>} : vector<24x96xi32>
    %12 = tpu.iota {dimensions = array<i32: 1>} : vector<24x96xi32>
    %c4_i32 = arith.constant 4 : i32
    %13 = vector.broadcast %c4_i32 : i32 to vector<24x96xi32>
    %14 = arith.muli %11, %13 : vector<24x96xi32>
    %15 = arith.cmpi sge, %12, %14 : vector<24x96xi32>
    %c1_i32 = arith.constant 1 : i32
    %16 = vector.broadcast %c1_i32 : i32 to vector<24x96xi32>
    %17 = arith.addi %11, %16 : vector<24x96xi32>
    %c4_i32_7 = arith.constant 4 : i32
    %18 = vector.broadcast %c4_i32_7 : i32 to vector<24x96xi32>
    %19 = arith.muli %17, %18 : vector<24x96xi32>
    %20 = arith.cmpi slt, %12, %19 : vector<24x96xi32>
    %21 = arith.andi %15, %20 : vector<24x96xi1>
    %22 = arith.extui %21 : vector<24x96xi1> to vector<24x96xi32>
    %23 = arith.sitofp %22 : vector<24x96xi32> to vector<24x96xf32>
    %cst_8 = arith.constant dense<0.000000e+00> : vector<24x16xf32>
    %24 = tpu.matmul %23, %10, %cst_8 {dimension_numbers = #tpu.dot_dimension_numbers<[1], [0], [0], [1], [0, 0, 1, 1], [], []>, precision = #tpu.contract_precision<fp32>} : vector<24x96xf32>, vector<96x16xf32>, vector<24x16xf32> -> vector<24x16xf32>
    %cst_9 = arith.constant 2.500000e-01 : f32
    %25 = vector.broadcast %cst_9 : f32 to vector<24x16xf32>
    %26 = arith.mulf %24, %25 : vector<24x16xf32>
    %c0_10 = arith.constant 0 : index
    %c0_11 = arith.constant 0 : index
    %27 = vector.load %arg1[%c0_10, %c0_11] : memref<24x16xf32, #tpu.memory_space<vmem>>, vector<24x16xf32>
    %c0_12 = arith.constant 0 : index
    %c0_13 = arith.constant 0 : index
    %28 = vector.load %arg3[%c0_12, %c0_13] : memref<24x4xi32, #tpu.memory_space<vmem>>, vector<24x4xi32>
    %29 = tpu.iota {dimensions = array<i32: 1>} : vector<24x24xi32>
    %cst_14 = arith.constant 0.000000e+00 : f32
    %30 = vector.broadcast %cst_14 : f32 to vector<24x24xf32>
    %31 = vector.extract_strided_slice %28 {offsets = [0, 0], sizes = [24, 1], strides = [1, 1]} : vector<24x4xi32> to vector<24x1xi32>
    %32 = vector.broadcast %31 : vector<24x1xi32> to vector<24x24xi32>
    %33 = arith.cmpi eq, %32, %29 : vector<24x24xi32>
    %34 = arith.extui %33 : vector<24x24xi1> to vector<24x24xi32>
    %35 = arith.sitofp %34 : vector<24x24xi32> to vector<24x24xf32>
    %36 = arith.addf %30, %35 : vector<24x24xf32>
    %37 = vector.extract_strided_slice %28 {offsets = [0, 1], sizes = [24, 1], strides = [1, 1]} : vector<24x4xi32> to vector<24x1xi32>
    %38 = vector.broadcast %37 : vector<24x1xi32> to vector<24x24xi32>
    %39 = arith.cmpi eq, %38, %29 : vector<24x24xi32>
    %40 = arith.extui %39 : vector<24x24xi1> to vector<24x24xi32>
    %41 = arith.sitofp %40 : vector<24x24xi32> to vector<24x24xf32>
    %42 = arith.addf %36, %41 : vector<24x24xf32>
    %43 = vector.extract_strided_slice %28 {offsets = [0, 2], sizes = [24, 1], strides = [1, 1]} : vector<24x4xi32> to vector<24x1xi32>
    %44 = vector.broadcast %43 : vector<24x1xi32> to vector<24x24xi32>
    %45 = arith.cmpi eq, %44, %29 : vector<24x24xi32>
    %46 = arith.extui %45 : vector<24x24xi1> to vector<24x24xi32>
    %47 = arith.sitofp %46 : vector<24x24xi32> to vector<24x24xf32>
    %48 = arith.addf %42, %47 : vector<24x24xf32>
    %49 = vector.extract_strided_slice %28 {offsets = [0, 3], sizes = [24, 1], strides = [1, 1]} : vector<24x4xi32> to vector<24x1xi32>
    %50 = vector.broadcast %49 : vector<24x1xi32> to vector<24x24xi32>
    %51 = arith.cmpi eq, %50, %29 : vector<24x24xi32>
    %52 = arith.extui %51 : vector<24x24xi1> to vector<24x24xi32>
    %53 = arith.sitofp %52 : vector<24x24xi32> to vector<24x24xf32>
    %54 = arith.addf %48, %53 : vector<24x24xf32>
    %cst_15 = arith.constant dense<0.000000e+00> : vector<24x16xf32>
    %55 = tpu.matmul %54, %27, %cst_15 {dimension_numbers = #tpu.dot_dimension_numbers<[1], [0], [0], [1], [0, 0, 1, 1], [], []>, precision = #tpu.contract_precision<fp32>} : vector<24x24xf32>, vector<24x16xf32>, vector<24x16xf32> -> vector<24x16xf32>
    %cst_16 = arith.constant 2.500000e-01 : f32
    %56 = vector.broadcast %cst_16 : f32 to vector<24x16xf32>
    %57 = arith.mulf %55, %56 : vector<24x16xf32>
    %c0_17 = arith.constant 0 : index
    %c0_18 = arith.constant 0 : index
    %58 = vector.load %arg6[%c0_17, %c0_18] : memref<16x32xf32, #tpu.memory_space<vmem>>, vector<16x32xf32>
    %cst_19 = arith.constant dense<0.000000e+00> : vector<24x32xf32>
    %59 = tpu.matmul %26, %58, %cst_19 {dimension_numbers = #tpu.dot_dimension_numbers<[1], [0], [0], [1], [0, 0, 1, 1], [], []>, precision = #tpu.contract_precision<fp32>} : vector<24x16xf32>, vector<16x32xf32>, vector<24x32xf32> -> vector<24x32xf32>
    %c0_20 = arith.constant 0 : index
    %c0_21 = arith.constant 0 : index
    %60 = vector.load %arg7[%c0_20, %c0_21] : memref<16x32xf32, #tpu.memory_space<vmem>>, vector<16x32xf32>
    %cst_22 = arith.constant dense<0.000000e+00> : vector<24x32xf32>
    %61 = tpu.matmul %57, %60, %cst_22 {dimension_numbers = #tpu.dot_dimension_numbers<[1], [0], [0], [1], [0, 0, 1, 1], [], []>, precision = #tpu.contract_precision<fp32>} : vector<24x16xf32>, vector<16x32xf32>, vector<24x32xf32> -> vector<24x32xf32>
    %62 = arith.addf %59, %61 : vector<24x32xf32>
    %c0_23 = arith.constant 0 : index
    %c0_24 = arith.constant 0 : index
    %63 = vector.load %arg8[%c0_23, %c0_24] : memref<1x32xf32, #tpu.memory_space<vmem>>, vector<1x32xf32>
    %64 = vector.broadcast %63 : vector<1x32xf32> to vector<24x32xf32>
    %65 = arith.addf %62, %64 : vector<24x32xf32>
    %cst_25 = arith.constant 0.000000e+00 : f32
    %66 = vector.broadcast %cst_25 : f32 to vector<24x32xf32>
    %67 = arith.cmpf ogt, %65, %66 : vector<24x32xf32>
    %cst_26 = arith.constant 2.000000e-01 : f32
    %68 = vector.broadcast %cst_26 : f32 to vector<24x32xf32>
    %69 = arith.mulf %68, %65 : vector<24x32xf32>
    %70 = arith.select %67, %65, %69 : vector<24x32xi1>, vector<24x32xf32>
    %c0_27 = arith.constant 0 : index
    %c0_28 = arith.constant 0 : index
    %71 = vector.load %arg9[%c0_27, %c0_28] : memref<24x32xf32, #tpu.memory_space<vmem>>, vector<24x32xf32>
    %72 = arith.addf %70, %71 : vector<24x32xf32>
    %cst_29 = arith.constant 0.000000e+00 : f32
    %73 = vector.broadcast %cst_29 : f32 to vector<24x32xf32>
    %74 = arith.cmpf ogt, %72, %73 : vector<24x32xf32>
    %cst_30 = arith.constant 2.000000e-01 : f32
    %75 = vector.broadcast %cst_30 : f32 to vector<24x32xf32>
    %76 = arith.mulf %75, %72 : vector<24x32xf32>
    %77 = arith.select %74, %72, %76 : vector<24x32xi1>, vector<24x32xf32>
    %c0_31 = arith.constant 0 : index
    %c0_32 = arith.constant 0 : index
    %78 = vector.load %arg10[%c0_31, %c0_32] : memref<24x32xf32, #tpu.memory_space<vmem>>, vector<24x32xf32>
    tpu.vector_store %arg10[%c0_31, %c0_32], %77 {strides = array<i32>} : memref<24x32xf32, #tpu.memory_space<vmem>>, vector<24x32xf32>,
    return
  }
  func.func @transform_0(%arg0: i32) -> (i32, i32) {
    %c0_i32 = arith.constant 0 : i32
    %c0_i32_0 = arith.constant 0 : i32
    %c0_i32_1 = arith.constant 0 : i32
    return %c0_i32, %c0_i32_0 : i32, i32
  }
  func.func @transform_1(%arg0: i32) -> (i32, i32) {
    %c0_i32 = arith.constant 0 : i32
    %c0_i32_0 = arith.constant 0 : i32
    return %arg0, %c0_i32 : i32, i32
  }
  func.func @transform_2(%arg0: i32) -> (i32, i32) {
    %c0_i32 = arith.constant 0 : i32
    %c0_i32_0 = arith.constant 0 : i32
    return %arg0, %c0_i32 : i32, i32
  }
  func.func @transform_3(%arg0: i32) -> (i32, i32) {
    %c0_i32 = arith.constant 0 : i32
    %c0_i32_0 = arith.constant 0 : i32
    %c0_i32_1 = arith.constant 0 : i32
    return %c0_i32, %c0_i32_0 : i32, i32
  }
  func.func @transform_4(%arg0: i32) -> (i32, i32) {
    %c0_i32 = arith.constant 0 : i32
    %c0_i32_0 = arith.constant 0 : i32
    %c0_i32_1 = arith.constant 0 : i32
    return %c0_i32, %c0_i32_0 : i32, i32
  }
  func.func @transform_5(%arg0: i32) -> (i32, i32) {
    %c0_i32 = arith.constant 0 : i32
    %c0_i32_0 = arith.constant 0 : i32
    %c0_i32_1 = arith.constant 0 : i32
    return %c0_i32, %c0_i32_0 : i32, i32
  }
  func.func @transform_6(%arg0: i32) -> (i32, i32) {
    %c0_i32 = arith.constant 0 : i32
    %c0_i32_0 = arith.constant 0 : i32
    %c0_i32_1 = arith.constant 0 : i32
    return %c0_i32, %c0_i32_0 : i32, i32
  }
  func.func @transform_7(%arg0: i32) -> (i32, i32) {
    %c0_i32 = arith.constant 0 : i32
    %c0_i32_0 = arith.constant 0 : i32
    %c0_i32_1 = arith.constant 0 : i32
    return %c0_i32, %c0_i32_0 : i32, i32
  }
  func.func @transform_8(%arg0: i32) -> (i32, i32) {
    %c0_i32 = arith.constant 0 : i32
    %c0_i32_0 = arith.constant 0 : i32
    return %arg0, %c0_i32 : i32, i32
  }
  func.func @transform_9(%arg0: i32) -> (i32, i32) {
    %c0_i32 = arith.constant 0 : i32
    %c0_i32_0 = arith.constant 0 : i32
    return %arg0, %c0_i32 : i32, i32
  }
}

module attributes {stable_mosaic.version = 11 : i64} {
  func.func @_mlp_kernel(%arg0: i32, %arg1: memref<24x32xf32, #tpu.memory_space<vmem>>, %arg2: memref<32x32xf32, #tpu.memory_space<vmem>>, %arg3: memref<1x32xf32, #tpu.memory_space<vmem>>, %arg4: memref<24x32xf32, #tpu.memory_space<vmem>>) attributes {dimension_semantics = [#tpu.dimension_semantics<parallel>], iteration_bounds = array<i64: 1>, scalar_prefetch = 0 : i64, scratch_operands = 0 : i64, tpu.core_type = #tpu.core_type<tc>, window_params = [{transform_indices = @transform_0, window_bounds = array<i64: 24, 32>}, {pipeline_mode = #tpu.pipeline_mode<synchronous>, transform_indices = @transform_1, window_bounds = array<i64: 32, 32>}, {pipeline_mode = #tpu.pipeline_mode<synchronous>, transform_indices = @transform_2, window_bounds = array<i64: 1, 32>}, {transform_indices = @transform_3, window_bounds = array<i64: 24, 32>}]} {
    %c0 = arith.constant 0 : index
    %c0_0 = arith.constant 0 : index
    %0 = vector.load %arg1[%c0, %c0_0] : memref<24x32xf32, #tpu.memory_space<vmem>>, vector<24x32xf32>
    %c0_1 = arith.constant 0 : index
    %c0_2 = arith.constant 0 : index
    %1 = vector.load %arg2[%c0_1, %c0_2] : memref<32x32xf32, #tpu.memory_space<vmem>>, vector<32x32xf32>
    %cst = arith.constant dense<0.000000e+00> : vector<24x32xf32>
    %2 = tpu.matmul %0, %1, %cst {dimension_numbers = #tpu.dot_dimension_numbers<[1], [0], [0], [1], [0, 0, 1, 1], [], []>, precision = #tpu.contract_precision<fp32>} : vector<24x32xf32>, vector<32x32xf32>, vector<24x32xf32> -> vector<24x32xf32>
    %c0_3 = arith.constant 0 : index
    %c0_4 = arith.constant 0 : index
    %3 = vector.load %arg3[%c0_3, %c0_4] : memref<1x32xf32, #tpu.memory_space<vmem>>, vector<1x32xf32>
    %4 = vector.broadcast %3 : vector<1x32xf32> to vector<24x32xf32>
    %5 = arith.addf %2, %4 : vector<24x32xf32>
    %cst_5 = arith.constant 0.000000e+00 : f32
    %6 = vector.broadcast %cst_5 : f32 to vector<24x32xf32>
    %7 = arith.cmpf ogt, %5, %6 : vector<24x32xf32>
    %cst_6 = arith.constant 2.000000e-01 : f32
    %8 = vector.broadcast %cst_6 : f32 to vector<24x32xf32>
    %9 = arith.mulf %8, %5 : vector<24x32xf32>
    %10 = arith.select %7, %5, %9 : vector<24x32xi1>, vector<24x32xf32>
    %c0_7 = arith.constant 0 : index
    %c0_8 = arith.constant 0 : index
    %11 = vector.load %arg4[%c0_7, %c0_8] : memref<24x32xf32, #tpu.memory_space<vmem>>, vector<24x32xf32>
    tpu.vector_store %arg4[%c0_7, %c0_8], %10 {strides = array<i32>} : memref<24x32xf32, #tpu.memory_space<vmem>>, vector<24x32xf32>,
    return
  }
  func.func @transform_0(%arg0: i32) -> (i32, i32) {
    %c0_i32 = arith.constant 0 : i32
    %c0_i32_0 = arith.constant 0 : i32
    return %arg0, %c0_i32 : i32, i32
  }
  func.func @transform_1(%arg0: i32) -> (i32, i32) {
    %c0_i32 = arith.constant 0 : i32
    %c0_i32_0 = arith.constant 0 : i32
    %c0_i32_1 = arith.constant 0 : i32
    return %c0_i32, %c0_i32_0 : i32, i32
  }
  func.func @transform_2(%arg0: i32) -> (i32, i32) {
    %c0_i32 = arith.constant 0 : i32
    %c0_i32_0 = arith.constant 0 : i32
    %c0_i32_1 = arith.constant 0 : i32
    return %c0_i32, %c0_i32_0 : i32, i32
  }
  func.func @transform_3(%arg0: i32) -> (i32, i32) {
    %c0_i32 = arith.constant 0 : i32
    %c0_i32_0 = arith.constant 0 : i32
    return %arg0, %c0_i32 : i32, i32
  }
}

</mosaic_0001>

<bundles_post_ra>
// kernel: student_teacher_forward.13
= control target key start
LH: loop header
LB: loop body
LE: loop exit
PB: predicated region body
PF: predicated region fallthrough
CT: control target
= control target key end

     0   :  { %v879_v3 = vmov 0.0|0.0   ;;  %vm29_vm0 = vcmask 261120   ;;  %vm880_vm1 = vmmov 0   ;;  %v881_v10 = vmov 0.0   ;;  %s1053_s0 = inlined_call_operand.vmem [shape: f32[24,32], index: 0, kind: input, shape index: {}]   ;;  %s1054_s1 = inlined_call_operand.vmem [shape: f32[32,32], index: 1, kind: input, shape index: {}]   ;;  %s1055_s2 = inlined_call_operand.vmem [shape: f32[1,32], index: 2, kind: input, shape index: {}]   ;;  %s1056_s3 = inlined_call_operand.hbm [shape: f32[24,32], index: 3, kind: output, shape index: {}]  }
   0x1   :  { %v18_v0 = vld [vmem:[%s1054_s1] sm:$0xff]  ;;  %v19_v1 = vld [vmem:[%s1054_s1 + $0x8] sm:$0xff]  ;;  %v20_v2 = vld [vmem:[%s1054_s1 + $0x10] sm:$0xff]  ;;  %783 = vmatprep.subr.bf16.mxu1 %v879_v3  ;;  %801 = vmatprep.subr.bf16.mxu0 %v879_v3 }
   0x2   :  { %v40_v4 = vand.u32 4294901760, %v18_v0  ;;  %v43_v5 = vand.u32 4294901760, %v19_v1  ;;  %v21_v6 = vld [vmem:[%s1054_s1 + $0x18] sm:$0xff]  ;;  %v46_v7 = vand.u32 4294901760, %v20_v2  ;;  %v15_v8 = vld [vmem:[%s1053_s0] sm:$0xff]  ;;  %689 = vmatprep.mubr.msk.f32.mxu1 %vm880_vm1, %v881_v10  ;;  %740 = vmatprep.mubr.msk.f32.mxu0 %vm880_vm1, %v881_v10  ;;  %v16_v12 = vld [vmem:[%s1053_s0 + $0x8] sm:$0xff] }
   0x3   :  { %v49_v9 = vand.u32 4294901760, %v21_v6  ;;  %v31_v11 = vsel %vm29_vm0, %v15_v8, 0  ;;  %v17_v17 = vld [vmem:[%s1053_s0 + $0x10] sm:$0xff] }
   0x4   :  { %v930_v13 = vpack.c.bf16 %v43_v5, %v40_v4  ;;  %v932_v14 = vsub.f32 %v18_v0, %v40_v4  ;;  %v934_v15 = vsub.f32 %v19_v1, %v43_v5  ;;  %v936_v16 = vsub.f32 %v20_v2, %v46_v7 }
   0x5   :  { %8 = vsyncpa [#allocation3], 0  ;;  %v941_v18 = vpack.c.bf16 %v49_v9, %v46_v7  ;;  %v943_v19 = vsub.f32 %v21_v6, %v49_v9  ;;  %v945_v20 = vand.u32 4294901760, %v31_v11  ;;  %v34_v21 = vsel %vm29_vm0, %v16_v12, 0  ;;  %v638_v55 = vld [vmem:[%s1055_s2] ss:$0 sm:$0xff] }
   0x6   :  { %785 = vmatpush3.bf16.msra.mxu1 %v930_v13  ;;  %803 = vmatpush3.bf16.msra.mxu0 %v930_v13  ;;  %v141_v22 = vand.u32 4294901760, %v932_v14  ;;  %v148_v23 = vand.u32 4294901760, %v934_v15  ;;  %v952_v24 = vand.u32 4294901760, %v34_v21  ;;  %v155_v25 = vand.u32 4294901760, %v936_v16  ;;  %s882_s2 = smov [#allocation2]  }
   0x7   :  { %786 = vmatprep.subr.bf16.mxu1 %v879_v3  ;;  %804 = vmatprep.subr.bf16.mxu0 %v879_v3  ;;  %v958_v26 = vsub.f32 %v31_v11, %v945_v20  ;;  %v162_v27 = vand.u32 4294901760, %v943_v19  ;;  %v37_v28 = vsel %vm29_vm0, %v17_v17, 0  ;;  %v796_v53 = vpack.c.bf16 %v934_v15, %v932_v14  ;;  %s627_s26 = sshll.u32 %s882_s2, 4  ;;  %s628_s26 = int_to_ptr.vmem [resolvable:$true] %s627_s26 }
   0x8   :  { %v142_v29 = vsub.f32 %v932_v14, %v141_v22  ;;  %v149_v30 = vsub.f32 %v934_v15, %v148_v23  ;;  %v965_v31 = vsub.f32 %v34_v21, %v952_v24  ;;  %v156_v33 = vsub.f32 %v936_v16, %v155_v25  ;;  %s855_s27 = scalar_lea.vmem %s628_s26, 384  ;;  %p860_p1 = scmp.lt.s32.totalorder %s628_s26, %s628_s26 }
   0x9   :  { %v110_v32 = vand.u32 4294901760, %v958_v26  ;;  %v163_v34 = vsub.f32 %v943_v19, %v162_v27  ;;  %v970_v35 = vand.u32 4294901760, %v37_v28  ;;  %v808_v38 = vpack.c.bf16 %v148_v23, %v141_v22  ;;  %p856_p0 = scmp.ne.s32.totalorder %s628_s26, %s855_s27  ;;  %p861_p2 = scmp.lt.s32.totalorder %s855_s27, %s855_s27 }
   0xa   :  { %788 = vmatpush3.bf16.msra.mxu1 %v941_v18  ;;  %806 = vmatpush3.bf16.msra.mxu0 %v941_v18  ;;  %v143_v36 = vand.u32 4294901760, %v142_v29  ;;  %v150_v37 = vand.u32 4294901760, %v149_v30  ;;  %v120_v39 = vand.u32 4294901760, %v965_v31  ;;  %v157_v44 = vand.u32 4294901760, %v156_v33 }
   0xb   :  { %v111_v40 = vsub.f32 %v958_v26, %v110_v32  ;;  %789 = vmatprep.subr.bf16.mxu1 %v879_v3  ;;  %807 = vmatprep.subr.bf16.mxu0 %v879_v3  ;;  %v129_v41 = vsub.f32 %v37_v28, %v970_v35  ;;  %v164_v45 = vand.u32 4294901760, %v163_v34  ;;  %v811_v48 = vpack.c.bf16 %v162_v27, %v155_v25  ;;  %p862_p3 = por %p861_p2, %p860_p1 }
   0xc   :  { %v790_v42 = vpack.c.bf16 %v150_v37, %v143_v36  ;;  %v121_v43 = vsub.f32 %v965_v31, %v120_v39  ;;  %v799_v54 = vpack.c.bf16 %v943_v19, %v936_v16 }
   0xd   :  { %v112_v46 = vand.u32 4294901760, %v111_v40  ;;  %741 = vmatmul.mubr.f32.vlgmr.msra.gmra.mrb[0].mxu0 %v110_v32  ;;  %v130_v47 = vand.u32 4294901760, %v129_v41  ;;  %v793_v51 = vpack.c.bf16 %v164_v45, %v157_v44  ;;  %p863_p4 = pnand %p862_p3, %p856_p0 }
   0xe   :  { %743 = vmatprep.mubr.msk.f32.mxu0 %vm880_vm1, %v881_v10  ;;  %809 = vmatpush3.bf16.msra.mxu0 %v808_v38  ;;  %v122_v49 = vand.u32 4294901760, %v121_v43 }
   0xf   :  { %690 = vmatmul.mubr.f32.vlgmr.msra.gmra.mrb[0].mxu1 %v112_v46  ;;  %v131_v50 = vsub.f32 %v129_v41, %v130_v47  ;;  %810 = vmatprep.subr.bf16.mxu0 %v879_v3 }
  0x10   :  { %791 = vmatpush3.bf16.msra.mxu1 %v790_v42  ;;  %692 = vmatprep.mubr.msk.f32.mxu1 %vm880_vm1, %v881_v10 }
  0x11   :  { %744 = vmatmul.mubr.f32.gmra.mrb[2].mxu0 %v120_v39  ;;  %792 = vmatprep.subr.bf16.mxu1 %v879_v3  ;;  %v132_v52 = vand.u32 4294901760, %v131_v50 }
  0x12   :  { %746 = vmatprep.mubr.msk.f32.mxu0 %vm880_vm1, %v881_v10  ;;  %812 = vmatpush3.bf16.msra.mxu0 %v811_v48 }
  0x13   :  { %693 = vmatmul.mubr.f32.gmra.mrb[2].mxu1 %v122_v49  ;;  %813 = vmatprep.subr.bf16.mxu0 %v879_v3 }
  0x14   :  { %695 = vmatprep.mubr.msk.f32.mxu1 %vm880_vm1, %v881_v10  ;;  %794 = vmatpush3.bf16.msra.mxu1 %v793_v51 }
  0x15   :  { %747 = vmatmul.mubr.f32.gmra.mrb[4].mxu0 %v130_v47  ;;  %795 = vmatprep.subr.bf16.mxu1 %v879_v3 }
  0x16   :  { %757 = vmatprep.mubr.msk.f32.mxu0 %vm880_vm1, %v881_v10 }
  0x17   :  { %696 = vmatmul.mubr.f32.gmra.mrb[4].mxu1 %v132_v52 }
  0x18   :  { %706 = vmatprep.mubr.msk.f32.mxu1 %vm880_vm1, %v881_v10 }
  0x19   :  { %758 = vmatmul.mubr.f32.vlgmr.msra.gmra.mrb[0].mxu0 %v945_v20 }
  0x1a   :  { %760 = vmatprep.mubr.msk.f32.mxu0 %vm880_vm1, %v881_v10  ;;  %815 = vmatpush3.bf16.msra.mxu0 %v930_v13 }
  0x1b   :  { %707 = vmatmul.mubr.f32.vlgmr.msra.gmra.mrb[0].mxu1 %v945_v20  ;;  %816 = vmatprep.subr.bf16.mxu0 %v879_v3 }
  0x1c   :  { %797 = vmatpush3.bf16.msra.mxu1 %v796_v53  ;;  %709 = vmatprep.mubr.msk.f32.mxu1 %vm880_vm1, %v881_v10 }
  0x1d   :  { %761 = vmatmul.mubr.f32.gmra.mrb[2].mxu0 %v952_v24  ;;  %798 = vmatprep.subr.bf16.mxu1 %v879_v3 }
  0x1e   :  { %763 = vmatprep.mubr.msk.f32.mxu0 %vm880_vm1, %v881_v10  ;;  %818 = vmatpush3.bf16.msra.mxu0 %v941_v18 }
  0x1f   :  { %710 = vmatmul.mubr.f32.gmra.mrb[2].mxu1 %v952_v24 }
  0x20   :  { %712 = vmatprep.mubr.msk.f32.mxu1 %vm880_vm1, %v881_v10  ;;  %800 = vmatpush3.bf16.msra.mxu1 %v799_v54 }
  0x21   :  { %764 = vmatmul.mubr.f32.gmra.mrb[4].mxu0 %v970_v35 }
  0x22   :  { %774 = vmatprep.mubr.msk.f32.mxu0 %vm880_vm1, %v881_v10 }
  0x23   :  { %713 = vmatmul.mubr.f32.gmra.mrb[4].mxu1 %v970_v35 }
  0x24   :  { %723 = vmatprep.mubr.msk.f32.mxu1 %vm880_vm1, %v881_v10 }
  0x25   :  { %775 = vmatmul.mubr.f32.vlgmr.msra.gmra.mrb[0].mxu0 %v945_v20 }
  0x26   :  { %777 = vmatprep.mubr.msk.f32.mxu0 %vm880_vm1, %v881_v10 }
  0x27   :  { %724 = vmatmul.mubr.f32.vlgmr.msra.gmra.mrb[0].mxu1 %v958_v26 }
  0x28   :  { %726 = vmatprep.mubr.msk.f32.mxu1 %vm880_vm1, %v881_v10 }
  0x29   :  { %778 = vmatmul.mubr.f32.gmra.mrb[2].mxu0 %v952_v24 }
  0x2a   :  { %780 = vmatprep.mubr.msk.f32.mxu0 %vm880_vm1, %v881_v10 }
  0x2b   :  { %727 = vmatmul.mubr.f32.gmra.mrb[2].mxu1 %v965_v31 }
  0x2c   :  { %729 = vmatprep.mubr.msk.f32.mxu1 %vm880_vm1, %v881_v10 }
  0x2d   :  { %781 = vmatmul.mubr.f32.gmra.mrb[4].mxu0 %v970_v35 }
  0x2f   :  { %730 = vmatmul.mubr.f32.gmra.mrb[4].mxu1 %v129_v41 }
  0xf8   :  { %v594_v56 = vpop.f32.mrb[0].mxu0 }
  0xf9   :  { %v776_v57 = vpop.f32.mrb[1].mxu0 }
  0xfa   :  { %v317_v58 = vpop.f32.mrb[0].mxu1 }
  0xfb   :  { %v819_v59 = vadd.f32 %v638_v55, %v317_v58  ;;  %v725_v60 = vpop.f32.mrb[1].mxu1 }
  0xfc   :  { %v600_v61 = vpop.f32.mrb[2].mxu0 }
  0xfd   :  { %v820_v62 = vadd.f32 %v819_v59, %v594_v56  ;;  %v779_v63 = vpop.f32.mrb[3].mxu0 }
  0xfe   :  { %v324_v0 = vpop.f32.mrb[2].mxu1 }
  0xff   :  { %vm610_vm2 = vcmp.gt.f32.partialorder %v820_v62, 0.0  ;;  %v613_v1 = vmul.f32 0.2, %v820_v62  ;;  %v821_v2 = vadd.f32 %v638_v55, %v324_v0  ;;  %v728_v3 = vpop.f32.mrb[3].mxu1 }
 0x100   :  { %v606_v4 = vpop.f32.mrb[4].mxu0 }
 0x101   :  { %v616_v5 = vsel %vm610_vm2, %v820_v62, %v613_v1  ;;  %v822_v6 = vadd.f32 %v821_v2, %v600_v61  ;;  %v782_v7 = vpop.f32.mrb[5].mxu0 }
 0x102   :  { %619 = vst.msk [vmem:[#allocation2] sm:$0xff] %vm29_vm0, %v616_v5  ;;  %v331_v8 = vpop.f32.mrb[4].mxu1 }
 0x103   :  { %vm611_vm3 = vcmp.gt.f32.partialorder %v822_v6, 0.0  ;;  %v614_v9 = vmul.f32 0.2, %v822_v6  ;;  %v823_v10 = vadd.f32 %v638_v55, %v331_v8  ;;  %v731_v11 = vpop.f32.mrb[5].mxu1 }
 0x105   :  { %v617_v12 = vsel %vm611_vm3, %v822_v6, %v614_v9  ;;  %v824_v13 = vadd.f32 %v823_v10, %v606_v4 }
 0x106   :  { %620 = vst.msk [vmem:[#allocation2 + $0x8] sm:$0xff] %vm29_vm0, %v617_v12 }
 0x107   :  { %vm612_vm4 = vcmp.gt.f32.partialorder %v824_v13, 0.0  ;;  %v615_v14 = vmul.f32 0.2, %v824_v13 }
 0x109   :  { %v618_v15 = vsel %vm612_vm4, %v824_v13, %v615_v14 }
 0x10a   :  { %621 = vst.msk [vmem:[#allocation2 + $0x10] sm:$0xff] %vm29_vm0, %v618_v15 }
 0x10b   :  { %866 = shalt.err (!%p863_p4)
}
 0x10c   :  { %s867_s30 = scalar_lea.hbm %s1056_s3, 384 }
 0x10d   :  { %p868_p5 = scmp.ne.s32.totalorder %s1056_s3, %s867_s30  ;;  %p871_p6 = scmp.lt.u32.totalorder %s867_s30, %s1056_s3 }
 0x10f   :  { %p873_p7 = pnand %p871_p6, %p868_p5 }
 0x111   :  { %876 = shalt.err (!%p873_p7)
}
 0x112   :  { %s883_s8 = smov 128   ;;  %s884_s9 = smov 8  }
 0x113   :  { %633 = dma.vmem_to_hbm [thread:$0]  %s628_s26, 384, %s1056_s3, [#allocation3], %s883_s8, %s883_s8, %s884_s9  }
 0x114   :  { %877 = dma.done.wait [#allocation3], 384  }
 0x115   :  { %878 = vsyncadd [#allocation3], 4294966912 }
 0x116   :  { %637 = vsyncpa [#allocation3], 1 }

// kernel: student_teacher_forward.7
= control target key start
LH: loop header
LB: loop body
LE: loop exit
PB: predicated region body
PF: predicated region fallthrough
CT: control target
= control target key end

     0   :  { %v1663_v0 = vmov 0.0|0.0   ;;  %vm36_vm0 = vcmask 261120   ;;  %vm1664_vm1 = vmmov 0   ;;  %v1665_v10 = vmov 0.0   ;;  %s2015_s1 = inlined_call_operand.vmem [shape: f32[32,32], index: 1, kind: input, shape index: {}]   ;;  %s2016_s3 = inlined_call_operand.vmem [shape: f32[32,8], index: 3, kind: input, shape index: {}]   ;;  %s2017_s0 = inlined_call_operand.vmem [shape: f32[24,32], index: 0, kind: input, shape index: {}]   ;;  %s2018_s2 = inlined_call_operand.vmem [shape: f32[1,32], index: 2, kind: input, shape index: {}]   ;;  %s2019_s4 = inlined_call_operand.vmem [shape: f32[1,8], index: 4, kind: input, shape index: {}]   ;;  %s2020_s5 = inlined_call_operand.vmem [shape: f32[24,32], index: 5, kind: output, shape index: {0}]   ;;  %s2021_s6 = inlined_call_operand.vmem [shape: f32[24,8], index: 6, kind: output, shape index: {1}]  }
   0x1   :  { %1522 = vmatprep.subr.bf16.mxu0 %v1663_v0  ;;  %1558 = vmatprep.subr.bf16.mxu1 %v1663_v0  ;;  %v25_v1 = vld [vmem:[%s2015_s1] sm:$0xff]  ;;  %v26_v2 = vld [vmem:[%s2015_s1 + $0x8] sm:$0xff]  ;;  %v27_v8 = vld [vmem:[%s2015_s1 + $0x10] sm:$0xff]  ;;  %vm1220_vm2 = vcmask 64512  }
   0x2   :  { %v629_v3 = vld [vmem:[%s2016_s3] sm:$0xff]  ;;  %v47_v4 = vand.u32 4294901760, %v25_v1  ;;  %v50_v5 = vand.u32 4294901760, %v26_v2  ;;  %v630_v6 = vld [vmem:[%s2016_s3 + $0x8] sm:$0xff]  ;;  %v28_v9 = vld [vmem:[%s2015_s1 + $0x18] sm:$0xff]  ;;  %1326 = vmatprep.mubr.msk.f32.mxu0 %vm1664_vm1, %v1665_v10  ;;  %1428 = vmatprep.mubr.msk.f32.mxu1 %vm1664_vm1, %v1665_v10  ;;  %v53_v12 = vand.u32 4294901760, %v27_v8 }
   0x3   :  { %v641_v7 = vand.u32 4294901760, %v629_v3  ;;  %v644_v11 = vand.u32 4294901760, %v630_v6  ;;  %v56_v13 = vand.u32 4294901760, %v28_v9  ;;  %v631_v14 = vld [vmem:[%s2016_s3 + $0x10] sm:$0xff]  ;;  %v632_v15 = vld [vmem:[%s2016_s3 + $0x18] sm:$0xff]  ;;  %v22_v16 = vld [vmem:[%s2017_s0] sm:$0xff] }
   0x4   :  { %v1734_v17 = vpack.c.bf16 %v50_v5, %v47_v4  ;;  %v1736_v18 = vsub.f32 %v25_v1, %v47_v4  ;;  %v1738_v19 = vsub.f32 %v26_v2, %v50_v5  ;;  %v1748_v24 = vsub.f32 %v27_v8, %v53_v12  ;;  %v23_v33 = vld [vmem:[%s2017_s0 + $0x8] sm:$0xff]  ;;  %v24_v54 = vld [vmem:[%s2017_s0 + $0x10] sm:$0xff] }
   0x5   :  { %v1740_v20 = vsub.f32 %v629_v3, %v641_v7  ;;  %v1742_v21 = vpack.c.bf16 %v644_v11, %v641_v7  ;;  %v1744_v22 = vsub.f32 %v630_v6, %v644_v11  ;;  %v1746_v23 = vpack.c.bf16 %v56_v13, %v53_v12 }
   0x6   :  { %1524 = vmatpush3.bf16.msra.mxu0 %v1734_v17  ;;  %v1751_v25 = vsub.f32 %v28_v9, %v56_v13  ;;  %v647_v26 = vand.u32 4294901760, %v631_v14  ;;  %v650_v27 = vand.u32 4294901760, %v632_v15  ;;  %v38_v28 = vsel %vm36_vm0, %v22_v16, 0 }
   0x7   :  { %1560 = vmatpush3.bf16.msra.mxu1 %v1742_v21  ;;  %1525 = vmatprep.subr.bf16.mxu0 %v1663_v0  ;;  %v1756_v29 = vand.u32 4294901760, %v38_v28  ;;  %v148_v30 = vand.u32 4294901760, %v1736_v18  ;;  %v155_v31 = vand.u32 4294901760, %v1738_v19  ;;  %v742_v32 = vand.u32 4294901760, %v1740_v20 }
   0x8   :  { %1561 = vmatprep.subr.bf16.mxu1 %v1663_v0  ;;  %v1765_v34 = vpack.c.bf16 %v650_v27, %v647_v26  ;;  %v1767_v35 = vsub.f32 %v631_v14, %v647_v26  ;;  %v1769_v36 = vsub.f32 %v632_v15, %v650_v27  ;;  %v749_v37 = vand.u32 4294901760, %v1744_v22 }
   0x9   :  { %v1773_v38 = vsub.f32 %v38_v28, %v1756_v29  ;;  %v149_v39 = vsub.f32 %v1736_v18, %v148_v30  ;;  %v156_v40 = vsub.f32 %v1738_v19, %v155_v31  ;;  %v743_v41 = vsub.f32 %v1740_v20, %v742_v32 }
   0xa   :  { %1527 = vmatpush3.bf16.msra.mxu0 %v1746_v23  ;;  %v750_v42 = vsub.f32 %v1744_v22, %v749_v37  ;;  %v41_v43 = vsel %vm36_vm0, %v23_v33, 0  ;;  %v162_v44 = vand.u32 4294901760, %v1748_v24  ;;  %v169_v45 = vand.u32 4294901760, %v1751_v25 }
   0xb   :  { %1563 = vmatpush3.bf16.msra.mxu1 %v1765_v34  ;;  %v1793_v46 = vand.u32 4294901760, %v1773_v38  ;;  %1528 = vmatprep.subr.bf16.mxu0 %v1663_v0  ;;  %v150_v47 = vand.u32 4294901760, %v149_v39  ;;  %v157_v48 = vand.u32 4294901760, %v156_v40  ;;  %v744_v49 = vand.u32 4294901760, %v743_v41 }
   0xc   :  { %1564 = vmatprep.subr.bf16.mxu1 %v1663_v0  ;;  %v751_v50 = vand.u32 4294901760, %v750_v42  ;;  %v1797_v51 = vand.u32 4294901760, %v41_v43  ;;  %v163_v52 = vsub.f32 %v1748_v24, %v162_v44  ;;  %v170_v53 = vsub.f32 %v1751_v25, %v169_v45 }
   0xd   :  { %v118_v55 = vsub.f32 %v1773_v38, %v1793_v46  ;;  %v1529_v56 = vpack.c.bf16 %v157_v48, %v150_v47  ;;  %v756_v57 = vand.u32 4294901760, %v1767_v35  ;;  %v763_v58 = vand.u32 4294901760, %v1769_v36 }
   0xe   :  { %v1565_v59 = vpack.c.bf16 %v751_v50, %v744_v49  ;;  %v1813_v60 = vsub.f32 %v41_v43, %v1797_v51  ;;  %v164_v61 = vand.u32 4294901760, %v163_v52  ;;  %v171_v62 = vand.u32 4294901760, %v170_v53 }
   0xf   :  { %v119_v63 = vand.u32 4294901760, %v118_v55  ;;  %v757_v1 = vsub.f32 %v1767_v35, %v756_v57  ;;  %v764_v2 = vsub.f32 %v1769_v36, %v763_v58  ;;  %v44_v3 = vsel %vm36_vm0, %v24_v54, 0 }
  0x10   :  { %v1823_v4 = vand.u32 4294901760, %v1813_v60  ;;  %v1825_v5 = vand.u32 4294901760, %v44_v3  ;;  %v1532_v11 = vpack.c.bf16 %v171_v62, %v164_v61  ;;  %v1535_v26 = vpack.c.bf16 %v1738_v19, %v1736_v18 }
  0x11   :  { %1327 = vmatmul.mubr.f32.vlgmr.msra.gmra.mrb[0].mxu0 %v119_v63  ;;  %1429 = vmatmul.mubr.f32.vlgmr.msra.gmra.mrb[0].mxu1 %v119_v63  ;;  %v758_v6 = vand.u32 4294901760, %v757_v1  ;;  %v765_v7 = vand.u32 4294901760, %v764_v2  ;;  %v1571_v27 = vpack.c.bf16 %v1744_v22, %v1740_v20  ;;  %v1538_v28 = vpack.c.bf16 %v1751_v25, %v1748_v24 }
  0x12   :  { %1530 = vmatpush3.bf16.msra.mxu0 %v1529_v56  ;;  %1566 = vmatpush3.bf16.msra.mxu1 %v1565_v59  ;;  %v128_v8 = vsub.f32 %v1813_v60, %v1823_v4  ;;  %v1830_v9 = vsub.f32 %v44_v3, %v1825_v5  ;;  %v1574_v33 = vpack.c.bf16 %v1769_v36, %v1767_v35 }
  0x13   :  { %1329 = vmatprep.mubr.msk.f32.mxu0 %vm1664_vm1, %v1665_v10  ;;  %1431 = vmatprep.mubr.msk.f32.mxu1 %vm1664_vm1, %v1665_v10  ;;  %v1568_v13 = vpack.c.bf16 %v765_v7, %v758_v6  ;;  %v1583_v39 = vpack.c.bf16 %v749_v37, %v742_v32  ;;  %v1550_v40 = vpack.c.bf16 %v169_v45, %v162_v44 }
  0x14   :  { %v129_v12 = vand.u32 4294901760, %v128_v8  ;;  %1531 = vmatprep.subr.bf16.mxu0 %v1663_v0  ;;  %1567 = vmatprep.subr.bf16.mxu1 %v1663_v0  ;;  %v1839_v14 = vand.u32 4294901760, %v1830_v9  ;;  %v1586_v18 = vpack.c.bf16 %v763_v58, %v756_v57 }
  0x16   :  { %1330 = vmatmul.mubr.f32.gmra.mrb[2].mxu0 %v129_v12  ;;  %1432 = vmatmul.mubr.f32.gmra.mrb[2].mxu1 %v129_v12  ;;  %v138_v15 = vsub.f32 %v1830_v9, %v1839_v14 }
  0x17   :  { %1332 = vmatprep.mubr.msk.f32.mxu0 %vm1664_vm1, %v1665_v10  ;;  %1533 = vmatpush3.bf16.msra.mxu0 %v1532_v11 }
  0x18   :  { %1434 = vmatprep.mubr.msk.f32.mxu1 %vm1664_vm1, %v1665_v10  ;;  %1569 = vmatpush3.bf16.msra.mxu1 %v1568_v13  ;;  %v139_v16 = vand.u32 4294901760, %v138_v15 }
  0x19   :  { %1534 = vmatprep.subr.bf16.mxu0 %v1663_v0  ;;  %1570 = vmatprep.subr.bf16.mxu1 %v1663_v0 }
  0x1a   :  { %1333 = vmatmul.mubr.f32.gmra.mrb[4].mxu0 %v139_v16  ;;  %1435 = vmatmul.mubr.f32.gmra.mrb[4].mxu1 %v139_v16 }
  0x1b   :  { %1343 = vmatprep.mubr.msk.f32.mxu0 %vm1664_vm1, %v1665_v10  ;;  %1445 = vmatprep.mubr.msk.f32.mxu1 %vm1664_vm1, %v1665_v10 }
  0x1e   :  { %1344 = vmatmul.mubr.f32.vlgmr.msra.gmra.mrb[0].mxu0 %v1756_v29  ;;  %1446 = vmatmul.mubr.f32.vlgmr.msra.gmra.mrb[0].mxu1 %v1756_v29 }
  0x1f   :  { %1536 = vmatpush3.bf16.msra.mxu0 %v1535_v26  ;;  %1572 = vmatpush3.bf16.msra.mxu1 %v1571_v27 }
  0x20   :  { %1346 = vmatprep.mubr.msk.f32.mxu0 %vm1664_vm1, %v1665_v10  ;;  %1448 = vmatprep.mubr.msk.f32.mxu1 %vm1664_vm1, %v1665_v10 }
  0x21   :  { %1537 = vmatprep.subr.bf16.mxu0 %v1663_v0  ;;  %1573 = vmatprep.subr.bf16.mxu1 %v1663_v0 }
  0x22   :  { %1347 = vmatmul.mubr.f32.gmra.mrb[2].mxu0 %v1797_v51  ;;  %1449 = vmatmul.mubr.f32.gmra.mrb[2].mxu1 %v1797_v51 }
  0x23   :  { %1349 = vmatprep.mubr.msk.f32.mxu0 %vm1664_vm1, %v1665_v10  ;;  %1539 = vmatpush3.bf16.msra.mxu0 %v1538_v28 }
  0x24   :  { %1451 = vmatprep.mubr.msk.f32.mxu1 %vm1664_vm1, %v1665_v10  ;;  %1575 = vmatpush3.bf16.msra.mxu1 %v1574_v33 }
  0x25   :  { %1540 = vmatprep.subr.bf16.mxu0 %v1663_v0  ;;  %1576 = vmatprep.subr.bf16.mxu1 %v1663_v0 }
  0x26   :  { %1350 = vmatmul.mubr.f32.gmra.mrb[4].mxu0 %v1825_v5  ;;  %1452 = vmatmul.mubr.f32.gmra.mrb[4].mxu1 %v1825_v5 }
  0x27   :  { %1360 = vmatprep.mubr.msk.f32.mxu0 %vm1664_vm1, %v1665_v10  ;;  %1462 = vmatprep.mubr.msk.f32.mxu1 %vm1664_vm1, %v1665_v10 }
  0x2a   :  { %1361 = vmatmul.mubr.f32.vlgmr.msra.gmra.mrb[0].mxu0 %v1773_v38  ;;  %1463 = vmatmul.mubr.f32.vlgmr.msra.gmra.mrb[0].mxu1 %v1773_v38  ;;  %v1547_v38 = vpack.c.bf16 %v155_v31, %v148_v30 }
  0x2b   :  { %1542 = vmatpush3.bf16.msra.mxu0 %v1734_v17  ;;  %1578 = vmatpush3.bf16.msra.mxu1 %v1742_v21 }
  0x2c   :  { %1363 = vmatprep.mubr.msk.f32.mxu0 %vm1664_vm1, %v1665_v10  ;;  %1465 = vmatprep.mubr.msk.f32.mxu1 %vm1664_vm1, %v1665_v10 }
  0x2d   :  { %1543 = vmatprep.subr.bf16.mxu0 %v1663_v0  ;;  %1579 = vmatprep.subr.bf16.mxu1 %v1663_v0 }
  0x2e   :  { %1364 = vmatmul.mubr.f32.gmra.mrb[2].mxu0 %v1813_v60  ;;  %1466 = vmatmul.mubr.f32.gmra.mrb[2].mxu1 %v1813_v60 }
  0x2f   :  { %1366 = vmatprep.mubr.msk.f32.mxu0 %vm1664_vm1, %v1665_v10  ;;  %1545 = vmatpush3.bf16.msra.mxu0 %v1746_v23 }
  0x30   :  { %1468 = vmatprep.mubr.msk.f32.mxu1 %vm1664_vm1, %v1665_v10  ;;  %1581 = vmatpush3.bf16.msra.mxu1 %v1765_v34 }
  0x31   :  { %1546 = vmatprep.subr.bf16.mxu0 %v1663_v0  ;;  %1582 = vmatprep.subr.bf16.mxu1 %v1663_v0 }
  0x32   :  { %1367 = vmatmul.mubr.f32.gmra.mrb[4].mxu0 %v1830_v9  ;;  %1469 = vmatmul.mubr.f32.gmra.mrb[4].mxu1 %v1830_v9 }
  0x33   :  { %1377 = vmatprep.mubr.msk.f32.mxu0 %vm1664_vm1, %v1665_v10  ;;  %1479 = vmatprep.mubr.msk.f32.mxu1 %vm1664_vm1, %v1665_v10 }
  0x36   :  { %1378 = vmatmul.mubr.f32.vlgmr.msra.gmra.mrb[0].mxu0 %v1793_v46  ;;  %1480 = vmatmul.mubr.f32.vlgmr.msra.gmra.mrb[0].mxu1 %v1793_v46 }
  0x37   :  { %1548 = vmatpush3.bf16.msra.mxu0 %v1547_v38  ;;  %1584 = vmatpush3.bf16.msra.mxu1 %v1583_v39 }
  0x38   :  { %1380 = vmatprep.mubr.msk.f32.mxu0 %vm1664_vm1, %v1665_v10  ;;  %1482 = vmatprep.mubr.msk.f32.mxu1 %vm1664_vm1, %v1665_v10 }
  0x39   :  { %1549 = vmatprep.subr.bf16.mxu0 %v1663_v0  ;;  %1585 = vmatprep.subr.bf16.mxu1 %v1663_v0 }
  0x3a   :  { %1381 = vmatmul.mubr.f32.gmra.mrb[2].mxu0 %v1823_v4  ;;  %1483 = vmatmul.mubr.f32.gmra.mrb[2].mxu1 %v1823_v4 }
  0x3b   :  { %1383 = vmatprep.mubr.msk.f32.mxu0 %vm1664_vm1, %v1665_v10  ;;  %1551 = vmatpush3.bf16.msra.mxu0 %v1550_v40 }
  0x3c   :  { %1485 = vmatprep.mubr.msk.f32.mxu1 %vm1664_vm1, %v1665_v10  ;;  %1587 = vmatpush3.bf16.msra.mxu1 %v1586_v18 }
  0x3d   :  { %1552 = vmatprep.subr.bf16.mxu0 %v1663_v0  ;;  %1588 = vmatprep.subr.bf16.mxu1 %v1663_v0 }
  0x3e   :  { %1384 = vmatmul.mubr.f32.gmra.mrb[4].mxu0 %v1839_v14  ;;  %1486 = vmatmul.mubr.f32.gmra.mrb[4].mxu1 %v1839_v14 }
  0x3f   :  { %1394 = vmatprep.mubr.msk.f32.mxu0 %vm1664_vm1, %v1665_v10  ;;  %1496 = vmatprep.mubr.msk.f32.mxu1 %vm1664_vm1, %v1665_v10 }
  0x42   :  { %1395 = vmatmul.mubr.f32.vlgmr.msra.gmra.mrb[0].mxu0 %v1756_v29  ;;  %1497 = vmatmul.mubr.f32.vlgmr.msra.gmra.mrb[0].mxu1 %v1756_v29 }
  0x43   :  { %1554 = vmatpush3.bf16.msra.mxu0 %v1734_v17  ;;  %1590 = vmatpush3.bf16.msra.mxu1 %v1742_v21  ;;  %v1233_v17 = vld [vmem:[%s2019_s4] ss:$0 sm:$0xff] }
  0x44   :  { %1397 = vmatprep.mubr.msk.f32.mxu0 %vm1664_vm1, %v1665_v10  ;;  %1499 = vmatprep.mubr.msk.f32.mxu1 %vm1664_vm1, %v1665_v10 }
  0x45   :  { %1555 = vmatprep.subr.bf16.mxu0 %v1663_v0  ;;  %1591 = vmatprep.subr.bf16.mxu1 %v1663_v0  ;;  %v1232_v0 = vld [vmem:[%s2018_s2] ss:$0 sm:$0xff] }
  0x46   :  { %1398 = vmatmul.mubr.f32.gmra.mrb[2].mxu0 %v1797_v51  ;;  %1500 = vmatmul.mubr.f32.gmra.mrb[2].mxu1 %v1797_v51 }
  0x47   :  { %1400 = vmatprep.mubr.msk.f32.mxu0 %vm1664_vm1, %v1665_v10  ;;  %1557 = vmatpush3.bf16.msra.mxu0 %v1746_v23 }
  0x48   :  { %1502 = vmatprep.mubr.msk.f32.mxu1 %vm1664_vm1, %v1665_v10  ;;  %1593 = vmatpush3.bf16.msra.mxu1 %v1765_v34 }
  0x4a   :  { %1401 = vmatmul.mubr.f32.gmra.mrb[4].mxu0 %v1825_v5  ;;  %1503 = vmatmul.mubr.f32.gmra.mrb[4].mxu1 %v1825_v5 }
  0x4b   :  { %1411 = vmatprep.mubr.msk.f32.mxu0 %vm1664_vm1, %v1665_v10  ;;  %1513 = vmatprep.mubr.msk.f32.mxu1 %vm1664_vm1, %v1665_v10 }
  0x4e   :  { %1412 = vmatmul.mubr.f32.vlgmr.msra.gmra.mrb[0].mxu0 %v1756_v29  ;;  %1514 = vmatmul.mubr.f32.vlgmr.msra.gmra.mrb[0].mxu1 %v1756_v29 }
  0x4f   :  { %1414 = vmatprep.mubr.msk.f32.mxu0 %vm1664_vm1, %v1665_v10  ;;  %1516 = vmatprep.mubr.msk.f32.mxu1 %vm1664_vm1, %v1665_v10 }
  0x52   :  { %1415 = vmatmul.mubr.f32.gmra.mrb[2].mxu0 %v1797_v51  ;;  %1517 = vmatmul.mubr.f32.gmra.mrb[2].mxu1 %v1797_v51 }
  0x53   :  { %1417 = vmatprep.mubr.msk.f32.mxu0 %vm1664_vm1, %v1665_v10  ;;  %1519 = vmatprep.mubr.msk.f32.mxu1 %vm1664_vm1, %v1665_v10 }
  0x56   :  { %1418 = vmatmul.mubr.f32.gmra.mrb[4].mxu0 %v1825_v5  ;;  %1520 = vmatmul.mubr.f32.gmra.mrb[4].mxu1 %v1825_v5 }
 0x121   :  { %v601_v19 = vpop.f32.mrb[0].mxu0  ;;  %v1195_v20 = vpop.f32.mrb[0].mxu1 }
 0x122   :  { %v1594_v21 = vadd.f32 %v1232_v0, %v601_v19  ;;  %v1597_v22 = vadd.f32 %v1233_v17, %v1195_v20  ;;  %v1413_v23 = vpop.f32.mrb[1].mxu0  ;;  %v1515_v24 = vpop.f32.mrb[1].mxu1 }
 0x124   :  { %vm617_vm3 = vcmp.gt.f32.partialorder %v1594_v21, 0.0  ;;  %v620_v10 = vmul.f32 0.2, %v1594_v21  ;;  %vm1211_vm4 = vcmp.gt.f32.partialorder %v1597_v22, 0.0  ;;  %v1214_v25 = vmul.f32 0.2, %v1597_v22 }
 0x125   :  { %v607_v29 = vpop.f32.mrb[2].mxu0  ;;  %v1201_v30 = vpop.f32.mrb[2].mxu1 }
 0x126   :  { %v623_v31 = vsel %vm617_vm3, %v1594_v21, %v620_v10  ;;  %v1217_v32 = vsel %vm1211_vm4, %v1597_v22, %v1214_v25  ;;  %v1595_v34 = vadd.f32 %v1232_v0, %v607_v29  ;;  %v1598_v35 = vadd.f32 %v1233_v17, %v1201_v30  ;;  %v1416_v36 = vpop.f32.mrb[3].mxu0  ;;  %v1518_v37 = vpop.f32.mrb[3].mxu1 }
 0x127   :  { %626 = vst.msk [vmem:[%s2020_s5] sm:$0xff] %vm36_vm0, %v623_v31 }
 0x128   :  { %1221 = vst.msk [vmem:[%s2021_s6] sm:$0xff] %vm1220_vm2, %v1217_v32  ;;  %vm618_vm5 = vcmp.gt.f32.partialorder %v1595_v34, 0.0  ;;  %v621_v41 = vmul.f32 0.2, %v1595_v34  ;;  %vm1212_vm6 = vcmp.gt.f32.partialorder %v1598_v35, 0.0 }
 0x129   :  { %v1215_v42 = vmul.f32 0.2, %v1598_v35  ;;  %v613_v43 = vpop.f32.mrb[4].mxu0  ;;  %v1207_v44 = vpop.f32.mrb[4].mxu1 }
 0x12a   :  { %v624_v45 = vsel %vm618_vm5, %v1595_v34, %v621_v41  ;;  %v1596_v47 = vadd.f32 %v1232_v0, %v613_v43  ;;  %v1599_v48 = vadd.f32 %v1233_v17, %v1207_v44  ;;  %v1419_v49 = vpop.f32.mrb[5].mxu0  ;;  %v1521_v50 = vpop.f32.mrb[5].mxu1 }
 0x12b   :  { %v1218_v46 = vsel %vm1212_vm6, %v1598_v35, %v1215_v42  ;;  %627 = vst.msk [vmem:[%s2020_s5 + $0x8] sm:$0xff] %vm36_vm0, %v624_v45 }
 0x12c   :  { %1222 = vst.msk [vmem:[%s2021_s6 + $0x8] sm:$0xff] %vm1220_vm2, %v1218_v46  ;;  %vm619_vm7 = vcmp.gt.f32.partialorder %v1596_v47, 0.0  ;;  %v622_v51 = vmul.f32 0.2, %v1596_v47  ;;  %vm1213_vm8 = vcmp.gt.f32.partialorder %v1599_v48, 0.0 }
 0x12d   :  { %v1216_v52 = vmul.f32 0.2, %v1599_v48 }
 0x12e   :  { %v625_v53 = vsel %vm619_vm7, %v1596_v47, %v622_v51 }
 0x12f   :  { %v1219_v54 = vsel %vm1213_vm8, %v1599_v48, %v1216_v52  ;;  %628 = vst.msk [vmem:[%s2020_s5 + $0x10] sm:$0xff] %vm36_vm0, %v625_v53 }
 0x130   :  { %1223 = vst.msk [vmem:[%s2021_s6 + $0x10] sm:$0xff] %vm1220_vm2, %v1219_v54 }

// kernel: student_teacher_forward.8
= control target key start
LH: loop header
LB: loop body
LE: loop exit
PB: predicated region body
PF: predicated region fallthrough
CT: control target
= control target key end

     0   :  { %vm77_vm0 = vcmask 1043456   ;;  %vm40_vm1 = vcmask 31744   ;;  %v3355_v3 = vmov 2   ;;  %v3356_v4 = vmov 0   ;;  %s4152_s3 = inlined_call_operand.vmem [shape: f32[4,8], index: 3, kind: input, shape index: {}]   ;;  %s4153_s1 = inlined_call_operand.vmem [shape: f32[96,4], index: 1, kind: input, shape index: {}]   ;;  %s4154_s2 = inlined_call_operand.vmem [shape: s32[24,4], index: 2, kind: input, shape index: {}]   ;;  %s4155_s0 = inlined_call_operand.vmem [shape: f32[24,8], index: 0, kind: input, shape index: {}]   ;;  %s4156_s4 = inlined_call_operand.vmem [shape: f32[1,8], index: 4, kind: input, shape index: {}]   ;;  %s4157_s5 = inlined_call_operand.vmem [shape: f32[24,16], index: 5, kind: output, shape index: {}]  }
   0x1   :  { %v32_v0 = vld [vmem:[%s4152_s3] sm:$0xf]  ;;  %v22_v2 = vld [vmem:[%s4153_s1 + $0x10] sm:$0xff]  ;;  %3345 = vset.pattern.permute.xlu1 %v3355_v3  ;;  %3344 = vset.pattern.permute.xlu0 %v3356_v4  ;;  %v21_v8 = vld [vmem:[%s4153_s1 + $0x8] sm:$0xff]  ;;  %v3357_v60 = vmov 3   ;;  %vm3360_vm2 = vmmov 0  }
   0x2   :  { %v20_v1 = vld [vmem:[%s4153_s1] sm:$0xff]  ;;  %v79_v5 = vsel %vm77_vm0, %v32_v0, 0  ;;  %v48_v7 = vsel %vm40_vm1, %v22_v2, 0  ;;  %v23_v9 = vld [vmem:[%s4153_s1 + $0x18] sm:$0xff]  ;;  %v45_v14 = vsel %vm40_vm1, %v21_v8, 0  ;;  %v25_v15 = vld [vmem:[%s4153_s1 + $0x28] sm:$0xff] }
   0x3   :  { %v42_v6 = vsel %vm40_vm1, %v20_v1, 0  ;;  %v24_v10 = vld [vmem:[%s4153_s1 + $0x20] sm:$0xff]  ;;  %v3415_v11 = vand.u32 4294901760, %v79_v5  ;;  %v3419_v13 = vand.u32 4294901760, %v48_v7  ;;  %v26_v16 = vld [vmem:[%s4153_s1 + $0x30] sm:$0xff]  ;;  %v3428_v17 = vand.u32 4294901760, %v45_v14 }
   0x4   :  { %v3417_v12 = vand.u32 4294901760, %v42_v6  ;;  %v51_v18 = vsel %vm40_vm1, %v23_v9, 0  ;;  %v54_v19 = vsel %vm40_vm1, %v24_v10, 0  ;;  %v57_v20 = vsel %vm40_vm1, %v25_v15, 0  ;;  %v3436_v21 = vld [vmem:[%s4154_s2] sm:$0xff]  ;;  %v27_v26 = vld [vmem:[%s4153_s1 + $0x38] sm:$0xff] }
   0x5   :  { %2668 = vmatprep.subr.mxu0 %v3415_v11  ;;  %3202 = vmatprep.subr.mxu1 %v3415_v11  ;;  %v3444_v23 = vsub.f32 %v48_v7, %v3419_v13  ;;  %v3447_v24 = vsub.f32 %v79_v5, %v3415_v11  ;;  %v3449_v25 = vand.u32 4294901760, %v51_v18  ;;  %v3457_v27 = vsub.f32 %v45_v14, %v3428_v17  ;;  %v3495_v43 = vld [vmem:[%s4154_s2 + $0x8] sm:$0xff]  ;;  %v28_v48 = vld [vmem:[%s4153_s1 + $0x40] sm:$0xff]  ;;  %v30_v58 = vld [vmem:[%s4153_s1 + $0x50] sm:$0xff] }
   0x6   :  { %v3441_v22 = vsub.f32 %v42_v6, %v3417_v12  ;;  %2669 = vmatpush3.msra.mxu0 %v3415_v11  ;;  %3203 = vmatpush3.msra.mxu1 %v3415_v11  ;;  %v3459_v28 = vand.u32 4294901760, %v54_v19  ;;  %v3461_v29 = vand.u32 4294901760, %v57_v20  ;;  %v60_v30 = vsel %vm40_vm1, %v26_v16, 0  ;;  %v29_v49 = vld [vmem:[%s4153_s1 + $0x48] sm:$0xff]  ;;  %v31_v59 = vld [vmem:[%s4153_s1 + $0x58] sm:$0xff] }
   0x7   :  { %v169_v32 = vand.u32 4294901760, %v3444_v23  ;;  %2708 = vmatprep.subr.mxu0 %v3447_v24  ;;  %v3468_v33 = vsub.f32 %v51_v18, %v3449_v25  ;;  %v3470_v34 = vand.u32 4294901760, %v60_v30  ;;  %1803 = vperm.xlu1 %3345, %v3436_v21   ;;  %v159_v35 = vand.u32 4294901760, %v3457_v27 }
   0x8   :  { %v149_v31 = vand.u32 4294901760, %v3441_v22  ;;  %v3475_v36 = vsub.f32 %v54_v19, %v3459_v28  ;;  %v3478_v37 = vsub.f32 %v57_v20, %v3461_v29  ;;  %v63_v38 = vsel %vm40_vm1, %v27_v26, 0  ;;  %1761 = vperm.xlu0 %3344, %v3436_v21  }
   0x9   :  { %v170_v40 = vsub.f32 %v3444_v23, %v169_v32  ;;  %v179_v41 = vand.u32 4294901760, %v3468_v33  ;;  %v3490_v42 = vsub.f32 %v60_v30, %v3470_v34  ;;  %v160_v44 = vsub.f32 %v3457_v27, %v159_v35 }
   0xa   :  { %v150_v39 = vsub.f32 %v3441_v22, %v149_v31  ;;  %v189_v45 = vand.u32 4294901760, %v3475_v36  ;;  %v199_v46 = vand.u32 4294901760, %v3478_v37  ;;  %v3502_v47 = vand.u32 4294901760, %v63_v38 }
   0xb   :  { %v171_v51 = vand.u32 4294901760, %v170_v40  ;;  %v180_v52 = vsub.f32 %v3468_v33, %v179_v41  ;;  %v209_v53 = vand.u32 4294901760, %v3490_v42  ;;  %3346 = vset.pattern.permute.xlu1 %v3356_v4  ;;  %v161_v54 = vand.u32 4294901760, %v160_v44 }
   0xc   :  { %v151_v50 = vand.u32 4294901760, %v150_v39  ;;  %v190_v55 = vsub.f32 %v3475_v36, %v189_v45  ;;  %v200_v56 = vsub.f32 %v3478_v37, %v199_v46  ;;  %v3522_v57 = vsub.f32 %v63_v38, %v3502_v47  ;;  %1764 = vperm.xlu1 %3346, %v3495_v43   ;;  %3348 = vset.pattern.permute.xlu0 %v3357_v60 }
   0xd   :  { %2673 = vmatprep.mubr.f32.mxu1 %v171_v51  ;;  %v181_v61 = vand.u32 4294901760, %v180_v52  ;;  %v210_v62 = vsub.f32 %v3490_v42, %v209_v53  ;;  %v66_v63 = vsel %vm40_vm1, %v28_v48, 0  ;;  %v69_v0 = vsel %vm40_vm1, %v29_v49, 0  ;;  %1824 = vperm.xlu0 %3348, %v3436_v21  }
   0xe   :  { %2670 = vmatprep.mubr.f32.mxu0 %v151_v50  ;;  %v191_v1 = vand.u32 4294901760, %v190_v55  ;;  %v201_v2 = vand.u32 4294901760, %v200_v56  ;;  %v219_v5 = vand.u32 4294901760, %v3522_v57  ;;  %v3538_v6 = vand.u32 4294901760, %v66_v63 }
   0xf   :  { %2671 = vmatmul.mubr.f32.vlgmr.msra.gmra.mrb[0].mxu0 %v161_v54  ;;  %2674 = vmatmul.mubr.f32.vlgmr.msra.gmra.mrb[0].mxu1 %v181_v61  ;;  %v211_v7 = vand.u32 4294901760, %v210_v62  ;;  %v3542_v8 = vand.u32 4294901760, %v69_v0  ;;  %v72_v9 = vsel %vm40_vm1, %v30_v58, 0  ;;  %v75_v10 = vsel %vm40_vm1, %v31_v59, 0  ;;  %v1759_v62 = vld [vmem:[%s4154_s2 + $0x10] sm:$0xff] }
  0x10   :  { %2709 = vmatpush3.msra.mxu0 %v3447_v24  ;;  %2676 = vmatprep.mubr.f32.mxu1 %v191_v1  ;;  %v220_v14 = vsub.f32 %v3522_v57, %v219_v5  ;;  %v3551_v15 = vsub.f32 %v66_v63, %v3538_v6  ;;  %v3553_v16 = vand.u32 4294901760, %v72_v9  ;;  %v3555_v18 = vand.u32 4294901760, %v75_v10 }
  0x11   :  { %2710 = vmatprep.mubr.f32.mxu0 %v3441_v22  ;;  %2728 = vmatprep.subr.mxu0 %v3415_v11  ;;  %v3559_v19 = vsub.f32 %v69_v0, %v3542_v8  ;;  %v3562_v20 = vand.u32 4294901760, %v3447_v24  ;;  %v3358_v26 = vmov 1   ;;  %vm1844_vm10 = vcmask 195584  }
  0x12   :  { %3347 = vset.pattern.permute.xlu1 %v3358_v26  ;;  %v229_v30 = vand.u32 4294901760, %v3551_v15  ;;  %v3567_v38 = vsub.f32 %v72_v9, %v3553_v16  ;;  %v3570_v39 = vsub.f32 %v75_v10, %v3555_v18  ;;  %v221_v40 = vand.u32 4294901760, %v220_v14  ;;  %3349 = vset.pattern.permute.xlu0 %v3358_v26 }
  0x13   :  { %2711 = vmatmul.mubr.f32.vlgmr.msra.gmra.mrb[2].mxu0 %v3457_v27  ;;  %1785 = vperm.xlu1 %3347, %v3495_v43   ;;  %v239_v44 = vand.u32 4294901760, %v3559_v19  ;;  %v271_v48 = vsub.f32 %v3447_v24, %v3562_v20 }
  0x14   :  { %2677 = vmatmul.mubr.f32.gmra.mrb[2].mxu1 %v201_v2  ;;  %2729 = vmatpush3.msra.mxu0 %v3415_v11  ;;  %v230_v49 = vsub.f32 %v3551_v15, %v229_v30  ;;  %v249_v50 = vand.u32 4294901760, %v3567_v38  ;;  %v259_v51 = vand.u32 4294901760, %v3570_v39 }
  0x15   :  { %2679 = vmatprep.mubr.f32.mxu1 %v211_v7  ;;  %2713 = vmatprep.mubr.f32.mxu0 %v3444_v23  ;;  %v240_v52 = vsub.f32 %v3559_v19, %v239_v44  ;;  %v272_v54 = vand.u32 4294901760, %v271_v48 }
  0x16   :  { %2748 = vmatprep.subr.mxu0 %v3562_v20  ;;  %v231_v24 = vand.u32 4294901760, %v230_v49  ;;  %v250_v55 = vsub.f32 %v3567_v38, %v249_v50  ;;  %v260_v58 = vsub.f32 %v3570_v39, %v259_v51  ;;  %1782 = vperm.xlu0 %3349, %v3436_v21   ;;  %v3359_v21 = vmov 0.0|0.0  }
  0x17   :  { %2714 = vmatmul.mubr.f32.gmra.mrb[4].mxu0 %v3468_v33  ;;  %3350 = vset.pattern.permute.xlu1 %v3355_v3  ;;  %v241_v56 = vand.u32 4294901760, %v240_v52 }
  0x18   :  { %2680 = vmatmul.mubr.f32.gmra.mrb[4].mxu1 %v221_v40  ;;  %2716 = vmatprep.mubr.f32.mxu0 %v3475_v36  ;;  %v251_v59 = vand.u32 4294901760, %v250_v55  ;;  %v261_v61 = vand.u32 4294901760, %v260_v58 }
  0x19   :  { %2682 = vmatprep.mubr.f32.mxu1 %v231_v24  ;;  %2688 = vmatprep.subr.mxu1 %v272_v54 }
  0x1a   :  { %2689 = vmatpush3.msra.mxu1 %v272_v54  ;;  %1806 = vperm.xlu1 %3350, %v3495_v43  }
  0x1b   :  { %2717 = vmatmul.mubr.f32.gmra.mrb[6].mxu0 %v3478_v37  ;;  %1788 = vperm.xlu0 %3349, %v1759_v62  }
  0x1c   :  { %2683 = vmatmul.mubr.f32.gmra.mrb[6].mxu1 %v241_v56  ;;  %2719 = vmatprep.mubr.f32.mxu0 %v3490_v42 }
  0x1d   :  { %2685 = vmatprep.mubr.f32.mxu1 %v251_v59  ;;  %3076 = vmatprep.subr.bf16.mxu1 %v3359_v21 }
  0x1e   :  { %3351 = vset.pattern.permute.xlu1 %v3356_v4  ;;  %v1755_v4 = vld [vmem:[%s4155_s0 + $0x8] sm:$0xff] }
  0x1f   :  { %2720 = vmatmul.mubr.f32.gmra.mrb[8].mxu0 %v3522_v57  ;;  %1767 = vperm.xlu1 %3351, %v1759_v62   ;;  %v1858_v23 = vand.u32 4294901760, %v1755_v4 }
  0x20   :  { %2686 = vmatmul.mubr.f32.gmra.mrb[8].mxu1 %v261_v61  ;;  %2722 = vmatprep.mubr.f32.mxu0 %v3551_v15 }
  0x21   :  { %2690 = vmatprep.mubr.f32.mxu1 %v3417_v12  ;;  %3354 = vset.pattern.permute.xlu0 %v3357_v60 }
  0x22   :  { %1830 = vperm.xlu0 %3354, %v1759_v62  }
  0x23   :  { %2723 = vmatmul.mubr.f32.gmra.mrb[10].mxu0 %v3559_v19  ;;  %3352 = vset.pattern.permute.xlu1 %v3357_v60 }
  0x24   :  { %2691 = vmatmul.mubr.f32.vlgmr.msra.gmra.mrb[10].mxu1 %v3428_v17  ;;  %2725 = vmatprep.mubr.f32.mxu0 %v3567_v38 }
  0x25   :  { %1827 = vperm.xlu1 %3352, %v3495_v43   ;;  %2693 = vmatprep.mubr.f32.mxu1 %v3419_v13 }
  0x27   :  { %2726 = vmatmul.mubr.f32.gmra.mrb[12].mxu0 %v3570_v39 }
  0x28   :  { %2730 = vmatprep.mubr.f32.mxu0 %v149_v31  ;;  %2694 = vmatmul.mubr.f32.gmra.mrb[0].mxu1 %v3449_v25  ;;  %v3651_v31 = vsub.f32 %v1755_v4, %v1858_v23 }
  0x29   :  { %3353 = vset.pattern.permute.xlu1 %v3355_v3  ;;  %2696 = vmatprep.mubr.f32.mxu1 %v3459_v28  ;;  %v1754_v3 = vld [vmem:[%s4155_s0] sm:$0xff] }
  0x2a   :  { %1809 = vperm.xlu1 %3353, %v1759_v62   ;;  %v1855_v22 = vand.u32 4294901760, %v1754_v3  ;;  %v1962_v33 = vand.u32 4294901760, %v3651_v31 }
  0x2b   :  { %2731 = vmatmul.mubr.f32.vlgmr.msra.gmra.mrb[2].mxu0 %v159_v35  ;;  %v3361_v35 = vmov 0.0  }
  0x2c   :  { %2749 = vmatpush3.msra.mxu0 %v3562_v20  ;;  %2733 = vmatprep.mubr.f32.mxu0 %v169_v32  ;;  %v3649_v27 = vsub.f32 %v1754_v3, %v1855_v22  ;;  %v1963_v37 = vsub.f32 %v3651_v31, %v1962_v33 }
  0x2d   :  { %2768 = vmatprep.subr.mxu0 %v3415_v11  ;;  %2697 = vmatmul.mubr.f32.gmra.mrb[2].mxu1 %v3461_v29 }
  0x2e   :  { %2699 = vmatprep.mubr.f32.mxu1 %v3470_v34  ;;  %v1955_v32 = vand.u32 4294901760, %v3649_v27  ;;  %v1964_v42 = vand.u32 4294901760, %v1963_v37 }
  0x2f   :  { %2734 = vmatmul.mubr.f32.gmra.mrb[4].mxu0 %v179_v41 }
  0x30   :  { %2736 = vmatprep.mubr.f32.mxu0 %v189_v45  ;;  %v1956_v36 = vsub.f32 %v3649_v27, %v1955_v32  ;;  %v3191_v45 = vpack.c.bf16 %v3651_v31, %v3649_v27 }
  0x31   :  { %2700 = vmatmul.mubr.f32.gmra.mrb[4].mxu1 %v3502_v47 }
  0x32   :  { %2702 = vmatprep.mubr.f32.mxu1 %v3538_v6  ;;  %v1957_v41 = vand.u32 4294901760, %v1956_v36 }
  0x33   :  { %2737 = vmatmul.mubr.f32.gmra.mrb[6].mxu0 %v199_v46  ;;  %v1756_v46 = vld [vmem:[%s4155_s0 + $0x10] sm:$0xff] }
  0x34   :  { %2739 = vmatprep.mubr.f32.mxu0 %v209_v53  ;;  %v3668_v43 = vpack.c.bf16 %v1964_v42, %v1957_v41  ;;  %v3695_v53 = vand.u32 4294901760, %v1756_v46 }
  0x35   :  { %2703 = vmatmul.mubr.f32.gmra.mrb[6].mxu1 %v3542_v8 }
  0x36   :  { %2705 = vmatprep.mubr.f32.mxu1 %v3553_v16  ;;  %v3734_v20 = vsub.f32 %v1756_v46, %v3695_v53 }
  0x37   :  { %2740 = vmatmul.mubr.f32.gmra.mrb[8].mxu0 %v219_v5 }
  0x38   :  { %2742 = vmatprep.mubr.f32.mxu0 %v229_v30 }
  0x39   :  { %2706 = vmatmul.mubr.f32.gmra.mrb[8].mxu1 %v3555_v18 }
  0x3a   :  { %2812 = vmatprep.mubr.msk.f32.mxu1 %vm3360_vm2, %v3361_v35 }
  0x3b   :  { %2743 = vmatmul.mubr.f32.gmra.mrb[10].mxu0 %v239_v44 }
  0x3c   :  { %2745 = vmatprep.mubr.f32.mxu0 %v249_v50  ;;  %v1969_v50 = vand.u32 4294901760, %v3734_v20 }
  0x3e   :  { %v1970_v61 = vsub.f32 %v3734_v20, %v1969_v50 }
  0x3f   :  { %2746 = vmatmul.mubr.f32.gmra.mrb[12].mxu0 %v259_v51 }
  0x40   :  { %2750 = vmatprep.mubr.f32.mxu0 %v3417_v12 }
  0x43   :  { %2751 = vmatmul.mubr.f32.vlgmr.msra.gmra.mrb[2].mxu0 %v3428_v17 }
  0x44   :  { %2769 = vmatpush3.msra.mxu0 %v3415_v11  ;;  %2753 = vmatprep.mubr.f32.mxu0 %v3419_v13  ;;  %v3687_v11 = vpack.c.bf16 %v1858_v23, %v1855_v22 }
  0x45   :  { %3184 = vmatprep.subr.bf16.mxu0 %v3359_v21 }
  0x47   :  { %2754 = vmatmul.mubr.f32.gmra.mrb[4].mxu0 %v3449_v25 }
  0x48   :  { %2756 = vmatprep.mubr.f32.mxu0 %v3459_v28 }
  0x4b   :  { %2757 = vmatmul.mubr.f32.gmra.mrb[6].mxu0 %v3461_v29 }
  0x4c   :  { %2759 = vmatprep.mubr.f32.mxu0 %v3470_v34 }
  0x4f   :  { %2760 = vmatmul.mubr.f32.gmra.mrb[8].mxu0 %v3502_v47 }
  0x50   :  { %2762 = vmatprep.mubr.f32.mxu0 %v3538_v6 }
  0x53   :  { %2763 = vmatmul.mubr.f32.gmra.mrb[10].mxu0 %v3542_v8 }
  0x54   :  { %2765 = vmatprep.mubr.f32.mxu0 %v3553_v16 }
  0x57   :  { %2766 = vmatmul.mubr.f32.gmra.mrb[12].mxu0 %v3555_v18 }
  0x58   :  { %2770 = vmatprep.mubr.f32.mxu0 %v3417_v12  ;;  %v3704_v12 = vpack.c.bf16 %v1962_v33, %v1955_v32  ;;  %v1971_v32 = vand.u32 4294901760, %v1970_v61 }
  0x5b   :  { %2771 = vmatmul.mubr.f32.vlgmr.msra.gmra.mrb[2].mxu0 %v3428_v17 }
  0x5c   :  { %2773 = vmatprep.mubr.f32.mxu0 %v3419_v13  ;;  %3186 = vmatpush3.bf16.msra.mxu0 %v3687_v11 }
  0x5d   :  { %2990 = vmatprep.subr.mxu0 %v3361_v35 }
  0x5f   :  { %2774 = vmatmul.mubr.f32.gmra.mrb[4].mxu0 %v3449_v25 }
  0x60   :  { %2776 = vmatprep.mubr.f32.mxu0 %v3459_v28  ;;  %2991 = vmatpush3.msra.mxu0 %v3695_v53  ;;  %v1036_v28 = vlaneseq }
  0x61   :  { %3187 = vmatprep.subr.bf16.mxu0 %v3359_v21 }
  0x63   :  { %2777 = vmatmul.mubr.f32.gmra.mrb[6].mxu0 %v3461_v29  ;;  %v3714_v29 = vand.u32 127, %v1036_v28 }
  0x64   :  { %2779 = vmatprep.mubr.f32.mxu0 %v3470_v34 }
  0x67   :  { %2780 = vmatmul.mubr.f32.gmra.mrb[8].mxu0 %v3502_v47 }
  0x68   :  { %2782 = vmatprep.mubr.f32.mxu0 %v3538_v6 }
  0x6b   :  { %2783 = vmatmul.mubr.f32.gmra.mrb[10].mxu0 %v3542_v8 }
  0x6c   :  { %2785 = vmatprep.mubr.f32.mxu0 %v3553_v16 }
  0x6f   :  { %2786 = vmatmul.mubr.f32.gmra.mrb[12].mxu0 %v3555_v18 }
  0x70   :  { %2992 = vmatprep.mubr.msk.f32.mxu0 %vm3360_vm2, %v3361_v35 }
  0x86   :  { %v1804_v13 = vpop.permute.xlu1 %1803 }
  0x87   :  { %v1762_v25 = vpop.permute.xlu0 %1761  ;;  %vm1811_vm4 = vcmp.eq.s32.totalorder %v1804_v13, %v3714_v29 }
  0x88   :  { %vm1769_vm3 = vcmp.eq.s32.totalorder %v1762_v25, %v3714_v29  ;;  %v2458_v0 = vsel %vm1811_vm4, 1.0, %v3361_v35 }
  0x89   :  { %v2452_v60 = vsel %vm1769_vm3, 1.0, %v3361_v35 }
  0x8b   :  { %v1765_v17 = vpop.permute.xlu1 %1764 }
  0x8c   :  { %v1825_v47 = vpop.permute.xlu0 %1824  ;;  %vm1770_vm5 = vcmp.eq.s32.totalorder %v1765_v17, %v3714_v29 }
  0x8d   :  { %vm1832_vm7 = vcmp.eq.s32.totalorder %v1825_v47, %v3714_v29  ;;  %v2453_v1 = vsel %vm1770_vm5, 1.0, %v3361_v35 }
  0x8e   :  { %v2461_v7 = vsel %vm1832_vm7, 1.0, %v3361_v35 }
  0x92   :  { %v1786_v34 = vpop.permute.xlu1 %1785 }
  0x93   :  { %vm1791_vm6 = vcmp.eq.s32.totalorder %v1786_v34, %v3714_v29 }
  0x94   :  { %v2456_v2 = vsel %vm1791_vm6, 1.0, %v3361_v35 }
  0x95   :  { %v1783_v63 = vpop.permute.xlu0 %1782  ;;  %v1800_v9 = vadd.f32 %v2456_v2, %v2453_v1 }
  0x96   :  { %vm1790_vm8 = vcmp.eq.s32.totalorder %v1783_v63, %v3714_v29 }
  0x97   :  { %v2455_v5 = vsel %vm1790_vm8, 1.0, %v3361_v35 }
  0x98   :  { %v1799_v6 = vadd.f32 %v2455_v5, %v2452_v60 }
  0x99   :  { %v1807_v57 = vpop.permute.xlu1 %1806 }
  0x9a   :  { %vm1812_vm9 = vcmp.eq.s32.totalorder %v1807_v57, %v3714_v29  ;;  %v1820_v10 = vadd.f32 %v2458_v0, %v1799_v6  ;;  %v1789_v15 = vpop.permute.xlu0 %1788  ;;  %v1037_v6 = vshrl.u32 %v1036_v28, 7 }
  0x9b   :  { %v2459_v14 = vsel %vm1812_vm9, 1.0, %v3361_v35  ;;  %vm1792_vm12 = vcmp.eq.s32.totalorder %v1789_v15, %v3714_v29  ;;  %vm1066_vm9 = vcmask 785408  }
  0x9c   :  { %v1841_v16 = vadd.f32 %v2461_v7, %v1820_v10  ;;  %v1821_v18 = vadd.f32 %v2459_v14, %v1800_v9  ;;  %v2457_v39 = vsel %vm1792_vm12, 1.0, %v3361_v35  ;;  %v1048_v10 = vadd.s32 1, %v1037_v6 }
  0x9d   :  { %v1039_v15 = vadd.s32 16, %v1037_v6 }
  0x9e   :  { %v1768_v8 = vpop.permute.xlu1 %1767  ;;  %v1846_v19 = vsel %vm1844_vm10, %v1841_v16, 0  ;;  %v1042_v16 = vmul.u32 4, %v1037_v6 }
  0x9f   :  { %vm1771_vm11 = vcmp.eq.s32.totalorder %v1768_v8, %v3714_v29  ;;  %v3736_v30 = vand.u32 4294901760, %v1846_v19  ;;  %v1038_v8 = vadd.s32 8, %v1037_v6  ;;  %v1044_v28 = vmul.u32 4, %v1039_v15 }
  0xa0   :  { %v2454_v38 = vsel %vm1771_vm11, 1.0, %v3361_v35  ;;  %vm1045_vm0 = vcmp.ge.s32.totalorder %v3714_v29, %v1042_v16 }
  0xa1   :  { %v1831_v40 = vpop.permute.xlu0 %1830  ;;  %v1923_v48 = vsub.f32 %v1846_v19, %v3736_v30  ;;  %v1801_v51 = vadd.f32 %v2457_v39, %v2454_v38  ;;  %v1049_v14 = vadd.s32 1, %v1038_v8  ;;  %v1043_v19 = vmul.u32 4, %v1038_v8 }
  0xa2   :  { %vm1834_vm14 = vcmp.eq.s32.totalorder %v1831_v40, %v3714_v29  ;;  %vm1047_vm7 = vcmp.ge.s32.totalorder %v3714_v29, %v1044_v28 }
  0xa3   :  { %v1924_v52 = vand.u32 4294901760, %v1923_v48  ;;  %v2463_v59 = vsel %vm1834_vm14, 1.0, %v3361_v35  ;;  %vm1046_vm3 = vcmp.ge.s32.totalorder %v3714_v29, %v1043_v19 }
  0xa4   :  { %v1828_v26 = vpop.permute.xlu1 %1827 }
  0xa5   :  { %vm1833_vm13 = vcmp.eq.s32.totalorder %v1828_v26, %v3714_v29  ;;  %v1925_v56 = vsub.f32 %v1923_v48, %v1924_v52  ;;  %v1050_v26 = vadd.s32 1, %v1039_v15 }
  0xa6   :  { %v2462_v44 = vsel %vm1833_vm13, 1.0, %v3361_v35 }
  0xa7   :  { %v1842_v49 = vadd.f32 %v2462_v44, %v1821_v18  ;;  %v1926_v4 = vand.u32 4294901760, %v1925_v56  ;;  %v1051_v18 = vmul.u32 4, %v1048_v10 }
  0xa9   :  { %v1849_v54 = vsel %vm1844_vm10, %v1842_v49, 0  ;;  %v1810_v24 = vpop.permute.xlu1 %1809  ;;  %2993 = vmatmul.mubr.f32.vlgmr.msra.gmra.mrb[14].mxu0 %v1926_v4  ;;  %vm1054_vm1 = vcmp.lt.s32.totalorder %v3714_v29, %v1051_v18 }
  0xaa   :  { %v3746_v55 = vand.u32 4294901760, %v1849_v54  ;;  %vm1813_vm15 = vcmp.eq.s32.totalorder %v1810_v24, %v3714_v29  ;;  %2995 = vmatprep.mubr.msk.f32.mxu0 %vm3360_vm2, %v3361_v35  ;;  %3189 = vmatpush3.bf16.msra.mxu0 %v3668_v43  ;;  %v3813_v43 = vld [vmem:[%s4156_s4] ss:$0 sm:$0xff]  ;;  %vm1057_vm5 = vmand %vm1045_vm0, %vm1054_vm1  ;;  %s3362_s4 = smov 8  }
  0xab   :  { %v2460_v58 = vsel %vm1813_vm15, 1.0, %v3361_v35  ;;  %3005 = vmatprep.subr.mxu0 %v3361_v35  ;;  %v3832_v38 = vsel %vm1057_vm5, 1.0, %v3361_v35 }
  0xac   :  { %v1933_v62 = vsub.f32 %v1849_v54, %v3746_v55  ;;  %v1822_v3 = vadd.f32 %v2460_v58, %v1801_v51  ;;  %v1068_v40 = vsel %vm1066_vm9, %v3832_v38, 0 }
  0xad   :  { %v3844_v49 = vsub.f32 %v1068_v40, %v1068_v40 }
  0xae   :  { %v1843_v22 = vadd.f32 %v2463_v59, %v1822_v3  ;;  %v1934_v23 = vand.u32 4294901760, %v1933_v62  ;;  %3006 = vmatpush3.msra.mxu0 %v1971_v32 }
  0xaf   :  { %3190 = vmatprep.subr.bf16.mxu0 %v3359_v21  ;;  %v1155_v51 = vand.u32 4294901760, %v3844_v49 }
  0xb0   :  { %v1852_v33 = vsel %vm1844_vm10, %v1843_v22, 0  ;;  %v1935_v36 = vsub.f32 %v1933_v62, %v1934_v23 }
  0xb1   :  { %v1942_v37 = vand.u32 4294901760, %v1852_v33  ;;  %v3857_v24 = vsub.f32 %v3844_v49, %v1155_v51 }
  0xb2   :  { %v1936_v41 = vand.u32 4294901760, %v1935_v36 }
  0xb3   :  { %v1943_v42 = vsub.f32 %v1852_v33, %v1942_v37 }
  0xb4   :  { %2996 = vmatmul.mubr.f32.gmra.mrb[16].mxu0 %v1936_v41 }
  0xb5   :  { %2998 = vmatprep.mubr.msk.f32.mxu0 %vm3360_vm2, %v3361_v35  ;;  %v1944_v46 = vand.u32 4294901760, %v1943_v42 }
  0xb7   :  { %v1945_v13 = vsub.f32 %v1943_v42, %v1944_v46 }
  0xb9   :  { %v1946_v17 = vand.u32 4294901760, %v1945_v13 }
  0xbb   :  { %2999 = vmatmul.mubr.f32.gmra.mrb[18].mxu0 %v1946_v17 }
  0xbc   :  { %3007 = vmatprep.mubr.msk.f32.mxu0 %vm3360_vm2, %v3361_v35 }
  0xbf   :  { %3008 = vmatmul.mubr.f32.vlgmr.msra.gmra.mrb[14].mxu0 %v3736_v30 }
  0xc0   :  { %3010 = vmatprep.mubr.msk.f32.mxu0 %vm3360_vm2, %v3361_v35  ;;  %3192 = vmatpush3.bf16.msra.mxu0 %v3191_v45 }
  0xc1   :  { %3020 = vmatprep.subr.mxu0 %v3361_v35 }
  0xc3   :  { %3011 = vmatmul.mubr.f32.gmra.mrb[16].mxu0 %v3746_v55 }
  0xc4   :  { %3013 = vmatprep.mubr.msk.f32.mxu0 %vm3360_vm2, %v3361_v35  ;;  %3021 = vmatpush3.msra.mxu0 %v3734_v20  ;;  %v1052_v20 = vmul.u32 4, %v1049_v14 }
  0xc5   :  { %3193 = vmatprep.subr.bf16.mxu0 %v3359_v21 }
  0xc6   :  { %vm1055_vm4 = vcmp.lt.s32.totalorder %v3714_v29, %v1052_v20 }
  0xc7   :  { %3014 = vmatmul.mubr.f32.gmra.mrb[18].mxu0 %v1942_v37  ;;  %vm1058_vm6 = vmand %vm1046_vm3, %vm1055_vm4 }
  0xc8   :  { %3022 = vmatprep.mubr.msk.f32.mxu0 %vm3360_vm2, %v3361_v35  ;;  %v3835_v39 = vsel %vm1058_vm6, 1.0, %v3361_v35 }
  0xc9   :  { %v1071_v44 = vsel %vm1066_vm9, %v3835_v39, 0 }
  0xcb   :  { %3023 = vmatmul.mubr.f32.vlgmr.msra.gmra.mrb[14].mxu0 %v1923_v48 }
  0xcc   :  { %3025 = vmatprep.mubr.msk.f32.mxu0 %vm3360_vm2, %v3361_v35  ;;  %3195 = vmatpush3.bf16.msra.mxu0 %v3687_v11 }
  0xcd   :  { %3035 = vmatprep.subr.mxu0 %v3361_v35 }
  0xcf   :  { %3026 = vmatmul.mubr.f32.gmra.mrb[16].mxu0 %v1933_v62  ;;  %v1157_v62 = vand.u32 4294901760, %v3857_v24 }
  0xd0   :  { %3028 = vmatprep.mubr.msk.f32.mxu0 %vm3360_vm2, %v3361_v35  ;;  %3036 = vmatpush3.msra.mxu0 %v3695_v53 }
  0xd1   :  { %3196 = vmatprep.subr.bf16.mxu0 %v3359_v21 }
  0xd3   :  { %3029 = vmatmul.mubr.f32.gmra.mrb[18].mxu0 %v1943_v42 }
  0xd4   :  { %3037 = vmatprep.mubr.msk.f32.mxu0 %vm3360_vm2, %v3361_v35 }
  0xd7   :  { %3038 = vmatmul.mubr.f32.vlgmr.msra.gmra.mrb[14].mxu0 %v1924_v52 }
  0xd8   :  { %3040 = vmatprep.mubr.msk.f32.mxu0 %vm3360_vm2, %v3361_v35  ;;  %3198 = vmatpush3.bf16.msra.mxu0 %v3704_v12 }
  0xd9   :  { %3050 = vmatprep.subr.mxu0 %v3361_v35 }
  0xdb   :  { %3041 = vmatmul.mubr.f32.gmra.mrb[16].mxu0 %v1934_v23 }
  0xdc   :  { %3043 = vmatprep.mubr.msk.f32.mxu0 %vm3360_vm2, %v3361_v35  ;;  %3051 = vmatpush3.msra.mxu0 %v1969_v50 }
  0xdd   :  { %3199 = vmatprep.subr.bf16.mxu0 %v3359_v21 }
  0xdf   :  { %3044 = vmatmul.mubr.f32.gmra.mrb[18].mxu0 %v1944_v46 }
  0xe0   :  { %3052 = vmatprep.mubr.msk.f32.mxu0 %vm3360_vm2, %v3361_v35 }
  0xe2   :  { %v2672_v27 = vpop.f32.mrb[0].mxu0 }
  0xe3   :  { %v153_v31 = vpop.f32.mrb[1].mxu0  ;;  %3053 = vmatmul.mubr.f32.vlgmr.msra.gmra.mrb[14].mxu0 %v3736_v30  ;;  %v164_v45 = vadd.f32 %v2672_v27, %v3813_v43 }
  0xe4   :  { %3055 = vmatprep.mubr.msk.f32.mxu0 %vm3360_vm2, %v3361_v35  ;;  %3201 = vmatpush3.bf16.msra.mxu0 %v3687_v11  ;;  %v154_v11 = vadd.f32 %v3813_v43, %v153_v31 }
  0xe5   :  { %3065 = vmatprep.subr.mxu0 %v3361_v35 }
  0xe7   :  { %3056 = vmatmul.mubr.f32.gmra.mrb[16].mxu0 %v3746_v55 }
  0xe8   :  { %3058 = vmatprep.mubr.msk.f32.mxu0 %vm3360_vm2, %v3361_v35  ;;  %3066 = vmatpush3.msra.mxu0 %v3695_v53 }
  0xeb   :  { %3059 = vmatmul.mubr.f32.gmra.mrb[18].mxu0 %v1942_v37 }
  0xec   :  { %3067 = vmatprep.mubr.msk.f32.mxu0 %vm3360_vm2, %v3361_v35 }
  0xef   :  { %3068 = vmatmul.mubr.f32.vlgmr.msra.gmra.mrb[14].mxu0 %v3736_v30  ;;  %v1053_v30 = vmul.u32 4, %v1050_v26 }
  0xf0   :  { %3070 = vmatprep.mubr.msk.f32.mxu0 %vm3360_vm2, %v3361_v35 }
  0xf1   :  { %vm1056_vm8 = vcmp.lt.s32.totalorder %v3714_v29, %v1053_v30  ;;  %v3846_v29 = vsub.f32 %v1071_v44, %v1071_v44 }
  0xf2   :  { %vm1059_vm10 = vmand %vm1047_vm7, %vm1056_vm8  ;;  %vm2415_vm8 = vcmask 64512  }
  0xf3   :  { %3071 = vmatmul.mubr.f32.gmra.mrb[16].mxu0 %v3746_v55  ;;  %v3842_v48 = vsel %vm1059_vm10, 1.0, %v3361_v35  ;;  %v1165_v52 = vand.u32 4294901760, %v3846_v29  ;;  %vm2431_vm10 = vcmask 130112  }
  0xf4   :  { %3073 = vmatprep.mubr.msk.f32.mxu0 %vm3360_vm2, %v3361_v35  ;;  %v1074_v50 = vsel %vm1066_vm9, %v3842_v48, 0 }
  0xf5   :  { %v3852_v54 = vsub.f32 %v1074_v50, %v1074_v50  ;;  %v3862_v55 = vsub.f32 %v3846_v29, %v1165_v52 }
  0xf7   :  { %v2692_v53 = vpop.f32.mrb[10].mxu1  ;;  %3074 = vmatmul.mubr.f32.gmra.mrb[18].mxu0 %v1942_v37  ;;  %v1175_v56 = vand.u32 4294901760, %v3852_v54  ;;  %v1167_v22 = vand.u32 4294901760, %v3862_v55 }
  0xf8   :  { %v346_v12 = vadd.f32 %v2692_v53, %v164_v45  ;;  %v339_v25 = vpop.f32.mrb[11].mxu1 }
  0xf9   :  { %v340_v34 = vadd.f32 %v339_v25, %v154_v11  ;;  %v3871_v23 = vsub.f32 %v3852_v54, %v1175_v56 }
  0xfb   :  { %v2695_v47 = vpop.f32.mrb[0].mxu1 }
  0xfc   :  { %v351_v57 = vpop.f32.mrb[1].mxu1  ;;  %v3210_v3 = vadd.f32 %v2695_v47, %v3813_v43 }
  0xfd   :  { %v3212_v32 = vadd.f32 %v3813_v43, %v351_v57 }
 0x100   :  { %v2698_v60 = vpop.f32.mrb[2].mxu1 }
 0x101   :  { %v363_v63 = vpop.f32.mrb[3].mxu1  ;;  %v3214_v33 = vadd.f32 %v2698_v60, %v3813_v43 }
 0x102   :  { %v3216_v37 = vadd.f32 %v3813_v43, %v363_v63 }
 0x104   :  { %v2701_v0 = vpop.f32.mrb[4].mxu1 }
 0x105   :  { %v375_v1 = vpop.f32.mrb[5].mxu1  ;;  %v3218_v41 = vadd.f32 %v2701_v0, %v3813_v43 }
 0x106   :  { %v3220_v13 = vadd.f32 %v3813_v43, %v375_v1 }
 0x108   :  { %v2704_v2 = vpop.f32.mrb[6].mxu1 }
 0x109   :  { %v387_v5 = vpop.f32.mrb[7].mxu1  ;;  %v3222_v17 = vadd.f32 %v2704_v2, %v3813_v43 }
 0x10a   :  { %v3224_v11 = vadd.f32 %v3813_v43, %v387_v5 }
 0x10c   :  { %v3821_v7 = vpop.f32.mrb[8].mxu1 }
 0x10d   :  { %v3823_v9 = vpop.f32.mrb[9].mxu1 }
 0x10e   :  { %v3886_v60 = vadd.f32 %v3813_v43, %v3823_v9 }
 0x12e   :  { %v2772_v58 = vpop.f32.mrb[2].mxu0 }
 0x12f   :  { %v3206_v59 = vadd.f32 %v2772_v58, %v346_v12  ;;  %v930_v61 = vpop.f32.mrb[3].mxu0 }
 0x130   :  { %v3209_v4 = vadd.f32 %v930_v61, %v340_v34  ;;  %v3882_v34 = vadd.f32 %v3821_v7, %v3813_v43 }
 0x131   :  { %vm1001_vm11 = vcmp.gt.f32.partialorder %v3206_v59, 0.0  ;;  %v1013_v36 = vmul.f32 0.2, %v3206_v59 }
 0x132   :  { %vm1000_vm12 = vcmp.gt.f32.partialorder %v3209_v4, 0.0  ;;  %v1012_v42 = vmul.f32 0.2, %v3209_v4  ;;  %v2775_v46 = vpop.f32.mrb[4].mxu0 }
 0x133   :  { %v1025_v27 = vsel %vm1001_vm11, %v3206_v59, %v1013_v36  ;;  %v3211_v31 = vadd.f32 %v3210_v3, %v2775_v46  ;;  %v942_v45 = vpop.f32.mrb[5].mxu0 }
 0x134   :  { %v1080_v53 = vand.u32 4294901760, %v1025_v27  ;;  %v1024_v12 = vsel %vm1000_vm12, %v3209_v4, %v1012_v42  ;;  %v3213_v25 = vadd.f32 %v3212_v32, %v942_v45 }
 0x135   :  { %v1077_v47 = vand.u32 4294901760, %v1024_v12  ;;  %vm1003_vm13 = vcmp.gt.f32.partialorder %v3211_v31, 0.0  ;;  %v1015_v57 = vmul.f32 0.2, %v3211_v31 }
 0x136   :  { %v3888_v63 = vsub.f32 %v1025_v27, %v1080_v53  ;;  %vm1002_vm14 = vcmp.gt.f32.partialorder %v3213_v25, 0.0  ;;  %v1014_v0 = vmul.f32 0.2, %v3213_v25  ;;  %v2778_v1 = vpop.f32.mrb[6].mxu0 }
 0x137   :  { %v3890_v2 = vsub.f32 %v1024_v12, %v1077_v47  ;;  %v1027_v5 = vsel %vm1003_vm13, %v3211_v31, %v1015_v57  ;;  %v3215_v6 = vadd.f32 %v3214_v33, %v2778_v1  ;;  %v954_v8 = vpop.f32.mrb[7].mxu0  ;;  %v3892_v10 = vpack.c.bf16 %v1080_v53, %v1077_v47 }
 0x138   :  { %v1193_v7 = vand.u32 4294901760, %v3888_v63  ;;  %v1086_v14 = vand.u32 4294901760, %v1027_v5  ;;  %v1026_v15 = vsel %vm1002_vm14, %v3213_v25, %v1014_v0  ;;  %v3217_v16 = vadd.f32 %v3216_v37, %v954_v8 }
 0x139   :  { %v1186_v43 = vand.u32 4294901760, %v3890_v2  ;;  %v1083_v9 = vand.u32 4294901760, %v1026_v15  ;;  %vm1005_vm15 = vcmp.gt.f32.partialorder %v3215_v6, 0.0  ;;  %v1017_v18 = vmul.f32 0.2, %v3215_v6  ;;  %3078 = vmatpush3.bf16.msra.mxu1 %v3892_v10 }
 0x13a   :  { %v3897_v19 = vsub.f32 %v1027_v5, %v1086_v14  ;;  %vm1004_vm0 = vcmp.gt.f32.partialorder %v3217_v16, 0.0  ;;  %v1016_v20 = vmul.f32 0.2, %v3217_v16  ;;  %v2781_v26 = vpop.f32.mrb[8].mxu0  ;;  %3079 = vmatprep.subr.bf16.mxu1 %v3359_v21  ;;  %v3903_v28 = vsub.f32 %v3888_v63, %v1193_v7 }
 0x13b   :  { %v3905_v30 = vsub.f32 %v1026_v15, %v1083_v9  ;;  %v1029_v40 = vsel %vm1005_vm15, %v3215_v6, %v1017_v18  ;;  %v3219_v44 = vadd.f32 %v3218_v41, %v2781_v26  ;;  %v966_v50 = vpop.f32.mrb[9].mxu0  ;;  %v3907_v58 = vpack.c.bf16 %v1086_v14, %v1083_v9 }
 0x13c   :  { %v1207_v59 = vand.u32 4294901760, %v3897_v19  ;;  %v1092_v61 = vand.u32 4294901760, %v1029_v40  ;;  %v1028_v3 = vsel %vm1004_vm0, %v3217_v16, %v1016_v20  ;;  %v3221_v4 = vadd.f32 %v3220_v13, %v966_v50 }
 0x13d   :  { %v1200_v32 = vand.u32 4294901760, %v3905_v30  ;;  %v1089_v33 = vand.u32 4294901760, %v1028_v3  ;;  %vm1007_vm1 = vcmp.gt.f32.partialorder %v3219_v44, 0.0  ;;  %v1019_v36 = vmul.f32 0.2, %v3219_v44  ;;  %3081 = vmatpush3.bf16.msra.mxu1 %v3907_v58 }
 0x13e   :  { %v3912_v37 = vsub.f32 %v1029_v40, %v1092_v61  ;;  %vm1006_vm3 = vcmp.gt.f32.partialorder %v3221_v4, 0.0  ;;  %v1018_v42 = vmul.f32 0.2, %v3221_v4  ;;  %v2784_v41 = vpop.f32.mrb[10].mxu0  ;;  %3082 = vmatprep.subr.bf16.mxu1 %v3359_v21  ;;  %v1187_v46 = vsub.f32 %v3890_v2, %v1186_v43 }
 0x13f   :  { %v3918_v27 = vsub.f32 %v1028_v3, %v1089_v33  ;;  %v1031_v13 = vsel %vm1007_vm1, %v3219_v44, %v1019_v36  ;;  %v3223_v31 = vadd.f32 %v3222_v17, %v2784_v41  ;;  %v978_v45 = vpop.f32.mrb[11].mxu0  ;;  %v3920_v53 = vpack.c.bf16 %v1092_v61, %v1089_v33 }
 0x140   :  { %v1221_v12 = vand.u32 4294901760, %v3912_v37  ;;  %v1098_v25 = vand.u32 4294901760, %v1031_v13  ;;  %v1030_v47 = vsel %vm1006_vm3, %v3221_v4, %v1018_v42  ;;  %v3225_v57 = vadd.f32 %v3224_v11, %v978_v45 }
 0x141   :  { %v1214_v0 = vand.u32 4294901760, %v3918_v27  ;;  %v1095_v1 = vand.u32 4294901760, %v1030_v47  ;;  %vm1009_vm4 = vcmp.gt.f32.partialorder %v3223_v31, 0.0  ;;  %v1021_v5 = vmul.f32 0.2, %v3223_v31  ;;  %3084 = vmatpush3.bf16.msra.mxu1 %v3920_v53 }
 0x142   :  { %v3925_v6 = vsub.f32 %v1031_v13, %v1098_v25  ;;  %vm1008_vm5 = vcmp.gt.f32.partialorder %v3225_v57, 0.0  ;;  %v1020_v8 = vmul.f32 0.2, %v3225_v57  ;;  %v2787_v17 = vpop.f32.mrb[12].mxu0  ;;  %3085 = vmatprep.subr.bf16.mxu1 %v3359_v21  ;;  %v1188_v14 = vand.u32 4294901760, %v1187_v46 }
 0x143   :  { %v3928_v15 = vsub.f32 %v1030_v47, %v1095_v1  ;;  %v1033_v16 = vsel %vm1009_vm4, %v3223_v31, %v1021_v5  ;;  %v3227_v11 = vadd.f32 %v3882_v34, %v2787_v17  ;;  %v990_v9 = vpop.f32.mrb[13].mxu0  ;;  %v3931_v18 = vpack.c.bf16 %v1098_v25, %v1095_v1 }
 0x144   :  { %v1235_v20 = vand.u32 4294901760, %v3925_v6  ;;  %v1104_v26 = vand.u32 4294901760, %v1033_v16  ;;  %v1032_v40 = vsel %vm1008_vm5, %v3225_v57, %v1020_v8  ;;  %v3229_v44 = vadd.f32 %v3886_v60, %v990_v9 }
 0x145   :  { %v1228_v50 = vand.u32 4294901760, %v3928_v15  ;;  %v1101_v61 = vand.u32 4294901760, %v1032_v40  ;;  %vm1011_vm6 = vcmp.gt.f32.partialorder %v3227_v11, 0.0  ;;  %v1023_v3 = vmul.f32 0.2, %v3227_v11  ;;  %3087 = vmatpush3.bf16.msra.mxu1 %v3931_v18 }
 0x146   :  { %v3937_v4 = vsub.f32 %v1033_v16, %v1104_v26  ;;  %vm1010_vm7 = vcmp.gt.f32.partialorder %v3229_v44, 0.0  ;;  %v1022_v34 = vmul.f32 0.2, %v3229_v44  ;;  %3088 = vmatprep.subr.bf16.mxu1 %v3359_v21  ;;  %v1195_v33 = vand.u32 4294901760, %v3903_v28 }
 0x147   :  { %v3941_v36 = vsub.f32 %v1032_v40, %v1101_v61  ;;  %v1035_v42 = vsel %vm1011_vm6, %v3227_v11, %v1023_v3  ;;  %v3943_v41 = vpack.c.bf16 %v1104_v26, %v1101_v61  ;;  %v1201_v60 = vsub.f32 %v3905_v30, %v1200_v32 }
 0x148   :  { %v1249_v46 = vand.u32 4294901760, %v3937_v4  ;;  %v1110_v13 = vand.u32 4294901760, %v1035_v42  ;;  %v1034_v31 = vsel %vm1010_vm7, %v3229_v44, %v1022_v34  ;;  %v3095_v45 = vpack.c.bf16 %v1195_v33, %v1188_v14 }
 0x149   :  { %v1242_v25 = vand.u32 4294901760, %v3941_v36  ;;  %v1107_v47 = vand.u32 4294901760, %v1034_v31  ;;  %3090 = vmatpush3.bf16.msra.mxu1 %v3943_v41  ;;  %v1202_v28 = vand.u32 4294901760, %v1201_v60  ;;  %v1208_v57 = vsub.f32 %v3897_v19, %v1207_v59 }
 0x14a   :  { %v3954_v1 = vsub.f32 %v1035_v42, %v1110_v13  ;;  %3091 = vmatprep.subr.bf16.mxu1 %v3359_v21  ;;  %v1215_v5 = vsub.f32 %v3918_v27, %v1214_v0  ;;  %v1222_v8 = vsub.f32 %v3912_v37, %v1221_v12  ;;  %v1229_v17 = vsub.f32 %v3928_v15, %v1228_v50 }
 0x14b   :  { %v3966_v14 = vsub.f32 %v1034_v31, %v1107_v47  ;;  %v3968_v16 = vpack.c.bf16 %v1110_v13, %v1107_v47  ;;  %v1209_v11 = vand.u32 4294901760, %v1208_v57  ;;  %v1236_v9 = vsub.f32 %v3925_v6, %v1235_v20 }
 0x14c   :  { %v1263_v26 = vand.u32 4294901760, %v3954_v1  ;;  %v1216_v40 = vand.u32 4294901760, %v1215_v5  ;;  %v1223_v44 = vand.u32 4294901760, %v1222_v8  ;;  %v1230_v61 = vand.u32 4294901760, %v1229_v17 }
 0x14d   :  { %v1256_v3 = vand.u32 4294901760, %v3966_v14  ;;  %3093 = vmatpush3.bf16.msra.mxu1 %v3968_v16  ;;  %v3098_v34 = vpack.c.bf16 %v1209_v11, %v1202_v28  ;;  %v1237_v33 = vand.u32 4294901760, %v1236_v9  ;;  %v1243_v42 = vsub.f32 %v3941_v36, %v1242_v25 }
 0x14e   :  { %3094 = vmatprep.subr.bf16.mxu1 %v3359_v21  ;;  %v3101_v60 = vpack.c.bf16 %v1223_v44, %v1216_v40  ;;  %v1250_v13 = vsub.f32 %v3937_v4, %v1249_v46  ;;  %v1264_v31 = vsub.f32 %v3954_v1, %v1263_v26  ;;  %v3113_v47 = vpack.c.bf16 %v3888_v63, %v3890_v2 }
 0x14f   :  { %v3104_v57 = vpack.c.bf16 %v1237_v33, %v1230_v61  ;;  %v1244_v5 = vand.u32 4294901760, %v1243_v42  ;;  %v1257_v8 = vsub.f32 %v3966_v14, %v1256_v3  ;;  %v3116_v28 = vpack.c.bf16 %v3897_v19, %v3905_v30 }
 0x150   :  { %2813 = vmatmul.mubr.f32.vlgmr.msra.gmra.mrb[12].mxu1 %v1157_v62  ;;  %v1251_v17 = vand.u32 4294901760, %v1250_v13  ;;  %v1265_v11 = vand.u32 4294901760, %v1264_v31  ;;  %v3119_v9 = vpack.c.bf16 %v3912_v37, %v3918_v27  ;;  %v3122_v40 = vpack.c.bf16 %v3925_v6, %v3928_v15 }
 0x151   :  { %3096 = vmatpush3.bf16.msra.mxu1 %v3095_v45  ;;  %2815 = vmatprep.mubr.msk.f32.mxu1 %vm3360_vm2, %v3361_v35  ;;  %v1258_v44 = vand.u32 4294901760, %v1257_v8  ;;  %v3125_v61 = vpack.c.bf16 %v3937_v4, %v3941_v36  ;;  %v3128_v24 = vpack.c.bf16 %v3954_v1, %v3966_v14  ;;  %v3149_v62 = vpack.c.bf16 %v1193_v7, %v1186_v43 }
 0x152   :  { %3097 = vmatprep.subr.bf16.mxu1 %v3359_v21  ;;  %v3107_v33 = vpack.c.bf16 %v1251_v17, %v1244_v5  ;;  %v3152_v45 = vpack.c.bf16 %v1207_v59, %v1200_v32  ;;  %v4010_v4 = vpack.c.bf16 %v1221_v12, %v1214_v0  ;;  %v4016_v63 = vpack.c.bf16 %v1235_v20, %v1228_v50 }
 0x153   :  { %v3110_v2 = vpack.c.bf16 %v1265_v11, %v1258_v44  ;;  %v4018_v7 = vpack.c.bf16 %v1249_v46, %v1242_v25  ;;  %v4020_v43 = vpack.c.bf16 %v1263_v26, %v1256_v3  ;;  %v1177_v19 = vand.u32 4294901760, %v3871_v23 }
 0x154   :  { %2816 = vmatmul.mubr.f32.gmra.mrb[14].mxu1 %v1167_v22 }
 0x155   :  { %3099 = vmatpush3.bf16.msra.mxu1 %v3098_v34  ;;  %2818 = vmatprep.mubr.msk.f32.mxu1 %vm3360_vm2, %v3361_v35 }
 0x156   :  { %3100 = vmatprep.subr.bf16.mxu1 %v3359_v21 }
 0x158   :  { %2819 = vmatmul.mubr.f32.gmra.mrb[16].mxu1 %v1177_v19 }
 0x159   :  { %3102 = vmatpush3.bf16.msra.mxu1 %v3101_v60  ;;  %2845 = vmatprep.mubr.msk.f32.mxu1 %vm3360_vm2, %v3361_v35 }
 0x15a   :  { %3103 = vmatprep.subr.bf16.mxu1 %v3359_v21 }
 0x15d   :  { %3105 = vmatpush3.bf16.msra.mxu1 %v3104_v57 }
 0x15e   :  { %3106 = vmatprep.subr.bf16.mxu1 %v3359_v21 }
 0x161   :  { %3108 = vmatpush3.bf16.msra.mxu1 %v3107_v33 }
 0x162   :  { %3109 = vmatprep.subr.bf16.mxu1 %v3359_v21 }
 0x165   :  { %3111 = vmatpush3.bf16.msra.mxu1 %v3110_v2 }
 0x166   :  { %3112 = vmatprep.subr.bf16.mxu1 %v3359_v21 }
 0x168   :  { %2846 = vmatmul.mubr.msk.f32.vlgmr.msra.gmra.mrb[12].mxu1 %vm1066_vm9, %v3832_v38 }
 0x169   :  { %3114 = vmatpush3.bf16.msra.mxu1 %v3113_v47  ;;  %2848 = vmatprep.mubr.msk.f32.mxu1 %vm3360_vm2, %v3361_v35 }
 0x16a   :  { %3115 = vmatprep.subr.bf16.mxu1 %v3359_v21 }
 0x16c   :  { %2849 = vmatmul.mubr.msk.f32.gmra.mrb[14].mxu1 %vm1066_vm9, %v3835_v39 }
 0x16d   :  { %3117 = vmatpush3.bf16.msra.mxu1 %v3116_v28  ;;  %2851 = vmatprep.mubr.msk.f32.mxu1 %vm3360_vm2, %v3361_v35 }
 0x16e   :  { %3118 = vmatprep.subr.bf16.mxu1 %v3359_v21 }
 0x170   :  { %2852 = vmatmul.mubr.msk.f32.gmra.mrb[16].mxu1 %vm1066_vm9, %v3842_v48 }
 0x171   :  { %3120 = vmatpush3.bf16.msra.mxu1 %v3119_v9  ;;  %2878 = vmatprep.mubr.msk.f32.mxu1 %vm3360_vm2, %v3361_v35 }
 0x172   :  { %3121 = vmatprep.subr.bf16.mxu1 %v3359_v21 }
 0x175   :  { %3123 = vmatpush3.bf16.msra.mxu1 %v3122_v40 }
 0x176   :  { %3124 = vmatprep.subr.bf16.mxu1 %v3359_v21 }
 0x179   :  { %3126 = vmatpush3.bf16.msra.mxu1 %v3125_v61 }
 0x17a   :  { %3127 = vmatprep.subr.bf16.mxu1 %v3359_v21 }
 0x17d   :  { %3129 = vmatpush3.bf16.msra.mxu1 %v3128_v24 }
 0x17e   :  { %3130 = vmatprep.subr.bf16.mxu1 %v3359_v21 }
 0x180   :  { %2879 = vmatmul.mubr.f32.vlgmr.msra.gmra.mrb[12].mxu1 %v3844_v49 }
 0x181   :  { %3132 = vmatpush3.bf16.msra.mxu1 %v3892_v10  ;;  %2881 = vmatprep.mubr.msk.f32.mxu1 %vm3360_vm2, %v3361_v35 }
 0x182   :  { %3133 = vmatprep.subr.bf16.mxu1 %v3359_v21 }
 0x184   :  { %2882 = vmatmul.mubr.f32.gmra.mrb[14].mxu1 %v3846_v29 }
 0x185   :  { %3135 = vmatpush3.bf16.msra.mxu1 %v3907_v58  ;;  %2884 = vmatprep.mubr.msk.f32.mxu1 %vm3360_vm2, %v3361_v35 }
 0x186   :  { %3136 = vmatprep.subr.bf16.mxu1 %v3359_v21 }
 0x188   :  { %2885 = vmatmul.mubr.f32.gmra.mrb[16].mxu1 %v3852_v54 }
 0x189   :  { %3138 = vmatpush3.bf16.msra.mxu1 %v3920_v53  ;;  %2911 = vmatprep.mubr.msk.f32.mxu1 %vm3360_vm2, %v3361_v35 }
 0x18a   :  { %3139 = vmatprep.subr.bf16.mxu1 %v3359_v21 }
 0x18d   :  { %3141 = vmatpush3.bf16.msra.mxu1 %v3931_v18 }
 0x18e   :  { %3142 = vmatprep.subr.bf16.mxu1 %v3359_v21 }
 0x191   :  { %3144 = vmatpush3.bf16.msra.mxu1 %v3943_v41 }
 0x192   :  { %3145 = vmatprep.subr.bf16.mxu1 %v3359_v21 }
 0x195   :  { %3147 = vmatpush3.bf16.msra.mxu1 %v3968_v16 }
 0x196   :  { %3148 = vmatprep.subr.bf16.mxu1 %v3359_v21 }
 0x198   :  { %2912 = vmatmul.mubr.f32.vlgmr.msra.gmra.mrb[12].mxu1 %v1155_v51 }
 0x199   :  { %3150 = vmatpush3.bf16.msra.mxu1 %v3149_v62  ;;  %2914 = vmatprep.mubr.msk.f32.mxu1 %vm3360_vm2, %v3361_v35 }
 0x19a   :  { %3151 = vmatprep.subr.bf16.mxu1 %v3359_v21 }
 0x19c   :  { %2915 = vmatmul.mubr.f32.gmra.mrb[14].mxu1 %v1165_v52 }
 0x19d   :  { %3153 = vmatpush3.bf16.msra.mxu1 %v3152_v45  ;;  %2917 = vmatprep.mubr.msk.f32.mxu1 %vm3360_vm2, %v3361_v35 }
 0x19e   :  { %3154 = vmatprep.subr.bf16.mxu1 %v3359_v21 }
 0x1a0   :  { %2918 = vmatmul.mubr.f32.gmra.mrb[16].mxu1 %v1175_v56 }
 0x1a1   :  { %3156 = vmatpush3.bf16.msra.mxu1 %v4010_v4  ;;  %2944 = vmatprep.mubr.msk.f32.mxu1 %vm3360_vm2, %v3361_v35 }
 0x1a2   :  { %3157 = vmatprep.subr.bf16.mxu1 %v3359_v21 }
 0x1a5   :  { %3159 = vmatpush3.bf16.msra.mxu1 %v4016_v63 }
 0x1a6   :  { %3160 = vmatprep.subr.bf16.mxu1 %v3359_v21 }
 0x1a9   :  { %3162 = vmatpush3.bf16.msra.mxu1 %v4018_v7 }
 0x1aa   :  { %3163 = vmatprep.subr.bf16.mxu1 %v3359_v21 }
 0x1ad   :  { %3165 = vmatpush3.bf16.msra.mxu1 %v4020_v43 }
 0x1ae   :  { %3166 = vmatprep.subr.bf16.mxu1 %v3359_v21 }
 0x1b0   :  { %2945 = vmatmul.mubr.msk.f32.vlgmr.msra.gmra.mrb[12].mxu1 %vm1066_vm9, %v3832_v38 }
 0x1b1   :  { %3168 = vmatpush3.bf16.msra.mxu1 %v3892_v10  ;;  %2947 = vmatprep.mubr.msk.f32.mxu1 %vm3360_vm2, %v3361_v35 }
 0x1b2   :  { %3169 = vmatprep.subr.bf16.mxu1 %v3359_v21 }
 0x1b4   :  { %2948 = vmatmul.mubr.msk.f32.gmra.mrb[14].mxu1 %vm1066_vm9, %v3835_v39 }
 0x1b5   :  { %3171 = vmatpush3.bf16.msra.mxu1 %v3907_v58  ;;  %2950 = vmatprep.mubr.msk.f32.mxu1 %vm3360_vm2, %v3361_v35 }
 0x1b6   :  { %3172 = vmatprep.subr.bf16.mxu1 %v3359_v21 }
 0x1b8   :  { %2951 = vmatmul.mubr.msk.f32.gmra.mrb[16].mxu1 %vm1066_vm9, %v3842_v48 }
 0x1b9   :  { %3174 = vmatpush3.bf16.msra.mxu1 %v3920_v53  ;;  %2977 = vmatprep.mubr.msk.f32.mxu1 %vm3360_vm2, %v3361_v35 }
 0x1ba   :  { %3175 = vmatprep.subr.bf16.mxu1 %v3359_v21 }
 0x1bd   :  { %3177 = vmatpush3.bf16.msra.mxu1 %v3931_v18 }
 0x1be   :  { %3178 = vmatprep.subr.bf16.mxu1 %v3359_v21 }
 0x1c1   :  { %3180 = vmatpush3.bf16.msra.mxu1 %v3943_v41 }
 0x1c2   :  { %3181 = vmatprep.subr.bf16.mxu1 %v3359_v21  ;;  %v2396_v49 = vpop.f32.mrb[14].mxu0 }
 0x1c3   :  { %v2412_v29 = vmul.f32 0.25, %v2396_v49  ;;  %v3069_v51 = vpop.f32.mrb[15].mxu0 }
 0x1c5   :  { %3183 = vmatpush3.bf16.msra.mxu1 %v3968_v16  ;;  %2422 = vrot.lane.b32.xlu1 %v2412_v29, %s3362_s4 }
 0x1c6   :  { %v2402_v52 = vpop.f32.mrb[16].mxu0 }
 0x1c7   :  { %v2413_v54 = vmul.f32 0.25, %v2402_v52  ;;  %v3072_v55 = vpop.f32.mrb[17].mxu0 }
 0x1c8   :  { %2978 = vmatmul.mubr.msk.f32.vlgmr.msra.gmra.mrb[12].mxu1 %vm1066_vm9, %v3832_v38 }
 0x1c9   :  { %2980 = vmatprep.mubr.msk.f32.mxu1 %vm3360_vm2, %v3361_v35  ;;  %2424 = vrot.lane.b32.xlu1 %v2413_v54, %s3362_s4 }
 0x1ca   :  { %v2408_v56 = vpop.f32.mrb[18].mxu0 }
 0x1cb   :  { %v2414_v22 = vmul.f32 0.25, %v2408_v56  ;;  %v3075_v21 = vpop.f32.mrb[19].mxu0 }
 0x1cc   :  { %2981 = vmatmul.mubr.msk.f32.gmra.mrb[14].mxu1 %vm1066_vm9, %v3835_v39 }
 0x1cd   :  { %2983 = vmatprep.mubr.msk.f32.mxu1 %vm3360_vm2, %v3361_v35  ;;  %2426 = vrot.lane.b32.xlu0 %v2414_v22, %s3362_s4 }
 0x1d0   :  { %2984 = vmatmul.mubr.msk.f32.gmra.mrb[16].mxu1 %vm1066_vm9, %v3842_v48 }
 0x237   :  { %v2423_v30 = vpop.permute.xlu1 %2422 }
 0x23b   :  { %v2425_v48 = vpop.permute.xlu1 %2424 }
 0x23f   :  { %v2427_v27 = vpop.permute.xlu0 %2426 }
 0x29b   :  { %v1735_v23 = vpop.f32.mrb[12].mxu1 }
 0x29c   :  { %v1751_v38 = vmul.f32 0.25, %v1735_v23  ;;  %v2979_v10 = vpop.f32.mrb[13].mxu1 }
 0x29e   :  { %2416 = vst.msk [vmem:[%s4157_s5] sm:$0xff] %vm2415_vm8, %v1751_v38 }
 0x29f   :  { %2432 = vst.msk [vmem:[%s4157_s5] sm:$0xff] %vm2431_vm10, %v2423_v30  ;;  %v1741_v35 = vpop.f32.mrb[14].mxu1 }
 0x2a0   :  { %v1752_v39 = vmul.f32 0.25, %v1741_v35  ;;  %v2982_v58 = vpop.f32.mrb[15].mxu1 }
 0x2a2   :  { %2417 = vst.msk [vmem:[%s4157_s5 + $0x8] sm:$0xff] %vm2415_vm8, %v1752_v39 }
 0x2a3   :  { %2433 = vst.msk [vmem:[%s4157_s5 + $0x8] sm:$0xff] %vm2431_vm10, %v2425_v48  ;;  %v1747_v59 = vpop.f32.mrb[16].mxu1 }
 0x2a4   :  { %v1753_v32 = vmul.f32 0.25, %v1747_v59  ;;  %v2985_v37 = vpop.f32.mrb[17].mxu1 }
 0x2a6   :  { %2418 = vst.msk [vmem:[%s4157_s5 + $0x10] sm:$0xff] %vm2415_vm8, %v1753_v32 }
 0x2a7   :  { %2434 = vst.msk [vmem:[%s4157_s5 + $0x10] sm:$0xff] %vm2431_vm10, %v2427_v27 }

// kernel: student_teacher_forward.9
= control target key start
LH: loop header
LB: loop body
LE: loop exit
PB: predicated region body
PF: predicated region fallthrough
CT: control target
= control target key end

     0   :  { %vm89_vm0 = vcmask 1043456   ;;  %vm52_vm1 = vcmask 31744   ;;  %v4750_v3 = vmov 2   ;;  %v4751_v4 = vmov 0   ;;  %s5737_s3 = inlined_call_operand.vmem [shape: f32[4,16], index: 3, kind: input, shape index: {}]   ;;  %s5738_s1 = inlined_call_operand.vmem [shape: f32[96,4], index: 1, kind: input, shape index: {}]   ;;  %s5739_s2 = inlined_call_operand.vmem [shape: s32[24,4], index: 2, kind: input, shape index: {}]   ;;  %s5740_s0 = inlined_call_operand.vmem [shape: f32[24,16], index: 0, kind: input, shape index: {}]   ;;  %s5741_s4 = inlined_call_operand.vmem [shape: f32[1,16], index: 4, kind: input, shape index: {}]   ;;  %s5742_s6 = inlined_call_operand.vmem [shape: f32[16,32], index: 6, kind: input, shape index: {}]   ;;  %s5743_s5 = inlined_call_operand.vmem [shape: f32[16,32], index: 5, kind: input, shape index: {}]   ;;  %s5744_s7 = inlined_call_operand.vmem [shape: f32[1,32], index: 7, kind: input, shape index: {}]   ;;  %s5745_s8 = inlined_call_operand.vmem [shape: f32[24,32], index: 8, kind: input, shape index: {}]   ;;  %s5746_s9 = inlined_call_operand.vmem [shape: f32[24,32], index: 9, kind: output, shape index: {}]  }
   0x1   :  { %v44_v0 = vld [vmem:[%s5737_s3] sm:$0xf]  ;;  %v33_v2 = vld [vmem:[%s5738_s1 + $0x8] sm:$0xff]  ;;  %4740 = vset.pattern.permute.xlu1 %v4750_v3  ;;  %4739 = vset.pattern.permute.xlu0 %v4751_v4  ;;  %v34_v8 = vld [vmem:[%s5738_s1 + $0x10] sm:$0xff]  ;;  %v4752_v54 = vmov 3   ;;  %vm4755_vm2 = vmmov 0  }
   0x2   :  { %v32_v1 = vld [vmem:[%s5738_s1] sm:$0xff]  ;;  %v91_v5 = vsel %vm89_vm0, %v44_v0, 0  ;;  %v57_v7 = vsel %vm52_vm1, %v33_v2, 0  ;;  %v35_v9 = vld [vmem:[%s5738_s1 + $0x18] sm:$0xff]  ;;  %v60_v14 = vsel %vm52_vm1, %v34_v8, 0  ;;  %v37_v15 = vld [vmem:[%s5738_s1 + $0x28] sm:$0xff] }
   0x3   :  { %v54_v6 = vsel %vm52_vm1, %v32_v1, 0  ;;  %v36_v10 = vld [vmem:[%s5738_s1 + $0x20] sm:$0xff]  ;;  %v4829_v11 = vand.u32 4294901760, %v91_v5  ;;  %v4833_v13 = vand.u32 4294901760, %v57_v7  ;;  %v38_v16 = vld [vmem:[%s5738_s1 + $0x30] sm:$0xff]  ;;  %v4842_v17 = vand.u32 4294901760, %v60_v14 }
   0x4   :  { %v4831_v12 = vand.u32 4294901760, %v54_v6  ;;  %v63_v18 = vsel %vm52_vm1, %v35_v9, 0  ;;  %v66_v19 = vsel %vm52_vm1, %v36_v10, 0  ;;  %v69_v20 = vsel %vm52_vm1, %v37_v15, 0  ;;  %v4871_v29 = vld [vmem:[%s5739_s2] sm:$0xff]  ;;  %v4904_v42 = vld [vmem:[%s5739_s2 + $0x8] sm:$0xff] }
   0x5   :  { %3872 = vmatprep.subr.mxu0 %v4829_v11  ;;  %v4852_v22 = vsub.f32 %v91_v5, %v4829_v11  ;;  %v4855_v23 = vsub.f32 %v57_v7, %v4833_v13  ;;  %v4857_v24 = vand.u32 4294901760, %v63_v18  ;;  %v4861_v25 = vsub.f32 %v60_v14, %v4842_v17  ;;  %1815 = vperm.xlu1 %4740, %v4871_v29   ;;  %v39_v47 = vld [vmem:[%s5738_s1 + $0x38] sm:$0xff]  ;;  %v40_v48 = vld [vmem:[%s5738_s1 + $0x40] sm:$0xff]  ;;  %v41_v49 = vld [vmem:[%s5738_s1 + $0x48] sm:$0xff] }
   0x6   :  { %v4849_v21 = vsub.f32 %v54_v6, %v4831_v12  ;;  %3873 = vmatpush3.msra.mxu0 %v4829_v11  ;;  %v4863_v26 = vand.u32 4294901760, %v66_v19  ;;  %v4865_v27 = vand.u32 4294901760, %v69_v20  ;;  %v72_v28 = vsel %vm52_vm1, %v38_v16, 0  ;;  %1773 = vperm.xlu0 %4739, %v4871_v29   ;;  %v42_v58 = vld [vmem:[%s5738_s1 + $0x50] sm:$0xff]  ;;  %v43_v59 = vld [vmem:[%s5738_s1 + $0x58] sm:$0xff] }
   0x7   :  { %v4875_v31 = vand.u32 4294901760, %v4852_v22  ;;  %v171_v32 = vand.u32 4294901760, %v4855_v23  ;;  %v4879_v33 = vsub.f32 %v63_v18, %v4857_v24  ;;  %v181_v34 = vand.u32 4294901760, %v4861_v25 }
   0x8   :  { %v161_v30 = vand.u32 4294901760, %v4849_v21  ;;  %v4885_v35 = vsub.f32 %v66_v19, %v4863_v26  ;;  %v4888_v36 = vsub.f32 %v69_v20, %v4865_v27  ;;  %v4890_v37 = vand.u32 4294901760, %v72_v28 }
   0x9   :  { %v283_v39 = vsub.f32 %v4852_v22, %v4875_v31  ;;  %v172_v40 = vsub.f32 %v4855_v23, %v171_v32  ;;  %v191_v41 = vand.u32 4294901760, %v4879_v33  ;;  %v182_v43 = vsub.f32 %v4861_v25, %v181_v34  ;;  %4741 = vset.pattern.permute.xlu1 %v4751_v4 }
   0xa   :  { %v162_v38 = vsub.f32 %v4849_v21, %v161_v30  ;;  %v201_v44 = vand.u32 4294901760, %v4885_v35  ;;  %v211_v45 = vand.u32 4294901760, %v4888_v36  ;;  %v4912_v46 = vsub.f32 %v72_v28, %v4890_v37  ;;  %4743 = vset.pattern.permute.xlu0 %v4752_v54  ;;  %1776 = vperm.xlu1 %4741, %v4904_v42  }
   0xb   :  { %v284_v51 = vand.u32 4294901760, %v283_v39  ;;  %v173_v52 = vand.u32 4294901760, %v172_v40  ;;  %v192_v53 = vsub.f32 %v4879_v33, %v191_v41  ;;  %v183_v55 = vand.u32 4294901760, %v182_v43  ;;  %1836 = vperm.xlu0 %4743, %v4871_v29  }
   0xc   :  { %v163_v50 = vand.u32 4294901760, %v162_v38  ;;  %v202_v56 = vsub.f32 %v4885_v35, %v201_v44  ;;  %v221_v57 = vand.u32 4294901760, %v4912_v46  ;;  %v212_v60 = vsub.f32 %v4888_v36, %v211_v45 }
   0xd   :  { %3892 = vmatprep.subr.mxu0 %v284_v51  ;;  %v75_v61 = vsel %vm52_vm1, %v39_v47, 0  ;;  %v78_v62 = vsel %vm52_vm1, %v40_v48, 0  ;;  %v81_v63 = vsel %vm52_vm1, %v41_v49, 0  ;;  %v193_v0 = vand.u32 4294901760, %v192_v53  ;;  %v1771_v53 = vld [vmem:[%s5739_s2 + $0x10] sm:$0xff] }
   0xe   :  { %3874 = vmatprep.mubr.f32.mxu0 %v163_v50  ;;  %v203_v1 = vand.u32 4294901760, %v202_v56  ;;  %v222_v2 = vsub.f32 %v4912_v46, %v221_v57  ;;  %v4949_v5 = vand.u32 4294901760, %v75_v61  ;;  %v4951_v6 = vand.u32 4294901760, %v78_v62 }
   0xf   :  { %3875 = vmatmul.mubr.f32.vlgmr.msra.gmra.mrb[0].mxu0 %v173_v52  ;;  %v4953_v7 = vand.u32 4294901760, %v81_v63  ;;  %v84_v8 = vsel %vm52_vm1, %v42_v58, 0  ;;  %v87_v9 = vsel %vm52_vm1, %v43_v59, 0  ;;  %v4753_v16 = vmov 1  }
  0x10   :  { %3893 = vmatpush3.msra.mxu0 %v284_v51  ;;  %3877 = vmatprep.mubr.f32.mxu0 %v183_v55  ;;  %v4958_v10 = vsub.f32 %v75_v61, %v4949_v5  ;;  %v4960_v14 = vand.u32 4294901760, %v84_v8  ;;  %v4962_v15 = vand.u32 4294901760, %v87_v9  ;;  %v4966_v18 = vsub.f32 %v78_v62, %v4951_v6 }
  0x11   :  { %3912 = vmatprep.subr.mxu0 %v4852_v22  ;;  %4742 = vset.pattern.permute.xlu1 %v4753_v16  ;;  %v4969_v19 = vsub.f32 %v81_v63, %v4953_v7  ;;  %v213_v20 = vand.u32 4294901760, %v212_v60  ;;  %v223_v40 = vand.u32 4294901760, %v222_v2  ;;  %vm1856_vm9 = vcmask 195584  }
  0x12   :  { %1797 = vperm.xlu1 %4742, %v4904_v42   ;;  %4744 = vset.pattern.permute.xlu0 %v4753_v16  ;;  %v231_v28 = vand.u32 4294901760, %v4958_v10  ;;  %v4974_v38 = vsub.f32 %v84_v8, %v4960_v14  ;;  %v4977_v39 = vsub.f32 %v87_v9, %v4962_v15  ;;  %v241_v43 = vand.u32 4294901760, %v4966_v18 }
  0x13   :  { %3878 = vmatmul.mubr.f32.gmra.mrb[2].mxu0 %v193_v0  ;;  %1794 = vperm.xlu0 %4744, %v4871_v29   ;;  %v251_v47 = vand.u32 4294901760, %v4969_v19 }
  0x14   :  { %3880 = vmatprep.mubr.f32.mxu0 %v203_v1  ;;  %v232_v48 = vsub.f32 %v4958_v10, %v231_v28  ;;  %v261_v49 = vand.u32 4294901760, %v4974_v38  ;;  %v242_v50 = vsub.f32 %v4966_v18, %v241_v43  ;;  %v271_v52 = vand.u32 4294901760, %v4977_v39 }
  0x15   :  { %v252_v51 = vsub.f32 %v4969_v19, %v251_v47 }
  0x16   :  { %4745 = vset.pattern.permute.xlu1 %v4750_v3  ;;  %v233_v29 = vand.u32 4294901760, %v232_v48  ;;  %v243_v55 = vand.u32 4294901760, %v242_v50  ;;  %v262_v56 = vsub.f32 %v4974_v38, %v261_v49  ;;  %v272_v59 = vsub.f32 %v4977_v39, %v271_v52 }
  0x17   :  { %3881 = vmatmul.mubr.f32.gmra.mrb[4].mxu0 %v213_v20  ;;  %1818 = vperm.xlu1 %4745, %v4904_v42   ;;  %v253_v58 = vand.u32 4294901760, %v252_v51 }
  0x18   :  { %3883 = vmatprep.mubr.f32.mxu0 %v223_v40  ;;  %1800 = vperm.xlu0 %4744, %v1771_v53   ;;  %v263_v60 = vand.u32 4294901760, %v262_v56  ;;  %v273_v61 = vand.u32 4294901760, %v272_v59 }
  0x1b   :  { %3884 = vmatmul.mubr.f32.gmra.mrb[6].mxu0 %v233_v29  ;;  %4746 = vset.pattern.permute.xlu1 %v4751_v4  ;;  %v4754_v4 = vmov 0.0|0.0  }
  0x1c   :  { %3886 = vmatprep.mubr.f32.mxu0 %v243_v55  ;;  %1779 = vperm.xlu1 %4746, %v1771_v53  }
  0x1d   :  { %4749 = vset.pattern.permute.xlu0 %v4752_v54  ;;  %4436 = vmatprep.subr.bf16.mxu1 %v4754_v4 }
  0x1e   :  { %1842 = vperm.xlu0 %4749, %v1771_v53  }
  0x1f   :  { %3887 = vmatmul.mubr.f32.gmra.mrb[8].mxu0 %v253_v58 }
  0x20   :  { %3889 = vmatprep.mubr.f32.mxu0 %v263_v60  ;;  %4747 = vset.pattern.permute.xlu1 %v4752_v54 }
  0x21   :  { %1839 = vperm.xlu1 %4747, %v4904_v42  }
  0x23   :  { %3890 = vmatmul.mubr.f32.gmra.mrb[10].mxu0 %v273_v61 }
  0x24   :  { %3894 = vmatprep.mubr.f32.mxu0 %v4831_v12 }
  0x25   :  { %4748 = vset.pattern.permute.xlu1 %v4750_v3  ;;  %v4756_v3 = vmov 0.0  }
  0x26   :  { %1821 = vperm.xlu1 %4748, %v1771_v53   ;;  %4016 = vmatprep.mubr.msk.f32.mxu1 %vm4755_vm2, %v4756_v3 }
  0x27   :  { %3895 = vmatmul.mubr.f32.vlgmr.msra.gmra.mrb[0].mxu0 %v4833_v13 }
  0x28   :  { %3913 = vmatpush3.msra.mxu0 %v4852_v22  ;;  %3897 = vmatprep.mubr.f32.mxu0 %v4842_v17 }
  0x29   :  { %3932 = vmatprep.subr.mxu0 %v4829_v11 }
  0x2b   :  { %3898 = vmatmul.mubr.f32.gmra.mrb[2].mxu0 %v4857_v24 }
  0x2c   :  { %3900 = vmatprep.mubr.f32.mxu0 %v4863_v26 }
  0x2f   :  { %3901 = vmatmul.mubr.f32.gmra.mrb[4].mxu0 %v4865_v27 }
  0x30   :  { %3903 = vmatprep.mubr.f32.mxu0 %v4890_v37 }
  0x33   :  { %3904 = vmatmul.mubr.f32.gmra.mrb[6].mxu0 %v4949_v5 }
  0x34   :  { %3906 = vmatprep.mubr.f32.mxu0 %v4951_v6 }
  0x37   :  { %3907 = vmatmul.mubr.f32.gmra.mrb[8].mxu0 %v4953_v7 }
  0x38   :  { %3909 = vmatprep.mubr.f32.mxu0 %v4960_v14 }
  0x3b   :  { %3910 = vmatmul.mubr.f32.gmra.mrb[10].mxu0 %v4962_v15 }
  0x3c   :  { %3914 = vmatprep.mubr.f32.mxu0 %v4849_v21  ;;  %v1767_v21 = vld [vmem:[%s5740_s0 + $0x8] sm:$0xff] }
  0x3f   :  { %3915 = vmatmul.mubr.f32.vlgmr.msra.gmra.mrb[0].mxu0 %v4855_v23  ;;  %v1870_v23 = vand.u32 4294901760, %v1767_v21 }
  0x40   :  { %3933 = vmatpush3.msra.mxu0 %v4829_v11  ;;  %3917 = vmatprep.mubr.f32.mxu0 %v4861_v25 }
  0x41   :  { %3952 = vmatprep.subr.mxu0 %v4875_v31 }
  0x43   :  { %3918 = vmatmul.mubr.f32.gmra.mrb[2].mxu0 %v4879_v33 }
  0x44   :  { %3920 = vmatprep.mubr.f32.mxu0 %v4885_v35 }
  0x47   :  { %3921 = vmatmul.mubr.f32.gmra.mrb[4].mxu0 %v4888_v36 }
  0x48   :  { %3923 = vmatprep.mubr.f32.mxu0 %v4912_v46 }
  0x4b   :  { %3924 = vmatmul.mubr.f32.gmra.mrb[6].mxu0 %v4958_v10 }
  0x4c   :  { %3926 = vmatprep.mubr.f32.mxu0 %v4966_v18 }
  0x4f   :  { %3927 = vmatmul.mubr.f32.gmra.mrb[8].mxu0 %v4969_v19 }
  0x50   :  { %3929 = vmatprep.mubr.f32.mxu0 %v4974_v38 }
  0x53   :  { %3930 = vmatmul.mubr.f32.gmra.mrb[10].mxu0 %v4977_v39 }
  0x54   :  { %3934 = vmatprep.mubr.f32.mxu0 %v161_v30  ;;  %v1768_v30 = vld [vmem:[%s5740_s0 + $0x10] sm:$0xff] }
  0x57   :  { %3935 = vmatmul.mubr.f32.vlgmr.msra.gmra.mrb[0].mxu0 %v171_v32 }
  0x58   :  { %3953 = vmatpush3.msra.mxu0 %v4875_v31  ;;  %3937 = vmatprep.mubr.f32.mxu0 %v181_v34  ;;  %v1048_v31 = vlaneseq  ;;  %v5095_v34 = vand.u32 4294901760, %v1768_v30 }
  0x59   :  { %3972 = vmatprep.subr.mxu0 %v4829_v11 }
  0x5a   :  { %v5131_v1 = vsub.f32 %v1768_v30, %v5095_v34 }
  0x5b   :  { %3938 = vmatmul.mubr.f32.gmra.mrb[2].mxu0 %v191_v41  ;;  %v5115_v41 = vsub.f32 %v1767_v21, %v1870_v23 }
  0x5c   :  { %3940 = vmatprep.mubr.f32.mxu0 %v201_v44  ;;  %v1981_v20 = vand.u32 4294901760, %v5131_v1 }
  0x5e   :  { %v1982_v29 = vsub.f32 %v5131_v1, %v1981_v20 }
  0x5f   :  { %3941 = vmatmul.mubr.f32.gmra.mrb[4].mxu0 %v211_v45 }
  0x60   :  { %3943 = vmatprep.mubr.f32.mxu0 %v221_v57  ;;  %v1974_v57 = vand.u32 4294901760, %v5115_v41  ;;  %v1983_v60 = vand.u32 4294901760, %v1982_v29 }
  0x62   :  { %v1975_v9 = vsub.f32 %v5115_v41, %v1974_v57 }
  0x63   :  { %3944 = vmatmul.mubr.f32.gmra.mrb[6].mxu0 %v231_v28 }
  0x64   :  { %3946 = vmatprep.mubr.f32.mxu0 %v241_v43  ;;  %v1976_v19 = vand.u32 4294901760, %v1975_v9 }
  0x67   :  { %3947 = vmatmul.mubr.f32.gmra.mrb[8].mxu0 %v251_v47 }
  0x68   :  { %3949 = vmatprep.mubr.f32.mxu0 %v261_v49 }
  0x6b   :  { %3950 = vmatmul.mubr.f32.gmra.mrb[10].mxu0 %v271_v52 }
  0x6c   :  { %3954 = vmatprep.mubr.f32.mxu0 %v4831_v12 }
  0x6f   :  { %3955 = vmatmul.mubr.f32.vlgmr.msra.gmra.mrb[0].mxu0 %v4833_v13 }
  0x70   :  { %3973 = vmatpush3.msra.mxu0 %v4829_v11  ;;  %3957 = vmatprep.mubr.f32.mxu0 %v4842_v17  ;;  %v1766_v11 = vld [vmem:[%s5740_s0] sm:$0xff] }
  0x71   :  { %4544 = vmatprep.subr.bf16.mxu0 %v4754_v4  ;;  %v1867_v22 = vand.u32 4294901760, %v1766_v11 }
  0x73   :  { %3958 = vmatmul.mubr.f32.gmra.mrb[2].mxu0 %v4857_v24  ;;  %v5087_v25 = vpack.c.bf16 %v1870_v23, %v1867_v22 }
  0x74   :  { %3960 = vmatprep.mubr.f32.mxu0 %v4863_v26 }
  0x77   :  { %3961 = vmatmul.mubr.f32.gmra.mrb[4].mxu0 %v4865_v27 }
  0x78   :  { %3963 = vmatprep.mubr.f32.mxu0 %v4890_v37 }
  0x7b   :  { %3964 = vmatmul.mubr.f32.gmra.mrb[6].mxu0 %v4949_v5 }
  0x7c   :  { %3966 = vmatprep.mubr.f32.mxu0 %v4951_v6 }
  0x7f   :  { %3967 = vmatmul.mubr.f32.gmra.mrb[8].mxu0 %v4953_v7 }
  0x80   :  { %3969 = vmatprep.mubr.f32.mxu0 %v4960_v14 }
  0x83   :  { %3970 = vmatmul.mubr.f32.gmra.mrb[10].mxu0 %v4962_v15 }
  0x84   :  { %3974 = vmatprep.mubr.f32.mxu0 %v4831_v12  ;;  %v1816_v32 = vpop.permute.xlu1 %1815  ;;  %v5100_v12 = vand.u32 127, %v1048_v31 }
  0x85   :  { %v1774_v33 = vpop.permute.xlu0 %1773 }
  0x86   :  { %vm1781_vm3 = vcmp.eq.s32.totalorder %v1774_v33, %v5100_v12  ;;  %vm1823_vm4 = vcmp.eq.s32.totalorder %v1816_v32, %v5100_v12 }
  0x87   :  { %3975 = vmatmul.mubr.f32.vlgmr.msra.gmra.mrb[0].mxu0 %v4833_v13 }
  0x88   :  { %3977 = vmatprep.mubr.f32.mxu0 %v4842_v17  ;;  %4546 = vmatpush3.bf16.msra.mxu0 %v5087_v25 }
  0x89   :  { %4194 = vmatprep.subr.mxu0 %v4756_v3  ;;  %v1777_v35 = vpop.permute.xlu1 %1776 }
  0x8a   :  { %v1837_v13 = vpop.permute.xlu0 %1836  ;;  %vm1782_vm7 = vcmp.eq.s32.totalorder %v1777_v35, %v5100_v12 }
  0x8b   :  { %3978 = vmatmul.mubr.f32.gmra.mrb[2].mxu0 %v4857_v24  ;;  %v3595_v24 = vsel %vm1781_vm3, 1.0, %v4756_v3  ;;  %vm1844_vm5 = vcmp.eq.s32.totalorder %v1837_v13, %v5100_v12  ;;  %v3596_v62 = vsel %vm1782_vm7, 1.0, %v4756_v3  ;;  %vm1078_vm7 = vcmask 785408  }
  0x8c   :  { %3980 = vmatprep.mubr.f32.mxu0 %v4863_v26  ;;  %4195 = vmatpush3.msra.mxu0 %v5095_v34  ;;  %v5113_v26 = vsub.f32 %v1766_v11, %v1867_v22  ;;  %v3604_v44 = vsel %vm1844_vm5, 1.0, %v4756_v3 }
  0x8d   :  { %4547 = vmatprep.subr.bf16.mxu0 %v4754_v4 }
  0x8e   :  { %v1967_v54 = vand.u32 4294901760, %v5113_v26 }
  0x8f   :  { %3981 = vmatmul.mubr.f32.gmra.mrb[4].mxu0 %v4865_v27  ;;  %v3601_v27 = vsel %vm1823_vm4, 1.0, %v4756_v3 }
  0x90   :  { %3983 = vmatprep.mubr.f32.mxu0 %v4890_v37  ;;  %v1968_v8 = vsub.f32 %v5113_v26, %v1967_v54 }
  0x91   :  { %v1798_v17 = vpop.permute.xlu1 %1797 }
  0x92   :  { %v1795_v36 = vpop.permute.xlu0 %1794  ;;  %vm1803_vm8 = vcmp.eq.s32.totalorder %v1798_v17, %v5100_v12  ;;  %v1969_v18 = vand.u32 4294901760, %v1968_v8 }
  0x93   :  { %3984 = vmatmul.mubr.f32.gmra.mrb[6].mxu0 %v4949_v5  ;;  %vm1802_vm6 = vcmp.eq.s32.totalorder %v1795_v36, %v5100_v12  ;;  %v3599_v63 = vsel %vm1803_vm8, 1.0, %v4756_v3  ;;  %v4551_v36 = vpack.c.bf16 %v5115_v41, %v5113_v26 }
  0x94   :  { %3986 = vmatprep.mubr.f32.mxu0 %v4951_v6  ;;  %v3598_v37 = vsel %vm1802_vm6, 1.0, %v4756_v3  ;;  %v1812_v2 = vadd.f32 %v3599_v63, %v3596_v62  ;;  %v4548_v50 = vpack.c.bf16 %v1976_v19, %v1969_v18 }
  0x95   :  { %v1811_v42 = vadd.f32 %v3598_v37, %v3595_v24 }
  0x96   :  { %v1819_v45 = vpop.permute.xlu1 %1818 }
  0x97   :  { %3987 = vmatmul.mubr.f32.gmra.mrb[8].mxu0 %v4953_v7  ;;  %v1832_v46 = vadd.f32 %v3601_v27, %v1811_v42  ;;  %vm1824_vm10 = vcmp.eq.s32.totalorder %v1819_v45, %v5100_v12  ;;  %v1801_v7 = vpop.permute.xlu0 %1800  ;;  %v4557_v27 = vpack.c.bf16 %v1974_v57, %v1967_v54 }
  0x98   :  { %3989 = vmatprep.mubr.f32.mxu0 %v4960_v14  ;;  %v3602_v10 = vsel %vm1824_vm10, 1.0, %v4756_v3  ;;  %vm1804_vm12 = vcmp.eq.s32.totalorder %v1801_v7, %v5100_v12  ;;  %v5269_v7 = vld [vmem:[%s5741_s4] ss:$0 sm:$0xff] }
  0x99   :  { %v1853_v0 = vadd.f32 %v3604_v44, %v1832_v46  ;;  %v1833_v16 = vadd.f32 %v3602_v10, %v1812_v2  ;;  %v3600_v40 = vsel %vm1804_vm12, 1.0, %v4756_v3 }
  0x9b   :  { %3990 = vmatmul.mubr.f32.gmra.mrb[10].mxu0 %v4962_v15  ;;  %v1780_v5 = vpop.permute.xlu1 %1779  ;;  %v1858_v6 = vsel %vm1856_vm9, %v1853_v0, 0 }
  0x9c   :  { %v5142_v14 = vand.u32 4294901760, %v1858_v6  ;;  %4196 = vmatprep.mubr.msk.f32.mxu0 %vm4755_vm2, %v4756_v3  ;;  %vm1783_vm11 = vcmp.eq.s32.totalorder %v1780_v5, %v5100_v12 }
  0x9d   :  { %v3597_v39 = vsel %vm1783_vm11, 1.0, %v4756_v3  ;;  %v1843_v43 = vpop.permute.xlu0 %1842 }
  0x9e   :  { %v5148_v15 = vsub.f32 %v1858_v6, %v5142_v14  ;;  %v1813_v51 = vadd.f32 %v3600_v40, %v3597_v39  ;;  %vm1846_vm14 = vcmp.eq.s32.totalorder %v1843_v43, %v5100_v12 }
  0x9f   :  { %v3606_v59 = vsel %vm1846_vm14, 1.0, %v4756_v3 }
  0xa0   :  { %v1840_v28 = vpop.permute.xlu1 %1839  ;;  %v1936_v38 = vand.u32 4294901760, %v5148_v15 }
  0xa1   :  { %vm1845_vm13 = vcmp.eq.s32.totalorder %v1840_v28, %v5100_v12 }
  0xa2   :  { %v3605_v47 = vsel %vm1845_vm13, 1.0, %v4756_v3  ;;  %v1937_v48 = vsub.f32 %v5148_v15, %v1936_v38 }
  0xa3   :  { %v1854_v49 = vadd.f32 %v3605_v47, %v1833_v16 }
  0xa4   :  { %v1938_v52 = vand.u32 4294901760, %v1937_v48 }
  0xa5   :  { %v1861_v53 = vsel %vm1856_vm9, %v1854_v49, 0  ;;  %v1822_v55 = vpop.permute.xlu1 %1821 }
  0xa6   :  { %v5165_v56 = vand.u32 4294901760, %v1861_v53  ;;  %vm1825_vm15 = vcmp.eq.s32.totalorder %v1822_v55, %v5100_v12  ;;  %4197 = vmatmul.mubr.f32.vlgmr.msra.gmra.mrb[12].mxu0 %v1938_v52 }
  0xa7   :  { %v3603_v58 = vsel %vm1825_vm15, 1.0, %v4756_v3  ;;  %4199 = vmatprep.mubr.msk.f32.mxu0 %vm4755_vm2, %v4756_v3  ;;  %4549 = vmatpush3.bf16.msra.mxu0 %v4548_v50 }
  0xa8   :  { %v1945_v61 = vsub.f32 %v1861_v53, %v5165_v56  ;;  %v1834_v11 = vadd.f32 %v3603_v58, %v1813_v51  ;;  %4209 = vmatprep.subr.mxu0 %v4756_v3 }
  0xaa   :  { %v1855_v21 = vadd.f32 %v3606_v59, %v1834_v11  ;;  %v1946_v22 = vand.u32 4294901760, %v1945_v61 }
  0xab   :  { %4210 = vmatpush3.msra.mxu0 %v1983_v60 }
  0xac   :  { %v1864_v23 = vsel %vm1856_vm9, %v1855_v21, 0  ;;  %v1947_v30 = vsub.f32 %v1945_v61, %v1946_v22  ;;  %4550 = vmatprep.subr.bf16.mxu0 %v4754_v4 }
  0xad   :  { %v1954_v32 = vand.u32 4294901760, %v1864_v23 }
  0xae   :  { %v1948_v33 = vand.u32 4294901760, %v1947_v30 }
  0xaf   :  { %v1955_v35 = vsub.f32 %v1864_v23, %v1954_v32 }
  0xb0   :  { %4200 = vmatmul.mubr.f32.gmra.mrb[14].mxu0 %v1948_v33 }
  0xb1   :  { %4202 = vmatprep.mubr.msk.f32.mxu0 %vm4755_vm2, %v4756_v3  ;;  %v1956_v13 = vand.u32 4294901760, %v1955_v35 }
  0xb3   :  { %v1957_v17 = vsub.f32 %v1955_v35, %v1956_v13 }
  0xb5   :  { %v1958_v24 = vand.u32 4294901760, %v1957_v17 }
  0xb7   :  { %4203 = vmatmul.mubr.f32.gmra.mrb[16].mxu0 %v1958_v24 }
  0xb8   :  { %4211 = vmatprep.mubr.msk.f32.mxu0 %vm4755_vm2, %v4756_v3 }
  0xbb   :  { %4212 = vmatmul.mubr.f32.vlgmr.msra.gmra.mrb[12].mxu0 %v5142_v14 }
  0xbc   :  { %4214 = vmatprep.mubr.msk.f32.mxu0 %vm4755_vm2, %v4756_v3  ;;  %4552 = vmatpush3.bf16.msra.mxu0 %v4551_v36 }
  0xbd   :  { %4224 = vmatprep.subr.mxu0 %v4756_v3 }
  0xbf   :  { %4215 = vmatmul.mubr.f32.gmra.mrb[14].mxu0 %v5165_v56 }
  0xc0   :  { %4217 = vmatprep.mubr.msk.f32.mxu0 %vm4755_vm2, %v4756_v3  ;;  %4225 = vmatpush3.msra.mxu0 %v5131_v1 }
  0xc1   :  { %4553 = vmatprep.subr.bf16.mxu0 %v4754_v4 }
  0xc3   :  { %4218 = vmatmul.mubr.f32.gmra.mrb[16].mxu0 %v1954_v32 }
  0xc4   :  { %4226 = vmatprep.mubr.msk.f32.mxu0 %vm4755_vm2, %v4756_v3 }
  0xc7   :  { %4227 = vmatmul.mubr.f32.vlgmr.msra.gmra.mrb[12].mxu0 %v5148_v15 }
  0xc8   :  { %4229 = vmatprep.mubr.msk.f32.mxu0 %vm4755_vm2, %v4756_v3  ;;  %4555 = vmatpush3.bf16.msra.mxu0 %v5087_v25 }
  0xc9   :  { %4239 = vmatprep.subr.mxu0 %v4756_v3 }
  0xcb   :  { %4230 = vmatmul.mubr.f32.gmra.mrb[14].mxu0 %v1945_v61 }
  0xcc   :  { %4232 = vmatprep.mubr.msk.f32.mxu0 %vm4755_vm2, %v4756_v3  ;;  %4240 = vmatpush3.msra.mxu0 %v5095_v34 }
  0xcd   :  { %4556 = vmatprep.subr.bf16.mxu0 %v4754_v4 }
  0xcf   :  { %4233 = vmatmul.mubr.f32.gmra.mrb[16].mxu0 %v1955_v35 }
  0xd0   :  { %4241 = vmatprep.mubr.msk.f32.mxu0 %vm4755_vm2, %v4756_v3 }
  0xd3   :  { %4242 = vmatmul.mubr.f32.vlgmr.msra.gmra.mrb[12].mxu0 %v1936_v38 }
  0xd4   :  { %4244 = vmatprep.mubr.msk.f32.mxu0 %vm4755_vm2, %v4756_v3  ;;  %4558 = vmatpush3.bf16.msra.mxu0 %v4557_v27 }
  0xd5   :  { %4254 = vmatprep.subr.mxu0 %v4756_v3 }
  0xd7   :  { %4245 = vmatmul.mubr.f32.gmra.mrb[14].mxu0 %v1946_v22 }
  0xd8   :  { %4247 = vmatprep.mubr.msk.f32.mxu0 %vm4755_vm2, %v4756_v3  ;;  %4255 = vmatpush3.msra.mxu0 %v1981_v20 }
  0xd9   :  { %4559 = vmatprep.subr.bf16.mxu0 %v4754_v4 }
  0xdb   :  { %4248 = vmatmul.mubr.f32.gmra.mrb[16].mxu0 %v1956_v13 }
  0xdc   :  { %4256 = vmatprep.mubr.msk.f32.mxu0 %vm4755_vm2, %v4756_v3 }
  0xdf   :  { %4257 = vmatmul.mubr.f32.vlgmr.msra.gmra.mrb[12].mxu0 %v5142_v14 }
  0xe0   :  { %4259 = vmatprep.mubr.msk.f32.mxu0 %vm4755_vm2, %v4756_v3  ;;  %4561 = vmatpush3.bf16.msra.mxu0 %v5087_v25  ;;  %v1049_v25 = vshrl.u32 %v1048_v31, 7 }
  0xe1   :  { %4269 = vmatprep.subr.mxu0 %v4756_v3 }
  0xe2   :  { %v1060_v26 = vadd.s32 1, %v1049_v25  ;;  %v1051_v37 = vadd.s32 16, %v1049_v25  ;;  %v1054_v42 = vmul.u32 4, %v1049_v25 }
  0xe3   :  { %4260 = vmatmul.mubr.f32.gmra.mrb[14].mxu0 %v5165_v56 }
  0xe4   :  { %4262 = vmatprep.mubr.msk.f32.mxu0 %vm4755_vm2, %v4756_v3  ;;  %4270 = vmatpush3.msra.mxu0 %v5095_v34  ;;  %v1050_v34 = vadd.s32 8, %v1049_v25  ;;  %v1063_v44 = vmul.u32 4, %v1060_v26  ;;  %v1062_v54 = vadd.s32 1, %v1051_v37  ;;  %vm1057_vm0 = vcmp.ge.s32.totalorder %v5100_v12, %v1054_v42 }
  0xe5   :  { %4562 = vmatprep.subr.bf16.mxu0 %v4754_v4  ;;  %v1056_v57 = vmul.u32 4, %v1051_v37 }
  0xe6   :  { %v1061_v41 = vadd.s32 1, %v1050_v34  ;;  %v1055_v45 = vmul.u32 4, %v1050_v34  ;;  %vm1066_vm1 = vcmp.lt.s32.totalorder %v5100_v12, %v1063_v44  ;;  %v1065_v62 = vmul.u32 4, %v1062_v54 }
  0xe7   :  { %4263 = vmatmul.mubr.f32.gmra.mrb[16].mxu0 %v1954_v32  ;;  %vm1069_vm5 = vmand %vm1057_vm0, %vm1066_vm1  ;;  %vm1059_vm8 = vcmp.ge.s32.totalorder %v5100_v12, %v1056_v57 }
  0xe8   :  { %4271 = vmatprep.mubr.msk.f32.mxu0 %vm4755_vm2, %v4756_v3  ;;  %v1064_v46 = vmul.u32 4, %v1061_v41  ;;  %vm1058_vm3 = vcmp.ge.s32.totalorder %v5100_v12, %v1055_v45  ;;  %v5246_v31 = vsel %vm1069_vm5, 1.0, %v4756_v3  ;;  %vm1068_vm9 = vcmp.lt.s32.totalorder %v5100_v12, %v1065_v62 }
  0xe9   :  { %v1080_v0 = vsel %vm1078_vm7, %v5246_v31, 0  ;;  %vm1071_vm10 = vmand %vm1059_vm8, %vm1068_vm9  ;;  %vm2431_vm9 = vcmask 130048  }
  0xea   :  { %vm1067_vm4 = vcmp.lt.s32.totalorder %v5100_v12, %v1064_v46  ;;  %v5257_v2 = vsub.f32 %v1080_v0, %v1080_v0  ;;  %v5260_v5 = vsel %vm1071_vm10, 1.0, %v4756_v3 }
  0xeb   :  { %4272 = vmatmul.mubr.f32.vlgmr.msra.gmra.mrb[12].mxu0 %v5142_v14  ;;  %vm1070_vm6 = vmand %vm1058_vm3, %vm1067_vm4  ;;  %v1086_v12 = vsel %vm1078_vm7, %v5260_v5, 0 }
  0xec   :  { %4274 = vmatprep.mubr.msk.f32.mxu0 %vm4755_vm2, %v4756_v3  ;;  %v5251_v63 = vsel %vm1070_vm6, 1.0, %v4756_v3  ;;  %v1167_v8 = vand.u32 4294901760, %v5257_v2  ;;  %v5273_v14 = vsub.f32 %v1086_v12, %v1086_v12 }
  0xed   :  { %v1083_v1 = vsel %vm1078_vm7, %v5251_v63, 0 }
  0xee   :  { %v5262_v6 = vsub.f32 %v1083_v1, %v1083_v1  ;;  %v5280_v19 = vsub.f32 %v5257_v2, %v1167_v8  ;;  %v1187_v40 = vand.u32 4294901760, %v5273_v14 }
  0xef   :  { %4275 = vmatmul.mubr.f32.gmra.mrb[14].mxu0 %v5165_v56 }
  0xf0   :  { %4277 = vmatprep.mubr.msk.f32.mxu0 %vm4755_vm2, %v4756_v3  ;;  %v1177_v9 = vand.u32 4294901760, %v5262_v6  ;;  %v1169_v51 = vand.u32 4294901760, %v5280_v19  ;;  %v5297_v60 = vsub.f32 %v5273_v14, %v1187_v40 }
  0xf2   :  { %v5285_v28 = vsub.f32 %v5262_v6, %v1177_v9 }
  0xf3   :  { %4278 = vmatmul.mubr.f32.gmra.mrb[16].mxu0 %v1954_v32 }
  0xf4   :  { %4284 = vmatprep.mubr.msk.f32.mxu0 %vm4755_vm2, %v4756_v3  ;;  %v1179_v55 = vand.u32 4294901760, %v5285_v28 }
 0x15a   :  { %v3976_v10 = vpop.f32.mrb[0].mxu0 }
 0x15b   :  { %v4600_v15 = vadd.f32 %v3976_v10, %v5269_v7  ;;  %v942_v16 = vpop.f32.mrb[1].mxu0 }
 0x15c   :  { %v4601_v18 = vadd.f32 %v5269_v7, %v942_v16 }
 0x15d   :  { %vm1013_vm11 = vcmp.gt.f32.partialorder %v4600_v15, 0.0  ;;  %v1025_v20 = vmul.f32 0.2, %v4600_v15 }
 0x15e   :  { %vm1012_vm12 = vcmp.gt.f32.partialorder %v4601_v18, 0.0  ;;  %v1024_v38 = vmul.f32 0.2, %v4601_v18  ;;  %v3979_v39 = vpop.f32.mrb[2].mxu0 }
 0x15f   :  { %v1037_v43 = vsel %vm1013_vm11, %v4600_v15, %v1025_v20  ;;  %v4602_v47 = vadd.f32 %v3979_v39, %v5269_v7  ;;  %v954_v48 = vpop.f32.mrb[3].mxu0  ;;  %vm3574_vm11 = vcmask 261120  }
 0x160   :  { %v1092_v49 = vand.u32 4294901760, %v1037_v43  ;;  %v1036_v50 = vsel %vm1012_vm12, %v4601_v18, %v1024_v38  ;;  %v4603_v29 = vadd.f32 %v5269_v7, %v954_v48 }
 0x161   :  { %v1089_v52 = vand.u32 4294901760, %v1036_v50  ;;  %vm1015_vm13 = vcmp.gt.f32.partialorder %v4602_v47, 0.0  ;;  %v1027_v53 = vmul.f32 0.2, %v4602_v47 }
 0x162   :  { %v5292_v56 = vsub.f32 %v1037_v43, %v1092_v49  ;;  %vm1014_vm14 = vcmp.gt.f32.partialorder %v4603_v29, 0.0  ;;  %v1026_v58 = vmul.f32 0.2, %v4603_v29  ;;  %v3982_v59 = vpop.f32.mrb[4].mxu0 }
 0x163   :  { %v5299_v61 = vsub.f32 %v1036_v50, %v1089_v52  ;;  %v1039_v11 = vsel %vm1015_vm13, %v4602_v47, %v1027_v53  ;;  %v4604_v21 = vadd.f32 %v3982_v59, %v5269_v7  ;;  %v966_v22 = vpop.f32.mrb[5].mxu0  ;;  %v5302_v23 = vpack.c.bf16 %v1092_v49, %v1089_v52 }
 0x164   :  { %v1205_v30 = vand.u32 4294901760, %v5292_v56  ;;  %v1098_v32 = vand.u32 4294901760, %v1039_v11  ;;  %v1038_v33 = vsel %vm1014_vm14, %v4603_v29, %v1026_v58  ;;  %v4605_v35 = vadd.f32 %v5269_v7, %v966_v22 }
 0x165   :  { %v1198_v13 = vand.u32 4294901760, %v5299_v61  ;;  %v1095_v17 = vand.u32 4294901760, %v1038_v33  ;;  %vm1017_vm15 = vcmp.gt.f32.partialorder %v4604_v21, 0.0  ;;  %v1029_v24 = vmul.f32 0.2, %v4604_v21  ;;  %4438 = vmatpush3.bf16.msra.mxu1 %v5302_v23 }
 0x166   :  { %v5308_v36 = vsub.f32 %v1039_v11, %v1098_v32  ;;  %vm1016_vm0 = vcmp.gt.f32.partialorder %v4605_v35, 0.0  ;;  %v1028_v27 = vmul.f32 0.2, %v4605_v35  ;;  %v3985_v25 = vpop.f32.mrb[6].mxu0  ;;  %4439 = vmatprep.subr.bf16.mxu1 %v4754_v4  ;;  %v5314_v34 = vsub.f32 %v5292_v56, %v1205_v30 }
 0x167   :  { %v5316_v26 = vsub.f32 %v1038_v33, %v1095_v17  ;;  %v1041_v41 = vsel %vm1017_vm15, %v4604_v21, %v1029_v24  ;;  %v4606_v37 = vadd.f32 %v3985_v25, %v5269_v7  ;;  %v978_v42 = vpop.f32.mrb[7].mxu0  ;;  %v5319_v44 = vpack.c.bf16 %v1098_v32, %v1095_v17 }
 0x168   :  { %v1219_v45 = vand.u32 4294901760, %v5308_v36  ;;  %v1104_v46 = vand.u32 4294901760, %v1041_v41  ;;  %v1040_v54 = vsel %vm1016_vm0, %v4605_v35, %v1028_v27  ;;  %v4607_v57 = vadd.f32 %v5269_v7, %v978_v42 }
 0x169   :  { %v1212_v62 = vand.u32 4294901760, %v5316_v26  ;;  %v1101_v0 = vand.u32 4294901760, %v1040_v54  ;;  %vm1019_vm1 = vcmp.gt.f32.partialorder %v4606_v37, 0.0  ;;  %v1031_v1 = vmul.f32 0.2, %v4606_v37  ;;  %4441 = vmatpush3.bf16.msra.mxu1 %v5319_v44 }
 0x16a   :  { %v5325_v12 = vsub.f32 %v1041_v41, %v1104_v46  ;;  %vm1018_vm3 = vcmp.gt.f32.partialorder %v4607_v57, 0.0  ;;  %v1030_v10 = vmul.f32 0.2, %v4607_v57  ;;  %v3988_v15 = vpop.f32.mrb[8].mxu0  ;;  %4442 = vmatprep.subr.bf16.mxu1 %v4754_v4  ;;  %v1199_v16 = vsub.f32 %v5299_v61, %v1198_v13 }
 0x16b   :  { %v5331_v18 = vsub.f32 %v1040_v54, %v1101_v0  ;;  %v1043_v20 = vsel %vm1019_vm1, %v4606_v37, %v1031_v1  ;;  %v4608_v38 = vadd.f32 %v3988_v15, %v5269_v7  ;;  %v990_v39 = vpop.f32.mrb[9].mxu0  ;;  %v5334_v43 = vpack.c.bf16 %v1104_v46, %v1101_v0 }
 0x16c   :  { %v1233_v47 = vand.u32 4294901760, %v5325_v12  ;;  %v1110_v48 = vand.u32 4294901760, %v1043_v20  ;;  %v1042_v49 = vsel %vm1018_vm3, %v4607_v57, %v1030_v10  ;;  %v4609_v50 = vadd.f32 %v5269_v7, %v990_v39 }
 0x16d   :  { %v1226_v29 = vand.u32 4294901760, %v5331_v18  ;;  %v1107_v52 = vand.u32 4294901760, %v1042_v49  ;;  %vm1021_vm4 = vcmp.gt.f32.partialorder %v4608_v38, 0.0  ;;  %v1033_v53 = vmul.f32 0.2, %v4608_v38  ;;  %4444 = vmatpush3.bf16.msra.mxu1 %v5334_v43 }
 0x16e   :  { %v5340_v58 = vsub.f32 %v1043_v20, %v1110_v48  ;;  %vm1020_vm5 = vcmp.gt.f32.partialorder %v4609_v50, 0.0  ;;  %v1032_v59 = vmul.f32 0.2, %v4609_v50  ;;  %v3991_v11 = vpop.f32.mrb[10].mxu0  ;;  %4445 = vmatprep.subr.bf16.mxu1 %v4754_v4  ;;  %v1200_v21 = vand.u32 4294901760, %v1199_v16 }
 0x16f   :  { %v5343_v22 = vsub.f32 %v1042_v49, %v1107_v52  ;;  %v1045_v32 = vsel %vm1021_vm4, %v4608_v38, %v1033_v53  ;;  %v4610_v33 = vadd.f32 %v3991_v11, %v5269_v7  ;;  %v1002_v35 = vpop.f32.mrb[11].mxu0  ;;  %v5346_v17 = vpack.c.bf16 %v1110_v48, %v1107_v52 }
 0x170   :  { %v1247_v24 = vand.u32 4294901760, %v5340_v58  ;;  %v1116_v27 = vand.u32 4294901760, %v1045_v32  ;;  %v1044_v25 = vsel %vm1020_vm5, %v4609_v50, %v1032_v59  ;;  %v4611_v41 = vadd.f32 %v5269_v7, %v1002_v35 }
 0x171   :  { %v1240_v37 = vand.u32 4294901760, %v5343_v22  ;;  %v1113_v42 = vand.u32 4294901760, %v1044_v25  ;;  %vm1023_vm6 = vcmp.gt.f32.partialorder %v4610_v33, 0.0  ;;  %v1035_v46 = vmul.f32 0.2, %v4610_v33  ;;  %4447 = vmatpush3.bf16.msra.mxu1 %v5346_v17 }
 0x172   :  { %v5352_v54 = vsub.f32 %v1045_v32, %v1116_v27  ;;  %vm1022_vm8 = vcmp.gt.f32.partialorder %v4611_v41, 0.0  ;;  %v1034_v57 = vmul.f32 0.2, %v4611_v41  ;;  %4448 = vmatprep.subr.bf16.mxu1 %v4754_v4  ;;  %v1207_v0 = vand.u32 4294901760, %v5314_v34 }
 0x173   :  { %v5356_v1 = vsub.f32 %v1044_v25, %v1113_v42  ;;  %v1047_v10 = vsel %vm1023_vm6, %v4610_v33, %v1035_v46  ;;  %v5358_v15 = vpack.c.bf16 %v1116_v27, %v1113_v42  ;;  %v1213_v7 = vsub.f32 %v5316_v26, %v1212_v62 }
 0x174   :  { %v1261_v16 = vand.u32 4294901760, %v5352_v54  ;;  %v1122_v20 = vand.u32 4294901760, %v1047_v10  ;;  %v1046_v38 = vsel %vm1022_vm8, %v4611_v41, %v1034_v57  ;;  %v4455_v39 = vpack.c.bf16 %v1207_v0, %v1200_v21 }
 0x175   :  { %v1254_v48 = vand.u32 4294901760, %v5356_v1  ;;  %v1119_v49 = vand.u32 4294901760, %v1046_v38  ;;  %4450 = vmatpush3.bf16.msra.mxu1 %v5358_v15  ;;  %v1214_v34 = vand.u32 4294901760, %v1213_v7  ;;  %v1220_v50 = vsub.f32 %v5308_v36, %v1219_v45 }
 0x176   :  { %v5369_v52 = vsub.f32 %v1047_v10, %v1122_v20  ;;  %4451 = vmatprep.subr.bf16.mxu1 %v4754_v4  ;;  %v1227_v53 = vsub.f32 %v5331_v18, %v1226_v29  ;;  %v1234_v59 = vsub.f32 %v5325_v12, %v1233_v47  ;;  %v1241_v11 = vsub.f32 %v5343_v22, %v1240_v37 }
 0x177   :  { %v5381_v21 = vsub.f32 %v1046_v38, %v1119_v49  ;;  %v5383_v32 = vpack.c.bf16 %v1122_v20, %v1119_v49  ;;  %v1221_v33 = vand.u32 4294901760, %v1220_v50  ;;  %v1248_v35 = vsub.f32 %v5340_v58, %v1247_v24 }
 0x178   :  { %v1275_v27 = vand.u32 4294901760, %v5369_v52  ;;  %v1228_v25 = vand.u32 4294901760, %v1227_v53  ;;  %v1235_v41 = vand.u32 4294901760, %v1234_v59  ;;  %v1242_v42 = vand.u32 4294901760, %v1241_v11 }
 0x179   :  { %v1268_v46 = vand.u32 4294901760, %v5381_v21  ;;  %4453 = vmatpush3.bf16.msra.mxu1 %v5383_v32  ;;  %v4458_v57 = vpack.c.bf16 %v1221_v33, %v1214_v34  ;;  %v1249_v0 = vand.u32 4294901760, %v1248_v35  ;;  %v1255_v10 = vsub.f32 %v5356_v1, %v1254_v48 }
 0x17a   :  { %4454 = vmatprep.subr.bf16.mxu1 %v4754_v4  ;;  %v4461_v7 = vpack.c.bf16 %v1235_v41, %v1228_v25  ;;  %v1262_v20 = vsub.f32 %v5352_v54, %v1261_v16  ;;  %v1276_v38 = vsub.f32 %v5369_v52, %v1275_v27  ;;  %v4473_v49 = vpack.c.bf16 %v5292_v56, %v5299_v61 }
 0x17b   :  { %v4464_v50 = vpack.c.bf16 %v1249_v0, %v1242_v42  ;;  %v1256_v53 = vand.u32 4294901760, %v1255_v10  ;;  %v1269_v59 = vsub.f32 %v5381_v21, %v1268_v46  ;;  %v4476_v34 = vpack.c.bf16 %v5308_v36, %v5316_v26  ;;  %v2430_v0 = vld [vmem:[%s5742_s6 + $0x8] sm:$0xff] }
 0x17c   :  { %4017 = vmatmul.mubr.f32.vlgmr.msra.gmra.mrb[0].mxu1 %v1169_v51  ;;  %v1263_v11 = vand.u32 4294901760, %v1262_v20  ;;  %v1277_v33 = vand.u32 4294901760, %v1276_v38  ;;  %v4479_v35 = vpack.c.bf16 %v5325_v12, %v5331_v18  ;;  %v4482_v25 = vpack.c.bf16 %v5340_v58, %v5343_v22 }
 0x17d   :  { %4456 = vmatpush3.bf16.msra.mxu1 %v4455_v39  ;;  %4019 = vmatprep.mubr.msk.f32.mxu1 %vm4755_vm2, %v4756_v3  ;;  %v1270_v41 = vand.u32 4294901760, %v1269_v59  ;;  %v4485_v42 = vpack.c.bf16 %v5352_v54, %v5356_v1  ;;  %v4488_v19 = vpack.c.bf16 %v5369_v52, %v5381_v21  ;;  %v5416_v51 = vpack.c.bf16 %v1205_v30, %v1198_v13  ;;  %v2429_v39 = vld [vmem:[%s5742_s6] sm:$0xff] }
 0x17e   :  { %4457 = vmatprep.subr.bf16.mxu1 %v4754_v4  ;;  %v4467_v54 = vpack.c.bf16 %v1263_v11, %v1256_v53  ;;  %v5429_v61 = vpack.c.bf16 %v1219_v45, %v1212_v62  ;;  %v5435_v56 = vpack.c.bf16 %v1233_v47, %v1226_v29  ;;  %v5441_v30 = vpack.c.bf16 %v1247_v24, %v1240_v37 }
 0x17f   :  { %v4470_v13 = vpack.c.bf16 %v1277_v33, %v1270_v41  ;;  %v5443_v1 = vpack.c.bf16 %v1261_v16, %v1254_v48  ;;  %v5445_v26 = vpack.c.bf16 %v1275_v27, %v1268_v46  ;;  %v1189_v36 = vand.u32 4294901760, %v5297_v60 }
 0x180   :  { %4020 = vmatmul.mubr.f32.gmra.mrb[2].mxu1 %v1179_v55  ;;  %v2442_v45 = vand.u32 4294901760, %v2429_v39  ;;  %v2445_v62 = vand.u32 4294901760, %v2430_v0 }
 0x181   :  { %4459 = vmatpush3.bf16.msra.mxu1 %v4458_v57  ;;  %4022 = vmatprep.mubr.msk.f32.mxu1 %vm4755_vm2, %v4756_v3 }
 0x182   :  { %4460 = vmatprep.subr.bf16.mxu1 %v4754_v4  ;;  %v5453_v12 = vpack.c.bf16 %v2445_v62, %v2442_v45  ;;  %v5455_v18 = vsub.f32 %v2429_v39, %v2442_v45  ;;  %v5457_v47 = vsub.f32 %v2430_v0, %v2445_v62 }
 0x184   :  { %4023 = vmatmul.mubr.f32.gmra.mrb[4].mxu1 %v1189_v36  ;;  %v2541_v28 = vand.u32 4294901760, %v5455_v18  ;;  %v2548_v55 = vand.u32 4294901760, %v5457_v47  ;;  %4564 = vmatpush3.bf16.msra.mxu0 %v5453_v12  ;;  %v4569_v37 = vpack.c.bf16 %v5457_v47, %v5455_v18 }
 0x185   :  { %4462 = vmatpush3.bf16.msra.mxu1 %v4461_v7  ;;  %4049 = vmatprep.mubr.msk.f32.mxu1 %vm4755_vm2, %v4756_v3 }
 0x186   :  { %4463 = vmatprep.subr.bf16.mxu1 %v4754_v4  ;;  %v2542_v60 = vsub.f32 %v5455_v18, %v2541_v28  ;;  %v2549_v29 = vsub.f32 %v5457_v47, %v2548_v55  ;;  %4580 = vmatprep.subr.bf16.mxu0 %v4754_v4  ;;  %v5492_v16 = vpack.c.bf16 %v2548_v55, %v2541_v28 }
 0x188   :  { %v2543_v58 = vand.u32 4294901760, %v2542_v60  ;;  %v2550_v22 = vand.u32 4294901760, %v2549_v29 }
 0x189   :  { %4465 = vmatpush3.bf16.msra.mxu1 %v4464_v50 }
 0x18a   :  { %4466 = vmatprep.subr.bf16.mxu1 %v4754_v4  ;;  %v5469_v24 = vpack.c.bf16 %v2550_v22, %v2543_v58 }
 0x18d   :  { %4468 = vmatpush3.bf16.msra.mxu1 %v4467_v54 }
 0x18e   :  { %4469 = vmatprep.subr.bf16.mxu1 %v4754_v4 }
 0x191   :  { %4471 = vmatpush3.bf16.msra.mxu1 %v4470_v13 }
 0x192   :  { %4472 = vmatprep.subr.bf16.mxu1 %v4754_v4 }
 0x194   :  { %4050 = vmatmul.mubr.msk.f32.vlgmr.msra.gmra.mrb[0].mxu1 %vm1078_vm7, %v5246_v31 }
 0x195   :  { %4474 = vmatpush3.bf16.msra.mxu1 %v4473_v49  ;;  %4052 = vmatprep.mubr.msk.f32.mxu1 %vm4755_vm2, %v4756_v3 }
 0x196   :  { %4475 = vmatprep.subr.bf16.mxu1 %v4754_v4 }
 0x198   :  { %4053 = vmatmul.mubr.msk.f32.gmra.mrb[2].mxu1 %vm1078_vm7, %v5251_v63 }
 0x199   :  { %4477 = vmatpush3.bf16.msra.mxu1 %v4476_v34  ;;  %4055 = vmatprep.mubr.msk.f32.mxu1 %vm4755_vm2, %v4756_v3 }
 0x19a   :  { %4478 = vmatprep.subr.bf16.mxu1 %v4754_v4 }
 0x19c   :  { %4056 = vmatmul.mubr.msk.f32.gmra.mrb[4].mxu1 %vm1078_vm7, %v5260_v5 }
 0x19d   :  { %4480 = vmatpush3.bf16.msra.mxu1 %v4479_v35  ;;  %4082 = vmatprep.mubr.msk.f32.mxu1 %vm4755_vm2, %v4756_v3 }
 0x19e   :  { %4481 = vmatprep.subr.bf16.mxu1 %v4754_v4 }
 0x1a1   :  { %4483 = vmatpush3.bf16.msra.mxu1 %v4482_v25 }
 0x1a2   :  { %4484 = vmatprep.subr.bf16.mxu1 %v4754_v4 }
 0x1a5   :  { %4486 = vmatpush3.bf16.msra.mxu1 %v4485_v42 }
 0x1a6   :  { %4487 = vmatprep.subr.bf16.mxu1 %v4754_v4 }
 0x1a9   :  { %4489 = vmatpush3.bf16.msra.mxu1 %v4488_v19 }
 0x1aa   :  { %4490 = vmatprep.subr.bf16.mxu1 %v4754_v4 }
 0x1ac   :  { %4083 = vmatmul.mubr.f32.vlgmr.msra.gmra.mrb[0].mxu1 %v5257_v2 }
 0x1ad   :  { %4492 = vmatpush3.bf16.msra.mxu1 %v5302_v23  ;;  %4085 = vmatprep.mubr.msk.f32.mxu1 %vm4755_vm2, %v4756_v3 }
 0x1ae   :  { %4493 = vmatprep.subr.bf16.mxu1 %v4754_v4 }
 0x1b0   :  { %4086 = vmatmul.mubr.f32.gmra.mrb[2].mxu1 %v5262_v6 }
 0x1b1   :  { %4495 = vmatpush3.bf16.msra.mxu1 %v5319_v44  ;;  %4088 = vmatprep.mubr.msk.f32.mxu1 %vm4755_vm2, %v4756_v3 }
 0x1b2   :  { %4496 = vmatprep.subr.bf16.mxu1 %v4754_v4 }
 0x1b4   :  { %4089 = vmatmul.mubr.f32.gmra.mrb[4].mxu1 %v5273_v14 }
 0x1b5   :  { %4498 = vmatpush3.bf16.msra.mxu1 %v5334_v43  ;;  %4115 = vmatprep.mubr.msk.f32.mxu1 %vm4755_vm2, %v4756_v3 }
 0x1b6   :  { %4499 = vmatprep.subr.bf16.mxu1 %v4754_v4 }
 0x1b9   :  { %4501 = vmatpush3.bf16.msra.mxu1 %v5346_v17 }
 0x1ba   :  { %4502 = vmatprep.subr.bf16.mxu1 %v4754_v4 }
 0x1bd   :  { %4504 = vmatpush3.bf16.msra.mxu1 %v5358_v15 }
 0x1be   :  { %4505 = vmatprep.subr.bf16.mxu1 %v4754_v4  ;;  %v2408_v48 = vpop.f32.mrb[12].mxu0 }
 0x1bf   :  { %v2424_v52 = vmul.f32 0.25, %v2408_v48  ;;  %v4273_v21 = vpop.f32.mrb[13].mxu0 }
 0x1c1   :  { %4507 = vmatpush3.bf16.msra.mxu1 %v5383_v32  ;;  %v2433_v27 = vsel %vm2431_vm9, %v2424_v52, 0 }
 0x1c2   :  { %4508 = vmatprep.subr.bf16.mxu1 %v4754_v4  ;;  %v5517_v46 = vand.u32 4294901760, %v2433_v27  ;;  %v2414_v57 = vpop.f32.mrb[14].mxu0 }
 0x1c3   :  { %v4276_v10 = vpop.f32.mrb[15].mxu0  ;;  %v2425_v6 = vmul.f32 0.25, %v2414_v57 }
 0x1c4   :  { %4116 = vmatmul.mubr.f32.vlgmr.msra.gmra.mrb[0].mxu1 %v1167_v8  ;;  %v5522_v7 = vsub.f32 %v2433_v27, %v5517_v46 }
 0x1c5   :  { %4510 = vmatpush3.bf16.msra.mxu1 %v5416_v51  ;;  %4118 = vmatprep.mubr.msk.f32.mxu1 %vm4755_vm2, %v4756_v3 }
 0x1c6   :  { %4511 = vmatprep.subr.bf16.mxu1 %v4754_v4  ;;  %v2510_v20 = vand.u32 4294901760, %v5522_v7  ;;  %v2420_v38 = vpop.f32.mrb[16].mxu0 }
 0x1c7   :  { %v4279_v49 = vpop.f32.mrb[17].mxu0  ;;  %v2426_v14 = vmul.f32 0.25, %v2420_v38 }
 0x1c8   :  { %4119 = vmatmul.mubr.f32.gmra.mrb[2].mxu1 %v1177_v9  ;;  %v2511_v2 = vsub.f32 %v5522_v7, %v2510_v20  ;;  %v2436_v9 = vsel %vm2431_vm9, %v2425_v6, 0 }
 0x1c9   :  { %4513 = vmatpush3.bf16.msra.mxu1 %v5429_v61  ;;  %4121 = vmatprep.mubr.msk.f32.mxu1 %vm4755_vm2, %v4756_v3 }
 0x1ca   :  { %4514 = vmatprep.subr.bf16.mxu1 %v4754_v4  ;;  %v2512_v8 = vand.u32 4294901760, %v2511_v2 }
 0x1cc   :  { %4122 = vmatmul.mubr.f32.gmra.mrb[4].mxu1 %v1187_v40  ;;  %4285 = vmatmul.mubr.f32.vlgmr.msra.gmra.mrb[18].mxu0 %v2512_v8  ;;  %v5573_v40 = vand.u32 4294901760, %v2436_v9 }
 0x1cd   :  { %4516 = vmatpush3.bf16.msra.mxu1 %v5435_v56  ;;  %4148 = vmatprep.mubr.msk.f32.mxu1 %vm4755_vm2, %v4756_v3 }
 0x1ce   :  { %4517 = vmatprep.subr.bf16.mxu1 %v4754_v4  ;;  %4362 = vmatprep.mubr.msk.f32.mxu0 %vm4755_vm2, %v4756_v3 }
 0x1d1   :  { %4519 = vmatpush3.bf16.msra.mxu1 %v5441_v30 }
 0x1d2   :  { %4520 = vmatprep.subr.bf16.mxu1 %v4754_v4 }
 0x1d5   :  { %4522 = vmatpush3.bf16.msra.mxu1 %v5443_v1 }
 0x1d6   :  { %4523 = vmatprep.subr.bf16.mxu1 %v4754_v4 }
 0x1d9   :  { %4525 = vmatpush3.bf16.msra.mxu1 %v5445_v26 }
 0x1da   :  { %4526 = vmatprep.subr.bf16.mxu1 %v4754_v4 }
 0x1dc   :  { %4149 = vmatmul.mubr.msk.f32.vlgmr.msra.gmra.mrb[0].mxu1 %vm1078_vm7, %v5246_v31 }
 0x1dd   :  { %4528 = vmatpush3.bf16.msra.mxu1 %v5302_v23  ;;  %4151 = vmatprep.mubr.msk.f32.mxu1 %vm4755_vm2, %v4756_v3  ;;  %v2439_v23 = vsel %vm2431_vm9, %v2426_v14, 0 }
 0x1de   :  { %4529 = vmatprep.subr.bf16.mxu1 %v4754_v4 }
 0x1e0   :  { %4152 = vmatmul.mubr.msk.f32.gmra.mrb[2].mxu1 %vm1078_vm7, %v5251_v63 }
 0x1e1   :  { %4531 = vmatpush3.bf16.msra.mxu1 %v5319_v44  ;;  %4154 = vmatprep.mubr.msk.f32.mxu1 %vm4755_vm2, %v4756_v3  ;;  %v2519_v44 = vsub.f32 %v2436_v9, %v5573_v40 }
 0x1e2   :  { %4532 = vmatprep.subr.bf16.mxu1 %v4754_v4 }
 0x1e4   :  { %4155 = vmatmul.mubr.msk.f32.gmra.mrb[4].mxu1 %vm1078_vm7, %v5260_v5 }
 0x1e5   :  { %4534 = vmatpush3.bf16.msra.mxu1 %v5334_v43  ;;  %4181 = vmatprep.mubr.msk.f32.mxu1 %vm4755_vm2, %v4756_v3  ;;  %v2528_v43 = vand.u32 4294901760, %v2439_v23 }
 0x1e6   :  { %4535 = vmatprep.subr.bf16.mxu1 %v4754_v4 }
 0x1e7   :  { %v2529_v50 = vsub.f32 %v2439_v23, %v2528_v43 }
 0x1e9   :  { %4537 = vmatpush3.bf16.msra.mxu1 %v5346_v17  ;;  %v2520_v17 = vand.u32 4294901760, %v2519_v44  ;;  %v2530_v53 = vand.u32 4294901760, %v2529_v50 }
 0x1ea   :  { %4538 = vmatprep.subr.bf16.mxu1 %v4754_v4 }
 0x1ed   :  { %4540 = vmatpush3.bf16.msra.mxu1 %v5358_v15  ;;  %v2521_v15 = vsub.f32 %v2519_v44, %v2520_v17 }
 0x1ee   :  { %4541 = vmatprep.subr.bf16.mxu1 %v4754_v4 }
 0x1f1   :  { %4543 = vmatpush3.bf16.msra.mxu1 %v5383_v32  ;;  %v2522_v32 = vand.u32 4294901760, %v2521_v15 }
 0x1f2   :  { %4598 = vmatprep.subr.bf16.mxu1 %v4754_v4 }
 0x1f4   :  { %4182 = vmatmul.mubr.msk.f32.vlgmr.msra.gmra.mrb[0].mxu1 %vm1078_vm7, %v5246_v31  ;;  %v2531_v31 = vsub.f32 %v2529_v50, %v2530_v53 }
 0x1f5   :  { %4184 = vmatprep.mubr.msk.f32.mxu1 %vm4755_vm2, %v4756_v3  ;;  %4599 = vmatpush3.bf16.msra.mxu1 %v5453_v12 }
 0x1f6   :  { %4565 = vmatprep.subr.bf16.mxu1 %v4754_v4  ;;  %v2532_v59 = vand.u32 4294901760, %v2531_v31 }
 0x1f8   :  { %4185 = vmatmul.mubr.msk.f32.gmra.mrb[2].mxu1 %vm1078_vm7, %v5251_v63  ;;  %v2427_v63 = vld [vmem:[%s5743_s5] sm:$0xff] }
 0x1f9   :  { %4187 = vmatprep.mubr.msk.f32.mxu1 %vm4755_vm2, %v4756_v3  ;;  %v2996_v34 = vand.u32 4294901760, %v2427_v63 }
 0x1fb   :  { %v3094_v33 = vsub.f32 %v2427_v63, %v2996_v34 }
 0x1fc   :  { %4188 = vmatmul.mubr.msk.f32.gmra.mrb[4].mxu1 %vm1078_vm7, %v5260_v5  ;;  %v2428_v5 = vld [vmem:[%s5743_s5 + $0x8] sm:$0xff] }
 0x1fd   :  { %4287 = vmatprep.mubr.msk.f32.mxu1 %vm4755_vm2, %v4756_v3  ;;  %v2999_v11 = vand.u32 4294901760, %v2428_v5  ;;  %v3095_v25 = vand.u32 4294901760, %v3094_v33 }
 0x1ff   :  { %v3101_v35 = vsub.f32 %v2428_v5, %v2999_v11  ;;  %v4581_v42 = vpack.c.bf16 %v2999_v11, %v2996_v34  ;;  %v3096_v51 = vsub.f32 %v3094_v33, %v3095_v25 }
 0x200   :  { %4288 = vmatmul.mubr.f32.vlgmr.msra.gmra.mrb[6].mxu1 %v2522_v32 }
 0x201   :  { %4290 = vmatprep.mubr.msk.f32.mxu1 %vm4755_vm2, %v4756_v3  ;;  %4567 = vmatpush3.bf16.msra.mxu1 %v5469_v24  ;;  %v3102_v41 = vand.u32 4294901760, %v3101_v35  ;;  %v4587_v19 = vpack.c.bf16 %v3101_v35, %v3094_v33  ;;  %v3097_v0 = vand.u32 4294901760, %v3096_v51 }
 0x202   :  { %4568 = vmatprep.subr.bf16.mxu1 %v4754_v4  ;;  %4582 = vmatpush3.bf16.msra.mxu0 %v4581_v42 }
 0x203   :  { %v3103_v39 = vsub.f32 %v3101_v35, %v3102_v41  ;;  %4586 = vmatprep.subr.bf16.mxu0 %v4754_v4  ;;  %v4593_v56 = vpack.c.bf16 %v3102_v41, %v3095_v25 }
 0x204   :  { %4291 = vmatmul.mubr.f32.gmra.mrb[8].mxu1 %v2532_v59 }
 0x205   :  { %4297 = vmatprep.mubr.msk.f32.mxu1 %vm4755_vm2, %v4756_v3  ;;  %v3104_v54 = vand.u32 4294901760, %v3103_v39 }
 0x207   :  { %v4584_v61 = vpack.c.bf16 %v3104_v54, %v3097_v0 }
 0x208   :  { %4298 = vmatmul.mubr.f32.vlgmr.msra.gmra.mrb[10].mxu1 %v5517_v46 }
 0x209   :  { %4300 = vmatprep.mubr.msk.f32.mxu1 %vm4755_vm2, %v4756_v3  ;;  %4570 = vmatpush3.bf16.msra.mxu1 %v4569_v37 }
 0x20a   :  { %4571 = vmatprep.subr.bf16.mxu1 %v4754_v4 }
 0x20c   :  { %4301 = vmatmul.mubr.f32.gmra.mrb[12].mxu1 %v5573_v40 }
 0x20d   :  { %4303 = vmatprep.mubr.msk.f32.mxu1 %vm4755_vm2, %v4756_v3 }
 0x210   :  { %4304 = vmatmul.mubr.f32.gmra.mrb[14].mxu1 %v2528_v43 }
 0x211   :  { %4310 = vmatprep.mubr.msk.f32.mxu1 %vm4755_vm2, %v4756_v3 }
 0x214   :  { %4311 = vmatmul.mubr.f32.vlgmr.msra.gmra.mrb[16].mxu1 %v5522_v7 }
 0x215   :  { %4313 = vmatprep.mubr.msk.f32.mxu1 %vm4755_vm2, %v4756_v3  ;;  %4573 = vmatpush3.bf16.msra.mxu1 %v5453_v12 }
 0x216   :  { %4574 = vmatprep.subr.bf16.mxu1 %v4754_v4 }
 0x218   :  { %4314 = vmatmul.mubr.f32.gmra.mrb[18].mxu1 %v2519_v44 }
 0x219   :  { %4316 = vmatprep.mubr.msk.f32.mxu1 %vm4755_vm2, %v4756_v3 }
 0x21c   :  { %4317 = vmatmul.mubr.f32.gmra.mrb[20].mxu1 %v2529_v50 }
 0x21d   :  { %4323 = vmatprep.mubr.msk.f32.mxu1 %vm4755_vm2, %v4756_v3 }
 0x220   :  { %4324 = vmatmul.mubr.f32.vlgmr.msra.gmra.mrb[22].mxu1 %v2510_v20 }
 0x221   :  { %4326 = vmatprep.mubr.msk.f32.mxu1 %vm4755_vm2, %v4756_v3  ;;  %4576 = vmatpush3.bf16.msra.mxu1 %v5492_v16 }
 0x222   :  { %4577 = vmatprep.subr.bf16.mxu1 %v4754_v4 }
 0x224   :  { %4327 = vmatmul.mubr.f32.gmra.mrb[24].mxu1 %v2520_v17 }
 0x225   :  { %4329 = vmatprep.mubr.msk.f32.mxu1 %vm4755_vm2, %v4756_v3 }
 0x228   :  { %4330 = vmatmul.mubr.f32.gmra.mrb[26].mxu1 %v2530_v53 }
 0x229   :  { %4336 = vmatprep.mubr.msk.f32.mxu1 %vm4755_vm2, %v4756_v3 }
 0x22c   :  { %4337 = vmatmul.mubr.f32.vlgmr.msra.gmra.mrb[28].mxu1 %v5517_v46 }
 0x22d   :  { %4339 = vmatprep.mubr.msk.f32.mxu1 %vm4755_vm2, %v4756_v3  ;;  %4579 = vmatpush3.bf16.msra.mxu1 %v5453_v12 }
 0x22e   :  { %4583 = vmatprep.subr.bf16.mxu1 %v4754_v4 }
 0x230   :  { %4340 = vmatmul.mubr.f32.gmra.mrb[30].mxu1 %v5573_v40 }
 0x231   :  { %4342 = vmatprep.mubr.msk.f32.mxu1 %vm4755_vm2, %v4756_v3 }
 0x234   :  { %4343 = vmatmul.mubr.f32.gmra.mrb[32].mxu1 %v2528_v43 }
 0x235   :  { %4349 = vmatprep.mubr.msk.f32.mxu1 %vm4755_vm2, %v4756_v3 }
 0x238   :  { %4350 = vmatmul.mubr.f32.vlgmr.msra.gmra.mrb[34].mxu1 %v5517_v46 }
 0x239   :  { %4352 = vmatprep.mubr.msk.f32.mxu1 %vm4755_vm2, %v4756_v3  ;;  %4585 = vmatpush3.bf16.msra.mxu1 %v4584_v61 }
 0x23a   :  { %4589 = vmatprep.subr.bf16.mxu1 %v4754_v4 }
 0x23c   :  { %4353 = vmatmul.mubr.f32.gmra.mrb[36].mxu1 %v5573_v40 }
 0x23d   :  { %4355 = vmatprep.mubr.msk.f32.mxu1 %vm4755_vm2, %v4756_v3 }
 0x240   :  { %4356 = vmatmul.mubr.f32.gmra.mrb[38].mxu1 %v2528_v43 }
 0x241   :  { %4375 = vmatprep.mubr.msk.f32.mxu1 %vm4755_vm2, %v4756_v3 }
 0x29f   :  { %v2514_v30 = vpop.f32.mrb[18].mxu0 }
 0x2a0   :  { %v4286_v13 = vpop.f32.mrb[19].mxu0 }
 0x2c7   :  { %v1747_v1 = vpop.f32.mrb[0].mxu1 }
 0x2c8   :  { %v1763_v26 = vmul.f32 0.25, %v1747_v1  ;;  %v4183_v36 = vpop.f32.mrb[1].mxu1 }
 0x2ca   :  { %v2987_v45 = vsel %vm2431_vm9, %v1763_v26, 0 }
 0x2cb   :  { %v5659_v62 = vand.u32 4294901760, %v2987_v45  ;;  %v1753_v12 = vpop.f32.mrb[2].mxu1 }
 0x2cc   :  { %v1764_v18 = vmul.f32 0.25, %v1753_v12  ;;  %v4186_v47 = vpop.f32.mrb[3].mxu1 }
 0x2cd   :  { %v3063_v28 = vsub.f32 %v2987_v45, %v5659_v62  ;;  %4376 = vmatmul.mubr.f32.vlgmr.msra.gmra.mrb[40].mxu1 %v5659_v62 }
 0x2ce   :  { %v2990_v55 = vsel %vm2431_vm9, %v1764_v18, 0  ;;  %4378 = vmatprep.mubr.msk.f32.mxu1 %vm4755_vm2, %v4756_v3  ;;  %4591 = vmatpush3.bf16.msra.mxu1 %v4581_v42 }
 0x2cf   :  { %v3064_v60 = vand.u32 4294901760, %v3063_v28  ;;  %v5666_v29 = vand.u32 4294901760, %v2990_v55  ;;  %v1759_v58 = vpop.f32.mrb[4].mxu1  ;;  %4595 = vmatprep.subr.bf16.mxu1 %v4754_v4 }
 0x2d0   :  { %v1765_v22 = vmul.f32 0.25, %v1759_v58  ;;  %v4189_v24 = vpop.f32.mrb[5].mxu1 }
 0x2d1   :  { %v3073_v37 = vsub.f32 %v2990_v55, %v5666_v29  ;;  %4379 = vmatmul.mubr.f32.gmra.mrb[42].mxu1 %v5666_v29  ;;  %v3065_v16 = vsub.f32 %v3063_v28, %v3064_v60 }
 0x2d2   :  { %v2993_v48 = vsel %vm2431_vm9, %v1765_v22, 0  ;;  %4381 = vmatprep.mubr.msk.f32.mxu1 %vm4755_vm2, %v4756_v3 }
 0x2d3   :  { %v5674_v52 = vand.u32 4294901760, %v2993_v48  ;;  %v3066_v21 = vand.u32 4294901760, %v3065_v16  ;;  %v3074_v27 = vand.u32 4294901760, %v3073_v37  ;;  %v2524_v46 = vpop.f32.mrb[6].mxu1 }
 0x2d4   :  { %v4289_v57 = vpop.f32.mrb[7].mxu1 }
 0x2d5   :  { %v3083_v10 = vsub.f32 %v2993_v48, %v5674_v52  ;;  %4363 = vmatmul.mubr.f32.vlgmr.msra.gmra.mrb[20].mxu0 %v3066_v21  ;;  %4382 = vmatmul.mubr.f32.gmra.mrb[44].mxu1 %v5674_v52  ;;  %v3075_v7 = vsub.f32 %v3073_v37, %v3074_v27 }
 0x2d6   :  { %4588 = vmatpush3.bf16.msra.mxu0 %v4587_v19  ;;  %4365 = vmatprep.mubr.msk.f32.mxu0 %vm4755_vm2, %v4756_v3 }
 0x2d7   :  { %4401 = vmatprep.mubr.msk.f32.mxu1 %vm4755_vm2, %v4756_v3  ;;  %v3076_v20 = vand.u32 4294901760, %v3075_v7  ;;  %v3084_v38 = vand.u32 4294901760, %v3083_v10  ;;  %4592 = vmatprep.subr.bf16.mxu0 %v4754_v4  ;;  %v2534_v49 = vpop.f32.mrb[8].mxu1 }
 0x2d8   :  { %v4292_v2 = vpop.f32.mrb[9].mxu1 }
 0x2d9   :  { %4366 = vmatmul.mubr.f32.gmra.mrb[22].mxu0 %v3076_v20  ;;  %4402 = vmatmul.mubr.f32.vlgmr.msra.gmra.mrb[46].mxu1 %v3064_v60  ;;  %v3085_v8 = vsub.f32 %v3083_v10, %v3084_v38 }
 0x2da   :  { %4368 = vmatprep.mubr.msk.f32.mxu0 %vm4755_vm2, %v4756_v3  ;;  %4404 = vmatprep.mubr.msk.f32.mxu1 %vm4755_vm2, %v4756_v3 }
 0x2db   :  { %v3086_v6 = vand.u32 4294901760, %v3085_v8  ;;  %4597 = vmatpush3.bf16.msra.mxu1 %v4581_v42  ;;  %v2615_v9 = vpop.f32.mrb[10].mxu1 }
 0x2dc   :  { %v4299_v14 = vpop.f32.mrb[11].mxu1  ;;  %v2616_v40 = vadd.f32 %v2615_v9, %v2514_v30 }
 0x2dd   :  { %4369 = vmatmul.mubr.f32.gmra.mrb[24].mxu0 %v3086_v6  ;;  %4405 = vmatmul.mubr.f32.gmra.mrb[48].mxu1 %v3074_v27 }
 0x2de   :  { %4388 = vmatprep.mubr.msk.f32.mxu0 %vm4755_vm2, %v4756_v3  ;;  %4407 = vmatprep.mubr.msk.f32.mxu1 %vm4755_vm2, %v4756_v3 }
 0x2df   :  { %v2621_v4 = vpop.f32.mrb[12].mxu1 }
 0x2e0   :  { %v2622_v23 = vadd.f32 %v2621_v4, %v2524_v46  ;;  %v4302_v44 = vpop.f32.mrb[13].mxu1 }
 0x2e1   :  { %4389 = vmatmul.mubr.f32.vlgmr.msra.gmra.mrb[26].mxu0 %v3063_v28  ;;  %4408 = vmatmul.mubr.f32.gmra.mrb[50].mxu1 %v3084_v38 }
 0x2e2   :  { %4594 = vmatpush3.bf16.msra.mxu0 %v4593_v56  ;;  %4391 = vmatprep.mubr.msk.f32.mxu0 %vm4755_vm2, %v4756_v3 }
 0x2e3   :  { %4427 = vmatprep.mubr.msk.f32.mxu1 %vm4755_vm2, %v4756_v3  ;;  %v2627_v43 = vpop.f32.mrb[14].mxu1 }
 0x2e4   :  { %v2628_v17 = vadd.f32 %v2627_v43, %v2534_v49  ;;  %v4305_v50 = vpop.f32.mrb[15].mxu1 }
 0x2e5   :  { %4392 = vmatmul.mubr.f32.gmra.mrb[28].mxu0 %v3073_v37  ;;  %4428 = vmatmul.mubr.f32.vlgmr.msra.gmra.mrb[52].mxu1 %v5659_v62 }
 0x2e6   :  { %4394 = vmatprep.mubr.msk.f32.mxu0 %vm4755_vm2, %v4756_v3  ;;  %4430 = vmatprep.mubr.msk.f32.mxu1 %vm4755_vm2, %v4756_v3 }
 0x2e7   :  { %v2703_v15 = vpop.f32.mrb[16].mxu1 }
 0x2e8   :  { %v4312_v53 = vpop.f32.mrb[17].mxu1  ;;  %v2704_v32 = vadd.f32 %v2703_v15, %v2616_v40 }
 0x2e9   :  { %4395 = vmatmul.mubr.f32.gmra.mrb[30].mxu0 %v3083_v10  ;;  %4431 = vmatmul.mubr.f32.gmra.mrb[54].mxu1 %v5666_v29 }
 0x2ea   :  { %4414 = vmatprep.mubr.msk.f32.mxu0 %vm4755_vm2, %v4756_v3  ;;  %4433 = vmatprep.mubr.msk.f32.mxu1 %vm4755_vm2, %v4756_v3 }
 0x2eb   :  { %v2710_v31 = vpop.f32.mrb[18].mxu1 }
 0x2ec   :  { %v2711_v59 = vadd.f32 %v2710_v31, %v2622_v23  ;;  %v4315_v63 = vpop.f32.mrb[19].mxu1 }
 0x2ed   :  { %4415 = vmatmul.mubr.f32.vlgmr.msra.gmra.mrb[32].mxu0 %v5659_v62  ;;  %4434 = vmatmul.mubr.f32.gmra.mrb[56].mxu1 %v5674_v52 }
 0x2ee   :  { %4417 = vmatprep.mubr.msk.f32.mxu0 %vm4755_vm2, %v4756_v3 }
 0x2ef   :  { %v2717_v5 = vpop.f32.mrb[20].mxu1 }
 0x2f0   :  { %v2718_v34 = vadd.f32 %v2717_v5, %v2628_v17  ;;  %v4318_v11 = vpop.f32.mrb[21].mxu1 }
 0x2f1   :  { %4418 = vmatmul.mubr.f32.gmra.mrb[34].mxu0 %v5666_v29 }
 0x2f2   :  { %4420 = vmatprep.mubr.msk.f32.mxu0 %vm4755_vm2, %v4756_v3 }
 0x2f3   :  { %v2792_v33 = vpop.f32.mrb[22].mxu1 }
 0x2f4   :  { %v4325_v35 = vpop.f32.mrb[23].mxu1  ;;  %v2793_v25 = vadd.f32 %v2792_v33, %v2704_v32 }
 0x2f5   :  { %4421 = vmatmul.mubr.f32.gmra.mrb[36].mxu0 %v5674_v52 }
 0x2f7   :  { %v2800_v41 = vpop.f32.mrb[24].mxu1 }
 0x2f8   :  { %v2801_v42 = vadd.f32 %v2800_v41, %v2711_v59  ;;  %v4328_v19 = vpop.f32.mrb[25].mxu1 }
 0x2fb   :  { %v2808_v51 = vpop.f32.mrb[26].mxu1 }
 0x2fc   :  { %v2809_v39 = vadd.f32 %v2808_v51, %v2718_v34  ;;  %v4331_v0 = vpop.f32.mrb[27].mxu1 }
 0x2fd   :  { %v3607_v0 = vld [vmem:[%s5744_s7] ss:$0 sm:$0xff] }
 0x2ff   :  { %v2885_v54 = vpop.f32.mrb[28].mxu1 }
 0x300   :  { %v2886_v61 = vadd.f32 %v2885_v54, %v2793_v25  ;;  %v4338_v56 = vpop.f32.mrb[29].mxu1 }
 0x303   :  { %v2891_v30 = vpop.f32.mrb[30].mxu1 }
 0x304   :  { %v2892_v13 = vadd.f32 %v2891_v30, %v2801_v42  ;;  %v4341_v1 = vpop.f32.mrb[31].mxu1 }
 0x307   :  { %v2897_v26 = vpop.f32.mrb[32].mxu1 }
 0x308   :  { %v2898_v36 = vadd.f32 %v2897_v26, %v2809_v39  ;;  %v4344_v3 = vpop.f32.mrb[33].mxu1  ;;  %v3559_v26 = vld [vmem:[%s5745_s8] sm:$0xff] }
 0x30b   :  { %v2970_v45 = vpop.f32.mrb[34].mxu1 }
 0x30c   :  { %v2971_v62 = vadd.f32 %v2970_v45, %v2886_v61  ;;  %v4351_v12 = vpop.f32.mrb[35].mxu1 }
 0x30f   :  { %v2976_v18 = vpop.f32.mrb[36].mxu1 }
 0x310   :  { %v2977_v47 = vadd.f32 %v2976_v18, %v2892_v13  ;;  %v4354_v28 = vpop.f32.mrb[37].mxu1 }
 0x313   :  { %v2982_v55 = vpop.f32.mrb[38].mxu1 }
 0x314   :  { %v2983_v60 = vadd.f32 %v2982_v55, %v2898_v36  ;;  %v4357_v29 = vpop.f32.mrb[39].mxu1  ;;  %v3560_v55 = vld [vmem:[%s5745_s8 + $0x8] sm:$0xff] }
 0x3a0   :  { %v3169_v58 = vpop.f32.mrb[40].mxu1 }
 0x3a1   :  { %v4377_v22 = vpop.f32.mrb[41].mxu1 }
 0x3a4   :  { %v3175_v24 = vpop.f32.mrb[42].mxu1 }
 0x3a5   :  { %v4380_v37 = vpop.f32.mrb[43].mxu1 }
 0x3a8   :  { %v3068_v16 = vpop.f32.mrb[20].mxu0  ;;  %v3181_v48 = vpop.f32.mrb[44].mxu1 }
 0x3a9   :  { %v3069_v52 = vadd.f32 %v3068_v16, %v2971_v62  ;;  %v4364_v21 = vpop.f32.mrb[21].mxu0  ;;  %v4383_v27 = vpop.f32.mrb[45].mxu1 }
 0x3ab   :  { %v3170_v46 = vadd.f32 %v3169_v58, %v3069_v52 }
 0x3ac   :  { %v3078_v57 = vpop.f32.mrb[22].mxu0  ;;  %v3346_v10 = vpop.f32.mrb[46].mxu1 }
 0x3ad   :  { %v3079_v7 = vadd.f32 %v3078_v57, %v2977_v47  ;;  %v4367_v20 = vpop.f32.mrb[23].mxu0  ;;  %v4403_v38 = vpop.f32.mrb[47].mxu1 }
 0x3af   :  { %v3176_v49 = vadd.f32 %v3175_v24, %v3079_v7 }
 0x3b0   :  { %v3088_v2 = vpop.f32.mrb[24].mxu0  ;;  %v3354_v8 = vpop.f32.mrb[48].mxu1 }
 0x3b1   :  { %v3089_v6 = vadd.f32 %v3088_v2, %v2983_v60  ;;  %v4370_v9 = vpop.f32.mrb[25].mxu0  ;;  %v4406_v14 = vpop.f32.mrb[49].mxu1 }
 0x3b3   :  { %v3182_v40 = vadd.f32 %v3181_v48, %v3089_v6  ;;  %v3561_v48 = vld [vmem:[%s5745_s8 + $0x10] sm:$0xff] }
 0x3b4   :  { %v3257_v4 = vpop.f32.mrb[26].mxu0  ;;  %v3362_v23 = vpop.f32.mrb[50].mxu1 }
 0x3b5   :  { %v3258_v44 = vadd.f32 %v3257_v4, %v3170_v46  ;;  %v4390_v43 = vpop.f32.mrb[27].mxu0  ;;  %v4409_v17 = vpop.f32.mrb[51].mxu1 }
 0x3b7   :  { %v3347_v50 = vadd.f32 %v3346_v10, %v3258_v44 }
 0x3b8   :  { %v3264_v15 = vpop.f32.mrb[28].mxu0  ;;  %v3524_v53 = vpop.f32.mrb[52].mxu1 }
 0x3b9   :  { %v3265_v32 = vadd.f32 %v3264_v15, %v3176_v49  ;;  %v4393_v31 = vpop.f32.mrb[29].mxu0  ;;  %v4429_v59 = vpop.f32.mrb[53].mxu1 }
 0x3bb   :  { %v3355_v63 = vadd.f32 %v3354_v8, %v3265_v32 }
 0x3bc   :  { %v3271_v5 = vpop.f32.mrb[30].mxu0  ;;  %v3530_v34 = vpop.f32.mrb[54].mxu1 }
 0x3bd   :  { %v3272_v11 = vadd.f32 %v3271_v5, %v3182_v40  ;;  %v4396_v33 = vpop.f32.mrb[31].mxu0  ;;  %v4432_v35 = vpop.f32.mrb[55].mxu1 }
 0x3bf   :  { %v3363_v25 = vadd.f32 %v3362_v23, %v3272_v11 }
 0x3c0   :  { %v3439_v41 = vpop.f32.mrb[32].mxu0  ;;  %v3536_v42 = vpop.f32.mrb[56].mxu1 }
 0x3c1   :  { %v3440_v19 = vadd.f32 %v3439_v41, %v3347_v50  ;;  %v4416_v51 = vpop.f32.mrb[33].mxu0  ;;  %v4435_v39 = vpop.f32.mrb[57].mxu1 }
 0x3c3   :  { %v3525_v54 = vadd.f32 %v3524_v53, %v3440_v19 }
 0x3c4   :  { %v3445_v61 = vpop.f32.mrb[34].mxu0 }
 0x3c5   :  { %v3547_v56 = vadd.f32 %v3607_v0, %v3525_v54  ;;  %v3446_v30 = vadd.f32 %v3445_v61, %v3355_v63  ;;  %v4419_v13 = vpop.f32.mrb[35].mxu0 }
 0x3c7   :  { %vm3550_vm2 = vcmp.gt.f32.partialorder %v3547_v56, 0.0  ;;  %v3553_v1 = vmul.f32 0.2, %v3547_v56  ;;  %v3531_v36 = vadd.f32 %v3530_v34, %v3446_v30 }
 0x3c8   :  { %v3451_v3 = vpop.f32.mrb[36].mxu0 }
 0x3c9   :  { %v3556_v45 = vsel %vm3550_vm2, %v3547_v56, %v3553_v1  ;;  %v3548_v62 = vadd.f32 %v3607_v0, %v3531_v36  ;;  %v3452_v12 = vadd.f32 %v3451_v3, %v3363_v25  ;;  %v4422_v18 = vpop.f32.mrb[37].mxu0 }
 0x3ca   :  { %v3562_v47 = vadd.f32 %v3559_v26, %v3556_v45 }
 0x3cb   :  { %vm3551_vm7 = vcmp.gt.f32.partialorder %v3548_v62, 0.0  ;;  %v3554_v28 = vmul.f32 0.2, %v3548_v62  ;;  %v3537_v60 = vadd.f32 %v3536_v42, %v3452_v12 }
 0x3cc   :  { %vm3565_vm10 = vcmp.gt.f32.partialorder %v3562_v47, 0.0  ;;  %v3568_v29 = vmul.f32 0.2, %v3562_v47 }
 0x3cd   :  { %v3557_v58 = vsel %vm3551_vm7, %v3548_v62, %v3554_v28  ;;  %v3549_v22 = vadd.f32 %v3607_v0, %v3537_v60 }
 0x3ce   :  { %v3571_v24 = vsel %vm3565_vm10, %v3562_v47, %v3568_v29  ;;  %v3563_v37 = vadd.f32 %v3560_v55, %v3557_v58 }
 0x3cf   :  { %3575 = vst.msk [vmem:[%s5746_s9] sm:$0xff] %vm3574_vm11, %v3571_v24  ;;  %vm3552_vm12 = vcmp.gt.f32.partialorder %v3549_v22, 0.0  ;;  %v3555_v16 = vmul.f32 0.2, %v3549_v22 }
 0x3d0   :  { %vm3566_vm13 = vcmp.gt.f32.partialorder %v3563_v37, 0.0  ;;  %v3569_v52 = vmul.f32 0.2, %v3563_v37 }
 0x3d1   :  { %v3558_v21 = vsel %vm3552_vm12, %v3549_v22, %v3555_v16 }
 0x3d2   :  { %v3572_v27 = vsel %vm3566_vm13, %v3563_v37, %v3569_v52  ;;  %v3564_v46 = vadd.f32 %v3561_v48, %v3558_v21 }
 0x3d3   :  { %3576 = vst.msk [vmem:[%s5746_s9 + $0x8] sm:$0xff] %vm3574_vm11, %v3572_v27 }
 0x3d4   :  { %vm3567_vm14 = vcmp.gt.f32.partialorder %v3564_v46, 0.0  ;;  %v3570_v57 = vmul.f32 0.2, %v3564_v46 }
 0x3d6   :  { %v3573_v10 = vsel %vm3567_vm14, %v3564_v46, %v3570_v57 }
 0x3d7   :  { %3577 = vst.msk [vmem:[%s5746_s9 + $0x10] sm:$0xff] %vm3574_vm11, %v3573_v10 }

</bundles_post_ra>
